<compile_context>
chip_gen: v5e
topology: v5e:2x2
jax: 0.10.0
libtpu: 0.0.40
codegen_flags: <defaults>
</compile_context>

<pallas_src>
import functools

import jax
import jax.numpy as jnp
from jax import lax
from jax.experimental import pallas as pl
from jax.experimental.pallas import tpu as pltpu


def _round_up(x, m):
    return ((x + m - 1) // m) * m


def _gru_recurrence_kernel(x_ref, h0_ref, wih_ref, whh_ref, brz_ref, bhn_ref,
                           h_out_ref, h_scratch, *, chunk, hp):
    """One time-chunk of the GRU recurrence for one batch block.

    Grid: (batch_block [parallel], time_chunk [arbitrary/sequential]).

    x_ref:     (chunk, BB, Ip)   raw input slice (projection fused in-kernel)
    h0_ref:    (BB, Hp)          initial hidden state for this batch block
    wih_ref:   (Ip, 3*Hp)        W_ih^T, gate-padded layout
    whh_ref:   (Hp, 3*Hp)        W_hh^T, gate-padded layout
    brz_ref:   (1, 3*Hp)         b_ih (all gates) + b_hh (r,z gates only)
    bhn_ref:   (1, Hp)           b_hh for the candidate (n) gate
    h_out_ref: (chunk, BB, Hp)   per-step hidden states (lane-dense)
    h_scratch: (BB, Hp) f32      hidden state carried across time chunks
    """
    c = pl.program_id(1)
    bb = h_scratch.shape[0]

    @pl.when(c == 0)
    def _():
        h_scratch[...] = h0_ref[...].astype(jnp.float32)

    # Hoisted bias loads/broadcasts (JAX does not CSE broadcast_in_dim, so
    # leaving them inside the unrolled loop costs `chunk` redundant copies).
    bias_rz = jnp.broadcast_to(brz_ref[...], (bb, 3 * hp))
    bias_n = jnp.broadcast_to(bhn_ref[...], (bb, hp))

    def step(i, h_prev):
        # Fused input projection: independent of the h carry, so the LLO
        # scheduler can overlap it with the previous step's dependent chain.
        gi = jnp.dot(x_ref[i], wih_ref[...],
                     preferred_element_type=jnp.float32) + bias_rz
        # The only matmul on the serial critical path.
        # TODO(synk): bf16 operands / pltpu.matmul_push_rhs staging would cut
        # its latency on v6e/v7x (needs a relaxed reference tolerance).
        gh = jnp.dot(h_prev, whh_ref[...], preferred_element_type=jnp.float32)
        # 128-aligned lane slices (Hp is a multiple of 128).
        r = jax.nn.sigmoid(gi[:, 0:hp] + gh[:, 0:hp])
        z = jax.nn.sigmoid(gi[:, hp:2 * hp] + gh[:, hp:2 * hp])
        n = jnp.tanh(gi[:, 2 * hp:3 * hp]
                     + r * (gh[:, 2 * hp:3 * hp] + bias_n))
        h_new = (1.0 - z) * n + z * h_prev
        h_out_ref[i] = h_new.astype(h_out_ref.dtype)
        return h_new

    # Hidden state stays in vregs across the chunk; a single VMEM round-trip
    # per chunk (cross-chunk carry) instead of one per timestep.
    h_final = lax.fori_loop(0, chunk, step, h_scratch[...], unroll=True)
    h_scratch[...] = h_final


def decoder_mse_forward(x, h0, params, *, time_chunk=32):
    """x: (T, B, I) f32 time-major (equal-length "packed" batch);
    h0: (1, B, H) f32.  Returns (output (B, T, O), hidden (1, B, H))."""
    T, B, I = x.shape
    H = params["b_hh"].shape[0] // 3

    f32 = jnp.float32
    Hp = _round_up(H, 128)              # lane-aligned hidden -> free gate slices
    Ip = _round_up(I, 128)              # tile-aligned K for the fused gi matmul
    TC = min(time_chunk, T)
    Tp = _round_up(T, TC)
    n_chunks = Tp // TC

    # Batch blocking: give each TensorCore an independent batch slice on
    # multi-core parts (v7x); a single block otherwise.
    Bp = _round_up(max(B, 8), 8)
    nb = 2 if Bp >= 16 else 1
    BB = _round_up(-(-Bp // nb), 8)
    Bp = nb * BB

    # --- Gate-padded weight layouts: gate g occupies lanes [g*Hp, g*Hp+H). --
    w_ih = params["w_ih"].astype(f32).reshape(3, H, I)
    w_hh = params["w_hh"].astype(f32).reshape(3, H, H)
    b_ih = params["b_ih"].astype(f32).reshape(3, H)
    b_hh = params["b_hh"].astype(f32).reshape(3, H)

    w_ih_p = jnp.zeros((3, Hp, Ip), f32).at[:, :H, :I].set(w_ih)
    w_hh_p = jnp.zeros((3, Hp, Hp), f32).at[:, :H, :H].set(w_hh)
    b_ih_p = jnp.zeros((3, Hp), f32).at[:, :H].set(b_ih)
    b_hh_p = jnp.zeros((3, Hp), f32).at[:, :H].set(b_hh)

    # Fold b_ih fully and the r/z parts of b_hh into the fused input
    # projection; b_hh(n) must stay inside the recurrence (gated by r).
    bias_rz = b_ih_p.at[0:2].add(b_hh_p[0:2]).reshape(1, 3 * Hp)
    b_hh_n = b_hh_p[2].reshape(1, Hp)

    wih_t = w_ih_p.reshape(3 * Hp, Ip).T            # (Ip, 3Hp)
    whh_t = w_hh_p.reshape(3 * Hp, Hp).T            # (Hp, 3Hp)

    # Pad raw inputs only (no gate-padded gi round-trip through HBM).
    x_p = jnp.zeros((Tp, Bp, Ip), f32).at[:T, :B, :I].set(x.astype(f32))
    h0_p = jnp.zeros((Bp, Hp), f32).at[:B, :H].set(h0[0].astype(f32))

    kernel = functools.partial(_gru_recurrence_kernel, chunk=TC, hp=Hp)

    # Explicit VMEM budget: double-buffered x / h_out chunks + weights + scratch.
    blk_bytes = 4 * (
        TC * BB * Ip                    # x chunk
        + TC * BB * Hp                  # h_out chunk
        + Ip * 3 * Hp                   # W_ih^T
        + Hp * 3 * Hp                   # W_hh^T
        + 8 * 3 * Hp + 8 * Hp           # biases (sublane-padded)
        + BB * Hp                       # h0
    )
    vmem_limit = int(min(max(2 * blk_bytes + 4 * BB * Hp + (4 << 20), 16 << 20),
                         64 << 20))

    h_all_p = pl.pallas_call(
        kernel,
        out_shape=jax.ShapeDtypeStruct((Tp, Bp, Hp), f32),
        grid_spec=pltpu.PrefetchScalarGridSpec(
            num_scalar_prefetch=0,
            grid=(nb, n_chunks),
            in_specs=[
                pl.BlockSpec((TC, BB, Ip), lambda b, c: (c, b, 0)),    # x chunk
                pl.BlockSpec((BB, Hp), lambda b, c: (b, 0)),           # h0
                pl.BlockSpec((Ip, 3 * Hp), lambda b, c: (0, 0)),       # W_ih^T
                pl.BlockSpec((Hp, 3 * Hp), lambda b, c: (0, 0)),       # W_hh^T
                pl.BlockSpec((1, 3 * Hp), lambda b, c: (0, 0)),        # b (r,z folded)
                pl.BlockSpec((1, Hp), lambda b, c: (0, 0)),            # b_hh(n)
            ],
            out_specs=pl.BlockSpec((TC, BB, Hp), lambda b, c: (c, b, 0)),
            scratch_shapes=[pltpu.VMEM((BB, Hp), jnp.float32)],
        ),
        compiler_params=pltpu.CompilerParams(
            # Batch blocks are independent (megacore-parallel on v7x); time
            # chunks carry h_scratch and must stay sequential.
            dimension_semantics=("parallel", "arbitrary"),
            vmem_limit_bytes=vmem_limit),
    )(x_p, h0_p, wih_t, whh_t, bias_rz, b_hh_n)

    # Strip padding; final hidden is just the last emitted state.
    h_all = h_all_p[:T, :B, :H]                    # (T, B, H)
    hidden = h_all[T - 1][None]                    # (1, B, H)

    # Output Linear head: one lane-dense batched matmul, off the serial path.
    # TODO(synk): on v5e, emitting h_all in bf16 would halve the writeback
    # bytes but fails the 1e-5 reference check kept here.
    unpacked = jnp.transpose(h_all, (1, 0, 2))     # (B, T, H)
    output = unpacked @ params["w_out"].astype(f32).T + params["b_out"].astype(f32)
    return output.astype(x.dtype), hidden.astype(x.dtype)


def _reference_forward(x, h0, params):
    """Pure-JAX reference (torch.nn.GRU semantics)."""
    H = params["b_hh"].shape[0] // 3
    w_ih, w_hh = params["w_ih"], params["w_hh"]
    b_ih, b_hh = params["b_ih"], params["b_hh"]

    def step(h, x_t):
        gi = x_t @ w_ih.T + b_ih
        gh = h @ w_hh.T + b_hh
        i_r, i_z, i_n = gi[:, :H], gi[:, H:2 * H], gi[:, 2 * H:]
        h_r, h_z, h_n = gh[:, :H], gh[:, H:2 * H], gh[:, 2 * H:]
        r = jax.nn.sigmoid(i_r + h_r)
        z = jax.nn.sigmoid(i_z + h_z)
        n = jnp.tanh(i_n + r * h_n)
        h_new = (1.0 - z) * n + z * h
        return h_new, h_new

    h_final, hs = jax.lax.scan(step, h0[0], x)
    unpacked = jnp.transpose(hs, (1, 0, 2))                       # (B, T, H)
    out = unpacked @ params["w_out"].T + params["b_out"]
    return out, h_final[None]


def init_params(key, input_size, hidden_size, output_size):
    ks = jax.random.split(key, 6)
    bound = 1.0 / jnp.sqrt(hidden_size)
    u = lambda k, shape: jax.random.uniform(k, shape, jnp.float32, -bound, bound)
    return {
        "w_ih": u(ks[0], (3 * hidden_size, input_size)),
        "w_hh": u(ks[1], (3 * hidden_size, hidden_size)),
        "b_ih": u(ks[2], (3 * hidden_size,)),
        "b_hh": u(ks[3], (3 * hidden_size,)),
        "w_out": u(ks[4], (output_size, hidden_size)),
        "b_out": u(ks[5], (output_size,)),
    }


if __name__ == "__main__":
    T, B = 8, 4
    input_size, hidden_size, output_size = 16, 32, 8

    key = jax.random.PRNGKey(0)
    k_x, k_h, k_p = jax.random.split(key, 3)
    x = jax.random.normal(k_x, (T, B, input_size), jnp.float32)    # packed (equal-len) input
    h0 = jax.random.normal(k_h, (1, B, hidden_size), jnp.float32)  # init_hidden
    params = init_params(k_p, input_size, hidden_size, output_size)

    out, hidden = decoder_mse_forward(x, h0, params)
    out, hidden = jax.block_until_ready((out, hidden))

    ref_out, ref_hidden = _reference_forward(x, h0, params)
    assert out.shape == (B, T, output_size)
    assert hidden.shape == (1, B, hidden_size)
    assert jnp.allclose(out, ref_out, atol=1e-5, rtol=1e-5)
    assert jnp.allclose(hidden, ref_hidden, atol=1e-5, rtol=1e-5)

    print("KERNEL_OK")
</pallas_src>

<mosaic_0001>
module attributes {stable_mosaic.version = 11 : i64} {
  func.func @_gru_recurrence_kernel(%arg0: i32, %arg1: i32, %arg2: memref<8x8x128xf32, #tpu.memory_space<vmem>>, %arg3: memref<8x128xf32, #tpu.memory_space<vmem>>, %arg4: memref<128x384xf32, #tpu.memory_space<vmem>>, %arg5: memref<128x384xf32, #tpu.memory_space<vmem>>, %arg6: memref<1x384xf32, #tpu.memory_space<vmem>>, %arg7: memref<1x128xf32, #tpu.memory_space<vmem>>, %arg8: memref<8x8x128xf32, #tpu.memory_space<vmem>>, %arg9: memref<8x128xf32, #tpu.memory_space<vmem>>) attributes {dimension_semantics = [#tpu.dimension_semantics<parallel>, #tpu.dimension_semantics<arbitrary>], iteration_bounds = array<i64: 1, 1>, scalar_prefetch = 0 : i64, scratch_operands = 1 : i64, tpu.core_type = #tpu.core_type<tc>, window_params = [{transform_indices = @transform_0, window_bounds = array<i64: 8, 8, 128>}, {transform_indices = @transform_1, window_bounds = array<i64: 8, 128>}, {pipeline_mode = #tpu.pipeline_mode<synchronous>, transform_indices = @transform_2, window_bounds = array<i64: 128, 384>}, {pipeline_mode = #tpu.pipeline_mode<synchronous>, transform_indices = @transform_3, window_bounds = array<i64: 128, 384>}, {pipeline_mode = #tpu.pipeline_mode<synchronous>, transform_indices = @transform_4, window_bounds = array<i64: 1, 384>}, {pipeline_mode = #tpu.pipeline_mode<synchronous>, transform_indices = @transform_5, window_bounds = array<i64: 1, 128>}, {transform_indices = @transform_6, window_bounds = array<i64: 8, 8, 128>}]} {
    %c0_i32 = arith.constant 0 : i32
    %0 = arith.cmpi eq, %arg1, %c0_i32 : i32
    %1 = arith.extui %0 : i1 to i32
    %c0_i32_0 = arith.constant 0 : i32
    %2 = arith.cmpi ne, %1, %c0_i32_0 : i32
    scf.if %2 {
      %c0_112 = arith.constant 0 : index
      %c0_113 = arith.constant 0 : index
      %323 = vector.load %arg3[%c0_112, %c0_113] : memref<8x128xf32, #tpu.memory_space<vmem>>, vector<8x128xf32>
      %c0_114 = arith.constant 0 : index
      %c0_115 = arith.constant 0 : index
      %324 = vector.load %arg9[%c0_114, %c0_115] : memref<8x128xf32, #tpu.memory_space<vmem>>, vector<8x128xf32>
      tpu.vector_store %arg9[%c0_114, %c0_115], %323 {strides = array<i32>} : memref<8x128xf32, #tpu.memory_space<vmem>>, vector<8x128xf32>,
    } else {
    }
    %c0 = arith.constant 0 : index
    %c0_1 = arith.constant 0 : index
    %3 = vector.load %arg6[%c0, %c0_1] : memref<1x384xf32, #tpu.memory_space<vmem>>, vector<1x384xf32>
    %4 = vector.shape_cast %3 : vector<1x384xf32> to vector<1x384xf32>
    %5 = vector.broadcast %4 : vector<1x384xf32> to vector<8x384xf32>
    %c0_2 = arith.constant 0 : index
    %c0_3 = arith.constant 0 : index
    %6 = vector.load %arg7[%c0_2, %c0_3] : memref<1x128xf32, #tpu.memory_space<vmem>>, vector<1x128xf32>
    %7 = vector.shape_cast %6 : vector<1x128xf32> to vector<1x128xf32>
    %8 = vector.broadcast %7 : vector<1x128xf32> to vector<8x128xf32>
    %c0_4 = arith.constant 0 : index
    %c0_5 = arith.constant 0 : index
    %9 = vector.load %arg9[%c0_4, %c0_5] : memref<8x128xf32, #tpu.memory_space<vmem>>, vector<8x128xf32>
    %c0_i32_6 = arith.constant 0 : i32
    %10 = arith.index_cast %c0_i32_6 : i32 to index
    %c0_7 = arith.constant 0 : index
    %c0_8 = arith.constant 0 : index
    %11 = vector.load %arg2[%10, %c0_7, %c0_8] : memref<8x8x128xf32, #tpu.memory_space<vmem>>, vector<1x8x128xf32>
    %12 = vector.shape_cast %11 : vector<1x8x128xf32> to vector<8x128xf32>
    %c0_9 = arith.constant 0 : index
    %c0_10 = arith.constant 0 : index
    %13 = vector.load %arg4[%c0_9, %c0_10] : memref<128x384xf32, #tpu.memory_space<vmem>>, vector<128x384xf32>
    %cst = arith.constant dense<0.000000e+00> : vector<8x384xf32>
    %14 = tpu.matmul %12, %13, %cst {dimension_numbers = #tpu.dot_dimension_numbers<[1], [0], [0], [1], [0, 0, 1, 1], [], []>} : vector<8x128xf32>, vector<128x384xf32>, vector<8x384xf32> -> vector<8x384xf32>
    %15 = arith.addf %14, %5 : vector<8x384xf32>
    %c0_11 = arith.constant 0 : index
    %c0_12 = arith.constant 0 : index
    %16 = vector.load %arg5[%c0_11, %c0_12] : memref<128x384xf32, #tpu.memory_space<vmem>>, vector<128x384xf32>
    %cst_13 = arith.constant dense<0.000000e+00> : vector<8x384xf32>
    %17 = tpu.matmul %9, %16, %cst_13 {dimension_numbers = #tpu.dot_dimension_numbers<[1], [0], [0], [1], [0, 0, 1, 1], [], []>} : vector<8x128xf32>, vector<128x384xf32>, vector<8x384xf32> -> vector<8x384xf32>
    %18 = vector.extract_strided_slice %15 {offsets = [0, 0], sizes = [8, 128], strides = [1, 1]} : vector<8x384xf32> to vector<8x128xf32>
    %19 = vector.extract_strided_slice %17 {offsets = [0, 0], sizes = [8, 128], strides = [1, 1]} : vector<8x384xf32> to vector<8x128xf32>
    %20 = arith.addf %18, %19 : vector<8x128xf32>
    %21 = arith.negf %20 : vector<8x128xf32>
    %22 = math.exp %21 : vector<8x128xf32>
    %cst_14 = arith.constant 1.000000e+00 : f32
    %23 = vector.broadcast %cst_14 : f32 to vector<8x128xf32>
    %24 = arith.addf %23, %22 : vector<8x128xf32>
    %25 = arith.divf %23, %24 : vector<8x128xf32>
    %26 = vector.extract_strided_slice %15 {offsets = [0, 128], sizes = [8, 128], strides = [1, 1]} : vector<8x384xf32> to vector<8x128xf32>
    %27 = vector.extract_strided_slice %17 {offsets = [0, 128], sizes = [8, 128], strides = [1, 1]} : vector<8x384xf32> to vector<8x128xf32>
    %28 = arith.addf %26, %27 : vector<8x128xf32>
    %29 = arith.negf %28 : vector<8x128xf32>
    %30 = math.exp %29 : vector<8x128xf32>
    %cst_15 = arith.constant 1.000000e+00 : f32
    %31 = vector.broadcast %cst_15 : f32 to vector<8x128xf32>
    %32 = arith.addf %31, %30 : vector<8x128xf32>
    %33 = arith.divf %31, %32 : vector<8x128xf32>
    %34 = vector.extract_strided_slice %15 {offsets = [0, 256], sizes = [8, 128], strides = [1, 1]} : vector<8x384xf32> to vector<8x128xf32>
    %35 = vector.extract_strided_slice %17 {offsets = [0, 256], sizes = [8, 128], strides = [1, 1]} : vector<8x384xf32> to vector<8x128xf32>
    %36 = arith.addf %35, %8 : vector<8x128xf32>
    %37 = arith.mulf %25, %36 : vector<8x128xf32>
    %38 = arith.addf %34, %37 : vector<8x128xf32>
    %39 = math.tanh %38 : vector<8x128xf32>
    %cst_16 = arith.constant 1.000000e+00 : f32
    %40 = vector.broadcast %cst_16 : f32 to vector<8x128xf32>
    %41 = arith.subf %40, %33 : vector<8x128xf32>
    %42 = arith.mulf %41, %39 : vector<8x128xf32>
    %43 = arith.mulf %33, %9 : vector<8x128xf32>
    %44 = arith.addf %42, %43 : vector<8x128xf32>
    %45 = arith.index_cast %c0_i32_6 : i32 to index
    %c0_17 = arith.constant 0 : index
    %c0_18 = arith.constant 0 : index
    %46 = vector.load %arg8[%45, %c0_17, %c0_18] : memref<8x8x128xf32, #tpu.memory_space<vmem>>, vector<1x8x128xf32>
    %47 = vector.shape_cast %46 : vector<1x8x128xf32> to vector<8x128xf32>
    %48 = vector.shape_cast %44 : vector<8x128xf32> to vector<1x8x128xf32>
    tpu.vector_store %arg8[%45, %c0_17, %c0_18], %48 {strides = array<i32>} : memref<8x8x128xf32, #tpu.memory_space<vmem>>, vector<1x8x128xf32>,
    %c1_i32 = arith.constant 1 : i32
    %49 = arith.index_cast %c1_i32 : i32 to index
    %c0_19 = arith.constant 0 : index
    %c0_20 = arith.constant 0 : index
    %50 = vector.load %arg2[%49, %c0_19, %c0_20] : memref<8x8x128xf32, #tpu.memory_space<vmem>>, vector<1x8x128xf32>
    %51 = vector.shape_cast %50 : vector<1x8x128xf32> to vector<8x128xf32>
    %c0_21 = arith.constant 0 : index
    %c0_22 = arith.constant 0 : index
    %52 = vector.load %arg4[%c0_21, %c0_22] : memref<128x384xf32, #tpu.memory_space<vmem>>, vector<128x384xf32>
    %cst_23 = arith.constant dense<0.000000e+00> : vector<8x384xf32>
    %53 = tpu.matmul %51, %52, %cst_23 {dimension_numbers = #tpu.dot_dimension_numbers<[1], [0], [0], [1], [0, 0, 1, 1], [], []>} : vector<8x128xf32>, vector<128x384xf32>, vector<8x384xf32> -> vector<8x384xf32>
    %54 = arith.addf %53, %5 : vector<8x384xf32>
    %c0_24 = arith.constant 0 : index
    %c0_25 = arith.constant 0 : index
    %55 = vector.load %arg5[%c0_24, %c0_25] : memref<128x384xf32, #tpu.memory_space<vmem>>, vector<128x384xf32>
    %cst_26 = arith.constant dense<0.000000e+00> : vector<8x384xf32>
    %56 = tpu.matmul %44, %55, %cst_26 {dimension_numbers = #tpu.dot_dimension_numbers<[1], [0], [0], [1], [0, 0, 1, 1], [], []>} : vector<8x128xf32>, vector<128x384xf32>, vector<8x384xf32> -> vector<8x384xf32>
    %57 = vector.extract_strided_slice %54 {offsets = [0, 0], sizes = [8, 128], strides = [1, 1]} : vector<8x384xf32> to vector<8x128xf32>
    %58 = vector.extract_strided_slice %56 {offsets = [0, 0], sizes = [8, 128], strides = [1, 1]} : vector<8x384xf32> to vector<8x128xf32>
    %59 = arith.addf %57, %58 : vector<8x128xf32>
    %60 = arith.negf %59 : vector<8x128xf32>
    %61 = math.exp %60 : vector<8x128xf32>
    %cst_27 = arith.constant 1.000000e+00 : f32
    %62 = vector.broadcast %cst_27 : f32 to vector<8x128xf32>
    %63 = arith.addf %62, %61 : vector<8x128xf32>
    %64 = arith.divf %62, %63 : vector<8x128xf32>
    %65 = vector.extract_strided_slice %54 {offsets = [0, 128], sizes = [8, 128], strides = [1, 1]} : vector<8x384xf32> to vector<8x128xf32>
    %66 = vector.extract_strided_slice %56 {offsets = [0, 128], sizes = [8, 128], strides = [1, 1]} : vector<8x384xf32> to vector<8x128xf32>
    %67 = arith.addf %65, %66 : vector<8x128xf32>
    %68 = arith.negf %67 : vector<8x128xf32>
    %69 = math.exp %68 : vector<8x128xf32>
    %cst_28 = arith.constant 1.000000e+00 : f32
    %70 = vector.broadcast %cst_28 : f32 to vector<8x128xf32>
    %71 = arith.addf %70, %69 : vector<8x128xf32>
    %72 = arith.divf %70, %71 : vector<8x128xf32>
    %73 = vector.extract_strided_slice %54 {offsets = [0, 256], sizes = [8, 128], strides = [1, 1]} : vector<8x384xf32> to vector<8x128xf32>
    %74 = vector.extract_strided_slice %56 {offsets = [0, 256], sizes = [8, 128], strides = [1, 1]} : vector<8x384xf32> to vector<8x128xf32>
    %75 = arith.addf %74, %8 : vector<8x128xf32>
    %76 = arith.mulf %64, %75 : vector<8x128xf32>
    %77 = arith.addf %73, %76 : vector<8x128xf32>
    %78 = math.tanh %77 : vector<8x128xf32>
    %cst_29 = arith.constant 1.000000e+00 : f32
    %79 = vector.broadcast %cst_29 : f32 to vector<8x128xf32>
    %80 = arith.subf %79, %72 : vector<8x128xf32>
    %81 = arith.mulf %80, %78 : vector<8x128xf32>
    %82 = arith.mulf %72, %44 : vector<8x128xf32>
    %83 = arith.addf %81, %82 : vector<8x128xf32>
    %84 = arith.index_cast %c1_i32 : i32 to index
    %c0_30 = arith.constant 0 : index
    %c0_31 = arith.constant 0 : index
    %85 = vector.load %arg8[%84, %c0_30, %c0_31] : memref<8x8x128xf32, #tpu.memory_space<vmem>>, vector<1x8x128xf32>
    %86 = vector.shape_cast %85 : vector<1x8x128xf32> to vector<8x128xf32>
    %87 = vector.shape_cast %83 : vector<8x128xf32> to vector<1x8x128xf32>
    tpu.vector_store %arg8[%84, %c0_30, %c0_31], %87 {strides = array<i32>} : memref<8x8x128xf32, #tpu.memory_space<vmem>>, vector<1x8x128xf32>,
    %c2_i32 = arith.constant 2 : i32
    %88 = arith.index_cast %c2_i32 : i32 to index
    %c0_32 = arith.constant 0 : index
    %c0_33 = arith.constant 0 : index
    %89 = vector.load %arg2[%88, %c0_32, %c0_33] : memref<8x8x128xf32, #tpu.memory_space<vmem>>, vector<1x8x128xf32>
    %90 = vector.shape_cast %89 : vector<1x8x128xf32> to vector<8x128xf32>
    %c0_34 = arith.constant 0 : index
    %c0_35 = arith.constant 0 : index
    %91 = vector.load %arg4[%c0_34, %c0_35] : memref<128x384xf32, #tpu.memory_space<vmem>>, vector<128x384xf32>
    %cst_36 = arith.constant dense<0.000000e+00> : vector<8x384xf32>
    %92 = tpu.matmul %90, %91, %cst_36 {dimension_numbers = #tpu.dot_dimension_numbers<[1], [0], [0], [1], [0, 0, 1, 1], [], []>} : vector<8x128xf32>, vector<128x384xf32>, vector<8x384xf32> -> vector<8x384xf32>
    %93 = arith.addf %92, %5 : vector<8x384xf32>
    %c0_37 = arith.constant 0 : index
    %c0_38 = arith.constant 0 : index
    %94 = vector.load %arg5[%c0_37, %c0_38] : memref<128x384xf32, #tpu.memory_space<vmem>>, vector<128x384xf32>
    %cst_39 = arith.constant dense<0.000000e+00> : vector<8x384xf32>
    %95 = tpu.matmul %83, %94, %cst_39 {dimension_numbers = #tpu.dot_dimension_numbers<[1], [0], [0], [1], [0, 0, 1, 1], [], []>} : vector<8x128xf32>, vector<128x384xf32>, vector<8x384xf32> -> vector<8x384xf32>
    %96 = vector.extract_strided_slice %93 {offsets = [0, 0], sizes = [8, 128], strides = [1, 1]} : vector<8x384xf32> to vector<8x128xf32>
    %97 = vector.extract_strided_slice %95 {offsets = [0, 0], sizes = [8, 128], strides = [1, 1]} : vector<8x384xf32> to vector<8x128xf32>
    %98 = arith.addf %96, %97 : vector<8x128xf32>
    %99 = arith.negf %98 : vector<8x128xf32>
    %100 = math.exp %99 : vector<8x128xf32>
    %cst_40 = arith.constant 1.000000e+00 : f32
    %101 = vector.broadcast %cst_40 : f32 to vector<8x128xf32>
    %102 = arith.addf %101, %100 : vector<8x128xf32>
    %103 = arith.divf %101, %102 : vector<8x128xf32>
    %104 = vector.extract_strided_slice %93 {offsets = [0, 128], sizes = [8, 128], strides = [1, 1]} : vector<8x384xf32> to vector<8x128xf32>
    %105 = vector.extract_strided_slice %95 {offsets = [0, 128], sizes = [8, 128], strides = [1, 1]} : vector<8x384xf32> to vector<8x128xf32>
    %106 = arith.addf %104, %105 : vector<8x128xf32>
    %107 = arith.negf %106 : vector<8x128xf32>
    %108 = math.exp %107 : vector<8x128xf32>
    %cst_41 = arith.constant 1.000000e+00 : f32
    %109 = vector.broadcast %cst_41 : f32 to vector<8x128xf32>
    %110 = arith.addf %109, %108 : vector<8x128xf32>
    %111 = arith.divf %109, %110 : vector<8x128xf32>
    %112 = vector.extract_strided_slice %93 {offsets = [0, 256], sizes = [8, 128], strides = [1, 1]} : vector<8x384xf32> to vector<8x128xf32>
    %113 = vector.extract_strided_slice %95 {offsets = [0, 256], sizes = [8, 128], strides = [1, 1]} : vector<8x384xf32> to vector<8x128xf32>
    %114 = arith.addf %113, %8 : vector<8x128xf32>
    %115 = arith.mulf %103, %114 : vector<8x128xf32>
    %116 = arith.addf %112, %115 : vector<8x128xf32>
    %117 = math.tanh %116 : vector<8x128xf32>
    %cst_42 = arith.constant 1.000000e+00 : f32
    %118 = vector.broadcast %cst_42 : f32 to vector<8x128xf32>
    %119 = arith.subf %118, %111 : vector<8x128xf32>
    %120 = arith.mulf %119, %117 : vector<8x128xf32>
    %121 = arith.mulf %111, %83 : vector<8x128xf32>
    %122 = arith.addf %120, %121 : vector<8x128xf32>
    %123 = arith.index_cast %c2_i32 : i32 to index
    %c0_43 = arith.constant 0 : index
    %c0_44 = arith.constant 0 : index
    %124 = vector.load %arg8[%123, %c0_43, %c0_44] : memref<8x8x128xf32, #tpu.memory_space<vmem>>, vector<1x8x128xf32>
    %125 = vector.shape_cast %124 : vector<1x8x128xf32> to vector<8x128xf32>
    %126 = vector.shape_cast %122 : vector<8x128xf32> to vector<1x8x128xf32>
    tpu.vector_store %arg8[%123, %c0_43, %c0_44], %126 {strides = array<i32>} : memref<8x8x128xf32, #tpu.memory_space<vmem>>, vector<1x8x128xf32>,
    %c3_i32 = arith.constant 3 : i32
    %127 = arith.index_cast %c3_i32 : i32 to index
    %c0_45 = arith.constant 0 : index
    %c0_46 = arith.constant 0 : index
    %128 = vector.load %arg2[%127, %c0_45, %c0_46] : memref<8x8x128xf32, #tpu.memory_space<vmem>>, vector<1x8x128xf32>
    %129 = vector.shape_cast %128 : vector<1x8x128xf32> to vector<8x128xf32>
    %c0_47 = arith.constant 0 : index
    %c0_48 = arith.constant 0 : index
    %130 = vector.load %arg4[%c0_47, %c0_48] : memref<128x384xf32, #tpu.memory_space<vmem>>, vector<128x384xf32>
    %cst_49 = arith.constant dense<0.000000e+00> : vector<8x384xf32>
    %131 = tpu.matmul %129, %130, %cst_49 {dimension_numbers = #tpu.dot_dimension_numbers<[1], [0], [0], [1], [0, 0, 1, 1], [], []>} : vector<8x128xf32>, vector<128x384xf32>, vector<8x384xf32> -> vector<8x384xf32>
    %132 = arith.addf %131, %5 : vector<8x384xf32>
    %c0_50 = arith.constant 0 : index
    %c0_51 = arith.constant 0 : index
    %133 = vector.load %arg5[%c0_50, %c0_51] : memref<128x384xf32, #tpu.memory_space<vmem>>, vector<128x384xf32>
    %cst_52 = arith.constant dense<0.000000e+00> : vector<8x384xf32>
    %134 = tpu.matmul %122, %133, %cst_52 {dimension_numbers = #tpu.dot_dimension_numbers<[1], [0], [0], [1], [0, 0, 1, 1], [], []>} : vector<8x128xf32>, vector<128x384xf32>, vector<8x384xf32> -> vector<8x384xf32>
    %135 = vector.extract_strided_slice %132 {offsets = [0, 0], sizes = [8, 128], strides = [1, 1]} : vector<8x384xf32> to vector<8x128xf32>
    %136 = vector.extract_strided_slice %134 {offsets = [0, 0], sizes = [8, 128], strides = [1, 1]} : vector<8x384xf32> to vector<8x128xf32>
    %137 = arith.addf %135, %136 : vector<8x128xf32>
    %138 = arith.negf %137 : vector<8x128xf32>
    %139 = math.exp %138 : vector<8x128xf32>
    %cst_53 = arith.constant 1.000000e+00 : f32
    %140 = vector.broadcast %cst_53 : f32 to vector<8x128xf32>
    %141 = arith.addf %140, %139 : vector<8x128xf32>
    %142 = arith.divf %140, %141 : vector<8x128xf32>
    %143 = vector.extract_strided_slice %132 {offsets = [0, 128], sizes = [8, 128], strides = [1, 1]} : vector<8x384xf32> to vector<8x128xf32>
    %144 = vector.extract_strided_slice %134 {offsets = [0, 128], sizes = [8, 128], strides = [1, 1]} : vector<8x384xf32> to vector<8x128xf32>
    %145 = arith.addf %143, %144 : vector<8x128xf32>
    %146 = arith.negf %145 : vector<8x128xf32>
    %147 = math.exp %146 : vector<8x128xf32>
    %cst_54 = arith.constant 1.000000e+00 : f32
    %148 = vector.broadcast %cst_54 : f32 to vector<8x128xf32>
    %149 = arith.addf %148, %147 : vector<8x128xf32>
    %150 = arith.divf %148, %149 : vector<8x128xf32>
    %151 = vector.extract_strided_slice %132 {offsets = [0, 256], sizes = [8, 128], strides = [1, 1]} : vector<8x384xf32> to vector<8x128xf32>
    %152 = vector.extract_strided_slice %134 {offsets = [0, 256], sizes = [8, 128], strides = [1, 1]} : vector<8x384xf32> to vector<8x128xf32>
    %153 = arith.addf %152, %8 : vector<8x128xf32>
    %154 = arith.mulf %142, %153 : vector<8x128xf32>
    %155 = arith.addf %151, %154 : vector<8x128xf32>
    %156 = math.tanh %155 : vector<8x128xf32>
    %cst_55 = arith.constant 1.000000e+00 : f32
    %157 = vector.broadcast %cst_55 : f32 to vector<8x128xf32>
    %158 = arith.subf %157, %150 : vector<8x128xf32>
    %159 = arith.mulf %158, %156 : vector<8x128xf32>
    %160 = arith.mulf %150, %122 : vector<8x128xf32>
    %161 = arith.addf %159, %160 : vector<8x128xf32>
    %162 = arith.index_cast %c3_i32 : i32 to index
    %c0_56 = arith.constant 0 : index
    %c0_57 = arith.constant 0 : index
    %163 = vector.load %arg8[%162, %c0_56, %c0_57] : memref<8x8x128xf32, #tpu.memory_space<vmem>>, vector<1x8x128xf32>
    %164 = vector.shape_cast %163 : vector<1x8x128xf32> to vector<8x128xf32>
    %165 = vector.shape_cast %161 : vector<8x128xf32> to vector<1x8x128xf32>
    tpu.vector_store %arg8[%162, %c0_56, %c0_57], %165 {strides = array<i32>} : memref<8x8x128xf32, #tpu.memory_space<vmem>>, vector<1x8x128xf32>,
    %c4_i32 = arith.constant 4 : i32
    %166 = arith.index_cast %c4_i32 : i32 to index
    %c0_58 = arith.constant 0 : index
    %c0_59 = arith.constant 0 : index
    %167 = vector.load %arg2[%166, %c0_58, %c0_59] : memref<8x8x128xf32, #tpu.memory_space<vmem>>, vector<1x8x128xf32>
    %168 = vector.shape_cast %167 : vector<1x8x128xf32> to vector<8x128xf32>
    %c0_60 = arith.constant 0 : index
    %c0_61 = arith.constant 0 : index
    %169 = vector.load %arg4[%c0_60, %c0_61] : memref<128x384xf32, #tpu.memory_space<vmem>>, vector<128x384xf32>
    %cst_62 = arith.constant dense<0.000000e+00> : vector<8x384xf32>
    %170 = tpu.matmul %168, %169, %cst_62 {dimension_numbers = #tpu.dot_dimension_numbers<[1], [0], [0], [1], [0, 0, 1, 1], [], []>} : vector<8x128xf32>, vector<128x384xf32>, vector<8x384xf32> -> vector<8x384xf32>
    %171 = arith.addf %170, %5 : vector<8x384xf32>
    %c0_63 = arith.constant 0 : index
    %c0_64 = arith.constant 0 : index
    %172 = vector.load %arg5[%c0_63, %c0_64] : memref<128x384xf32, #tpu.memory_space<vmem>>, vector<128x384xf32>
    %cst_65 = arith.constant dense<0.000000e+00> : vector<8x384xf32>
    %173 = tpu.matmul %161, %172, %cst_65 {dimension_numbers = #tpu.dot_dimension_numbers<[1], [0], [0], [1], [0, 0, 1, 1], [], []>} : vector<8x128xf32>, vector<128x384xf32>, vector<8x384xf32> -> vector<8x384xf32>
    %174 = vector.extract_strided_slice %171 {offsets = [0, 0], sizes = [8, 128], strides = [1, 1]} : vector<8x384xf32> to vector<8x128xf32>
    %175 = vector.extract_strided_slice %173 {offsets = [0, 0], sizes = [8, 128], strides = [1, 1]} : vector<8x384xf32> to vector<8x128xf32>
    %176 = arith.addf %174, %175 : vector<8x128xf32>
    %177 = arith.negf %176 : vector<8x128xf32>
    %178 = math.exp %177 : vector<8x128xf32>
    %cst_66 = arith.constant 1.000000e+00 : f32
    %179 = vector.broadcast %cst_66 : f32 to vector<8x128xf32>
    %180 = arith.addf %179, %178 : vector<8x128xf32>
    %181 = arith.divf %179, %180 : vector<8x128xf32>
    %182 = vector.extract_strided_slice %171 {offsets = [0, 128], sizes = [8, 128], strides = [1, 1]} : vector<8x384xf32> to vector<8x128xf32>
    %183 = vector.extract_strided_slice %173 {offsets = [0, 128], sizes = [8, 128], strides = [1, 1]} : vector<8x384xf32> to vector<8x128xf32>
    %184 = arith.addf %182, %183 : vector<8x128xf32>
    %185 = arith.negf %184 : vector<8x128xf32>
    %186 = math.exp %185 : vector<8x128xf32>
    %cst_67 = arith.constant 1.000000e+00 : f32
    %187 = vector.broadcast %cst_67 : f32 to vector<8x128xf32>
    %188 = arith.addf %187, %186 : vector<8x128xf32>
    %189 = arith.divf %187, %188 : vector<8x128xf32>
    %190 = vector.extract_strided_slice %171 {offsets = [0, 256], sizes = [8, 128], strides = [1, 1]} : vector<8x384xf32> to vector<8x128xf32>
    %191 = vector.extract_strided_slice %173 {offsets = [0, 256], sizes = [8, 128], strides = [1, 1]} : vector<8x384xf32> to vector<8x128xf32>
    %192 = arith.addf %191, %8 : vector<8x128xf32>
    %193 = arith.mulf %181, %192 : vector<8x128xf32>
    %194 = arith.addf %190, %193 : vector<8x128xf32>
    %195 = math.tanh %194 : vector<8x128xf32>
    %cst_68 = arith.constant 1.000000e+00 : f32
    %196 = vector.broadcast %cst_68 : f32 to vector<8x128xf32>
    %197 = arith.subf %196, %189 : vector<8x128xf32>
    %198 = arith.mulf %197, %195 : vector<8x128xf32>
    %199 = arith.mulf %189, %161 : vector<8x128xf32>
    %200 = arith.addf %198, %199 : vector<8x128xf32>
    %201 = arith.index_cast %c4_i32 : i32 to index
    %c0_69 = arith.constant 0 : index
    %c0_70 = arith.constant 0 : index
    %202 = vector.load %arg8[%201, %c0_69, %c0_70] : memref<8x8x128xf32, #tpu.memory_space<vmem>>, vector<1x8x128xf32>
    %203 = vector.shape_cast %202 : vector<1x8x128xf32> to vector<8x128xf32>
    %204 = vector.shape_cast %200 : vector<8x128xf32> to vector<1x8x128xf32>
    tpu.vector_store %arg8[%201, %c0_69, %c0_70], %204 {strides = array<i32>} : memref<8x8x128xf32, #tpu.memory_space<vmem>>, vector<1x8x128xf32>,
    %c5_i32 = arith.constant 5 : i32
    %205 = arith.index_cast %c5_i32 : i32 to index
    %c0_71 = arith.constant 0 : index
    %c0_72 = arith.constant 0 : index
    %206 = vector.load %arg2[%205, %c0_71, %c0_72] : memref<8x8x128xf32, #tpu.memory_space<vmem>>, vector<1x8x128xf32>
    %207 = vector.shape_cast %206 : vector<1x8x128xf32> to vector<8x128xf32>
    %c0_73 = arith.constant 0 : index
    %c0_74 = arith.constant 0 : index
    %208 = vector.load %arg4[%c0_73, %c0_74] : memref<128x384xf32, #tpu.memory_space<vmem>>, vector<128x384xf32>
    %cst_75 = arith.constant dense<0.000000e+00> : vector<8x384xf32>
    %209 = tpu.matmul %207, %208, %cst_75 {dimension_numbers = #tpu.dot_dimension_numbers<[1], [0], [0], [1], [0, 0, 1, 1], [], []>} : vector<8x128xf32>, vector<128x384xf32>, vector<8x384xf32> -> vector<8x384xf32>
    %210 = arith.addf %209, %5 : vector<8x384xf32>
    %c0_76 = arith.constant 0 : index
    %c0_77 = arith.constant 0 : index
    %211 = vector.load %arg5[%c0_76, %c0_77] : memref<128x384xf32, #tpu.memory_space<vmem>>, vector<128x384xf32>
    %cst_78 = arith.constant dense<0.000000e+00> : vector<8x384xf32>
    %212 = tpu.matmul %200, %211, %cst_78 {dimension_numbers = #tpu.dot_dimension_numbers<[1], [0], [0], [1], [0, 0, 1, 1], [], []>} : vector<8x128xf32>, vector<128x384xf32>, vector<8x384xf32> -> vector<8x384xf32>
    %213 = vector.extract_strided_slice %210 {offsets = [0, 0], sizes = [8, 128], strides = [1, 1]} : vector<8x384xf32> to vector<8x128xf32>
    %214 = vector.extract_strided_slice %212 {offsets = [0, 0], sizes = [8, 128], strides = [1, 1]} : vector<8x384xf32> to vector<8x128xf32>
    %215 = arith.addf %213, %214 : vector<8x128xf32>
    %216 = arith.negf %215 : vector<8x128xf32>
    %217 = math.exp %216 : vector<8x128xf32>
    %cst_79 = arith.constant 1.000000e+00 : f32
    %218 = vector.broadcast %cst_79 : f32 to vector<8x128xf32>
    %219 = arith.addf %218, %217 : vector<8x128xf32>
    %220 = arith.divf %218, %219 : vector<8x128xf32>
    %221 = vector.extract_strided_slice %210 {offsets = [0, 128], sizes = [8, 128], strides = [1, 1]} : vector<8x384xf32> to vector<8x128xf32>
    %222 = vector.extract_strided_slice %212 {offsets = [0, 128], sizes = [8, 128], strides = [1, 1]} : vector<8x384xf32> to vector<8x128xf32>
    %223 = arith.addf %221, %222 : vector<8x128xf32>
    %224 = arith.negf %223 : vector<8x128xf32>
    %225 = math.exp %224 : vector<8x128xf32>
    %cst_80 = arith.constant 1.000000e+00 : f32
    %226 = vector.broadcast %cst_80 : f32 to vector<8x128xf32>
    %227 = arith.addf %226, %225 : vector<8x128xf32>
    %228 = arith.divf %226, %227 : vector<8x128xf32>
    %229 = vector.extract_strided_slice %210 {offsets = [0, 256], sizes = [8, 128], strides = [1, 1]} : vector<8x384xf32> to vector<8x128xf32>
    %230 = vector.extract_strided_slice %212 {offsets = [0, 256], sizes = [8, 128], strides = [1, 1]} : vector<8x384xf32> to vector<8x128xf32>
    %231 = arith.addf %230, %8 : vector<8x128xf32>
    %232 = arith.mulf %220, %231 : vector<8x128xf32>
    %233 = arith.addf %229, %232 : vector<8x128xf32>
    %234 = math.tanh %233 : vector<8x128xf32>
    %cst_81 = arith.constant 1.000000e+00 : f32
    %235 = vector.broadcast %cst_81 : f32 to vector<8x128xf32>
    %236 = arith.subf %235, %228 : vector<8x128xf32>
    %237 = arith.mulf %236, %234 : vector<8x128xf32>
    %238 = arith.mulf %228, %200 : vector<8x128xf32>
    %239 = arith.addf %237, %238 : vector<8x128xf32>
    %240 = arith.index_cast %c5_i32 : i32 to index
    %c0_82 = arith.constant 0 : index
    %c0_83 = arith.constant 0 : index
    %241 = vector.load %arg8[%240, %c0_82, %c0_83] : memref<8x8x128xf32, #tpu.memory_space<vmem>>, vector<1x8x128xf32>
    %242 = vector.shape_cast %241 : vector<1x8x128xf32> to vector<8x128xf32>
    %243 = vector.shape_cast %239 : vector<8x128xf32> to vector<1x8x128xf32>
    tpu.vector_store %arg8[%240, %c0_82, %c0_83], %243 {strides = array<i32>} : memref<8x8x128xf32, #tpu.memory_space<vmem>>, vector<1x8x128xf32>,
    %c6_i32 = arith.constant 6 : i32
    %244 = arith.index_cast %c6_i32 : i32 to index
    %c0_84 = arith.constant 0 : index
    %c0_85 = arith.constant 0 : index
    %245 = vector.load %arg2[%244, %c0_84, %c0_85] : memref<8x8x128xf32, #tpu.memory_space<vmem>>, vector<1x8x128xf32>
    %246 = vector.shape_cast %245 : vector<1x8x128xf32> to vector<8x128xf32>
    %c0_86 = arith.constant 0 : index
    %c0_87 = arith.constant 0 : index
    %247 = vector.load %arg4[%c0_86, %c0_87] : memref<128x384xf32, #tpu.memory_space<vmem>>, vector<128x384xf32>
    %cst_88 = arith.constant dense<0.000000e+00> : vector<8x384xf32>
    %248 = tpu.matmul %246, %247, %cst_88 {dimension_numbers = #tpu.dot_dimension_numbers<[1], [0], [0], [1], [0, 0, 1, 1], [], []>} : vector<8x128xf32>, vector<128x384xf32>, vector<8x384xf32> -> vector<8x384xf32>
    %249 = arith.addf %248, %5 : vector<8x384xf32>
    %c0_89 = arith.constant 0 : index
    %c0_90 = arith.constant 0 : index
    %250 = vector.load %arg5[%c0_89, %c0_90] : memref<128x384xf32, #tpu.memory_space<vmem>>, vector<128x384xf32>
    %cst_91 = arith.constant dense<0.000000e+00> : vector<8x384xf32>
    %251 = tpu.matmul %239, %250, %cst_91 {dimension_numbers = #tpu.dot_dimension_numbers<[1], [0], [0], [1], [0, 0, 1, 1], [], []>} : vector<8x128xf32>, vector<128x384xf32>, vector<8x384xf32> -> vector<8x384xf32>
    %252 = vector.extract_strided_slice %249 {offsets = [0, 0], sizes = [8, 128], strides = [1, 1]} : vector<8x384xf32> to vector<8x128xf32>
    %253 = vector.extract_strided_slice %251 {offsets = [0, 0], sizes = [8, 128], strides = [1, 1]} : vector<8x384xf32> to vector<8x128xf32>
    %254 = arith.addf %252, %253 : vector<8x128xf32>
    %255 = arith.negf %254 : vector<8x128xf32>
    %256 = math.exp %255 : vector<8x128xf32>
    %cst_92 = arith.constant 1.000000e+00 : f32
    %257 = vector.broadcast %cst_92 : f32 to vector<8x128xf32>
    %258 = arith.addf %257, %256 : vector<8x128xf32>
    %259 = arith.divf %257, %258 : vector<8x128xf32>
    %260 = vector.extract_strided_slice %249 {offsets = [0, 128], sizes = [8, 128], strides = [1, 1]} : vector<8x384xf32> to vector<8x128xf32>
    %261 = vector.extract_strided_slice %251 {offsets = [0, 128], sizes = [8, 128], strides = [1, 1]} : vector<8x384xf32> to vector<8x128xf32>
    %262 = arith.addf %260, %261 : vector<8x128xf32>
    %263 = arith.negf %262 : vector<8x128xf32>
    %264 = math.exp %263 : vector<8x128xf32>
    %cst_93 = arith.constant 1.000000e+00 : f32
    %265 = vector.broadcast %cst_93 : f32 to vector<8x128xf32>
    %266 = arith.addf %265, %264 : vector<8x128xf32>
    %267 = arith.divf %265, %266 : vector<8x128xf32>
    %268 = vector.extract_strided_slice %249 {offsets = [0, 256], sizes = [8, 128], strides = [1, 1]} : vector<8x384xf32> to vector<8x128xf32>
    %269 = vector.extract_strided_slice %251 {offsets = [0, 256], sizes = [8, 128], strides = [1, 1]} : vector<8x384xf32> to vector<8x128xf32>
    %270 = arith.addf %269, %8 : vector<8x128xf32>
    %271 = arith.mulf %259, %270 : vector<8x128xf32>
    %272 = arith.addf %268, %271 : vector<8x128xf32>
    %273 = math.tanh %272 : vector<8x128xf32>
    %cst_94 = arith.constant 1.000000e+00 : f32
    %274 = vector.broadcast %cst_94 : f32 to vector<8x128xf32>
    %275 = arith.subf %274, %267 : vector<8x128xf32>
    %276 = arith.mulf %275, %273 : vector<8x128xf32>
    %277 = arith.mulf %267, %239 : vector<8x128xf32>
    %278 = arith.addf %276, %277 : vector<8x128xf32>
    %279 = arith.index_cast %c6_i32 : i32 to index
    %c0_95 = arith.constant 0 : index
    %c0_96 = arith.constant 0 : index
    %280 = vector.load %arg8[%279, %c0_95, %c0_96] : memref<8x8x128xf32, #tpu.memory_space<vmem>>, vector<1x8x128xf32>
    %281 = vector.shape_cast %280 : vector<1x8x128xf32> to vector<8x128xf32>
    %282 = vector.shape_cast %278 : vector<8x128xf32> to vector<1x8x128xf32>
    tpu.vector_store %arg8[%279, %c0_95, %c0_96], %282 {strides = array<i32>} : memref<8x8x128xf32, #tpu.memory_space<vmem>>, vector<1x8x128xf32>,
    %c7_i32 = arith.constant 7 : i32
    %283 = arith.index_cast %c7_i32 : i32 to index
    %c0_97 = arith.constant 0 : index
    %c0_98 = arith.constant 0 : index
    %284 = vector.load %arg2[%283, %c0_97, %c0_98] : memref<8x8x128xf32, #tpu.memory_space<vmem>>, vector<1x8x128xf32>
    %285 = vector.shape_cast %284 : vector<1x8x128xf32> to vector<8x128xf32>
    %c0_99 = arith.constant 0 : index
    %c0_100 = arith.constant 0 : index
    %286 = vector.load %arg4[%c0_99, %c0_100] : memref<128x384xf32, #tpu.memory_space<vmem>>, vector<128x384xf32>
    %cst_101 = arith.constant dense<0.000000e+00> : vector<8x384xf32>
    %287 = tpu.matmul %285, %286, %cst_101 {dimension_numbers = #tpu.dot_dimension_numbers<[1], [0], [0], [1], [0, 0, 1, 1], [], []>} : vector<8x128xf32>, vector<128x384xf32>, vector<8x384xf32> -> vector<8x384xf32>
    %288 = arith.addf %287, %5 : vector<8x384xf32>
    %c0_102 = arith.constant 0 : index
    %c0_103 = arith.constant 0 : index
    %289 = vector.load %arg5[%c0_102, %c0_103] : memref<128x384xf32, #tpu.memory_space<vmem>>, vector<128x384xf32>
    %cst_104 = arith.constant dense<0.000000e+00> : vector<8x384xf32>
    %290 = tpu.matmul %278, %289, %cst_104 {dimension_numbers = #tpu.dot_dimension_numbers<[1], [0], [0], [1], [0, 0, 1, 1], [], []>} : vector<8x128xf32>, vector<128x384xf32>, vector<8x384xf32> -> vector<8x384xf32>
    %291 = vector.extract_strided_slice %288 {offsets = [0, 0], sizes = [8, 128], strides = [1, 1]} : vector<8x384xf32> to vector<8x128xf32>
    %292 = vector.extract_strided_slice %290 {offsets = [0, 0], sizes = [8, 128], strides = [1, 1]} : vector<8x384xf32> to vector<8x128xf32>
    %293 = arith.addf %291, %292 : vector<8x128xf32>
    %294 = arith.negf %293 : vector<8x128xf32>
    %295 = math.exp %294 : vector<8x128xf32>
    %cst_105 = arith.constant 1.000000e+00 : f32
    %296 = vector.broadcast %cst_105 : f32 to vector<8x128xf32>
    %297 = arith.addf %296, %295 : vector<8x128xf32>
    %298 = arith.divf %296, %297 : vector<8x128xf32>
    %299 = vector.extract_strided_slice %288 {offsets = [0, 128], sizes = [8, 128], strides = [1, 1]} : vector<8x384xf32> to vector<8x128xf32>
    %300 = vector.extract_strided_slice %290 {offsets = [0, 128], sizes = [8, 128], strides = [1, 1]} : vector<8x384xf32> to vector<8x128xf32>
    %301 = arith.addf %299, %300 : vector<8x128xf32>
    %302 = arith.negf %301 : vector<8x128xf32>
    %303 = math.exp %302 : vector<8x128xf32>
    %cst_106 = arith.constant 1.000000e+00 : f32
    %304 = vector.broadcast %cst_106 : f32 to vector<8x128xf32>
    %305 = arith.addf %304, %303 : vector<8x128xf32>
    %306 = arith.divf %304, %305 : vector<8x128xf32>
    %307 = vector.extract_strided_slice %288 {offsets = [0, 256], sizes = [8, 128], strides = [1, 1]} : vector<8x384xf32> to vector<8x128xf32>
    %308 = vector.extract_strided_slice %290 {offsets = [0, 256], sizes = [8, 128], strides = [1, 1]} : vector<8x384xf32> to vector<8x128xf32>
    %309 = arith.addf %308, %8 : vector<8x128xf32>
    %310 = arith.mulf %298, %309 : vector<8x128xf32>
    %311 = arith.addf %307, %310 : vector<8x128xf32>
    %312 = math.tanh %311 : vector<8x128xf32>
    %cst_107 = arith.constant 1.000000e+00 : f32
    %313 = vector.broadcast %cst_107 : f32 to vector<8x128xf32>
    %314 = arith.subf %313, %306 : vector<8x128xf32>
    %315 = arith.mulf %314, %312 : vector<8x128xf32>
    %316 = arith.mulf %306, %278 : vector<8x128xf32>
    %317 = arith.addf %315, %316 : vector<8x128xf32>
    %318 = arith.index_cast %c7_i32 : i32 to index
    %c0_108 = arith.constant 0 : index
    %c0_109 = arith.constant 0 : index
    %319 = vector.load %arg8[%318, %c0_108, %c0_109] : memref<8x8x128xf32, #tpu.memory_space<vmem>>, vector<1x8x128xf32>
    %320 = vector.shape_cast %319 : vector<1x8x128xf32> to vector<8x128xf32>
    %321 = vector.shape_cast %317 : vector<8x128xf32> to vector<1x8x128xf32>
    tpu.vector_store %arg8[%318, %c0_108, %c0_109], %321 {strides = array<i32>} : memref<8x8x128xf32, #tpu.memory_space<vmem>>, vector<1x8x128xf32>,
    %c8_i32 = arith.constant 8 : i32
    %c0_110 = arith.constant 0 : index
    %c0_111 = arith.constant 0 : index
    %322 = vector.load %arg9[%c0_110, %c0_111] : memref<8x128xf32, #tpu.memory_space<vmem>>, vector<8x128xf32>
    tpu.vector_store %arg9[%c0_110, %c0_111], %317 {strides = array<i32>} : memref<8x128xf32, #tpu.memory_space<vmem>>, vector<8x128xf32>,
    return
  }
  func.func @transform_0(%arg0: i32, %arg1: i32) -> (i32, i32, i32) {
    %c0_i32 = arith.constant 0 : i32
    %c0_i32_0 = arith.constant 0 : i32
    return %arg1, %arg0, %c0_i32 : i32, i32, i32
  }
  func.func @transform_1(%arg0: i32, %arg1: i32) -> (i32, i32) {
    %c0_i32 = arith.constant 0 : i32
    %c0_i32_0 = arith.constant 0 : i32
    return %arg0, %c0_i32 : i32, i32
  }
  func.func @transform_2(%arg0: i32, %arg1: i32) -> (i32, i32) {
    %c0_i32 = arith.constant 0 : i32
    %c0_i32_0 = arith.constant 0 : i32
    %c0_i32_1 = arith.constant 0 : i32
    return %c0_i32, %c0_i32_0 : i32, i32
  }
  func.func @transform_3(%arg0: i32, %arg1: i32) -> (i32, i32) {
    %c0_i32 = arith.constant 0 : i32
    %c0_i32_0 = arith.constant 0 : i32
    %c0_i32_1 = arith.constant 0 : i32
    return %c0_i32, %c0_i32_0 : i32, i32
  }
  func.func @transform_4(%arg0: i32, %arg1: i32) -> (i32, i32) {
    %c0_i32 = arith.constant 0 : i32
    %c0_i32_0 = arith.constant 0 : i32
    %c0_i32_1 = arith.constant 0 : i32
    return %c0_i32, %c0_i32_0 : i32, i32
  }
  func.func @transform_5(%arg0: i32, %arg1: i32) -> (i32, i32) {
    %c0_i32 = arith.constant 0 : i32
    %c0_i32_0 = arith.constant 0 : i32
    %c0_i32_1 = arith.constant 0 : i32
    return %c0_i32, %c0_i32_0 : i32, i32
  }
  func.func @transform_6(%arg0: i32, %arg1: i32) -> (i32, i32, i32) {
    %c0_i32 = arith.constant 0 : i32
    %c0_i32_0 = arith.constant 0 : i32
    return %arg1, %arg0, %c0_i32 : i32, i32, i32
  }
}

</mosaic_0001>

<bundles_post_ra>
// kernel: tpu_custom_call.1
= control target key start
LH: loop header
LB: loop body
LE: loop exit
PB: predicated region body
PF: predicated region fallthrough
CT: control target
= control target key end

     0   :  { %11 = vsyncpa [#allocation4], 0  ;;  %s3990_s0 = inlined_call_operand.hbm [shape: f32[8,8,128], index: 0, kind: input, shape index: {}]   ;;  %s3991_s1 = inlined_call_operand.hbm [shape: f32[8,128], index: 1, kind: input, shape index: {}]   ;;  %s3992_s2 = inlined_call_operand.hbm [shape: f32[128,384], index: 2, kind: input, shape index: {}]   ;;  %s3993_s3 = inlined_call_operand.hbm [shape: f32[128,384], index: 3, kind: input, shape index: {}]   ;;  %s3994_s4 = inlined_call_operand.vmem [shape: f32[1,384], index: 4, kind: input, shape index: {}]   ;;  %s3995_s5 = inlined_call_operand.vmem [shape: f32[1,128], index: 5, kind: input, shape index: {}]   ;;  %s3996_s6 = inlined_call_operand.hbm [shape: f32[8,8,128], index: 6, kind: output, shape index: {}]  }
   0x1   :  { %12 = vsyncpa [#allocation7], 0 }
   0x2   :  { %13 = vsyncpa [#allocation10], 0  ;;  %s33_s23 = sshll.u32 %s3991_s1, 4  ;;  %s34_s23 = int_to_ptr.hbm [resolvable:$true] %s33_s23 }
   0x3   :  { %14 = vsyncpa [#allocation5], 0  ;;  %s2504_s24 = smov [#allocation6]   ;;  %s19_s28 = sshll.u32 %s3990_s0, 4  ;;  %s20_s28 = int_to_ptr.hbm [resolvable:$true] %s19_s28 }
   0x4   :  { %s35_s25 = sshll.u32 %s2504_s24, 4  ;;  %s2505_s29 = smov [#allocation3]   ;;  %s36_s25 = int_to_ptr.vmem [resolvable:$true] %s35_s25 }
   0x5   :  { %38 = dma.hbm_to_vmem [thread:$0]  %s34_s23, 128, %s36_s25, [#allocation7]  }
   0x6   :  { %s21_s30 = sshll.u32 %s2505_s29, 4  ;;  %s2506_s7 = smov 128   ;;  %s22_s30 = int_to_ptr.vmem [resolvable:$true] %s21_s30 }
   0x7   :  { %s2507_s8 = smov 8   ;;  %s43_s10 = sshll.u32 %s3992_s2, 4  ;;  %s44_s10 = int_to_ptr.hbm [resolvable:$true] %s43_s10 }
   0x8   :  { %27 = dma.hbm_to_vmem [thread:$0]  %s20_s28, 1024, %s22_s30, [#allocation4], %s2506_s7, %s2506_s7, %s2507_s8  }
   0x9   :  { %s2508_s11 = smov [#allocation8]   ;;  %s56_s14 = sshll.u32 %s3993_s3, 4  ;;  %s57_s14 = int_to_ptr.hbm [resolvable:$true] %s56_s14 }
   0xa   :  { %s45_s12 = sshll.u32 %s2508_s11, 4  ;;  %s2509_s15 = smov 384   ;;  %s46_s12 = int_to_ptr.vmem [resolvable:$true] %s45_s12 }
   0xb   :  { %s2510_s16 = smov 24   ;;  %s2511_s17 = smov [#allocation9]  }
   0xc   :  { %51 = dma.hbm_to_vmem [thread:$0]  %s44_s10, 6144, %s46_s12, [#allocation7], %s2509_s15, %s2509_s15, %s2510_s16  }
   0xd   :  { %s58_s18 = sshll.u32 %s2511_s17, 4  ;;  %s59_s18 = int_to_ptr.vmem [resolvable:$true] %s58_s18 }
   0xe   :  { %64 = dma.hbm_to_vmem [thread:$0]  %s57_s14, 6144, %s59_s18, [#allocation10], %s2509_s15, %s2509_s15, %s2510_s16  }
   0xf   :  { %2496 = dma.done.wait [#allocation4], 1024  }
  0x10   :  { %2497 = vsyncadd [#allocation4], 4294966272 }
  0x11   :  { %2498 = dma.done.wait [#allocation7], 6272  }
  0x12   :  { %2499 = vsyncadd [#allocation7], 4294961024 }
  0x13   :  { %2500 = dma.done.wait [#allocation10], 6144  }
  0x14   :  { %2501 = vsyncadd [#allocation10], 4294961152  ;;  %v2563_v0 = vld [vmem:[#allocation8 + $0x168] sm:$0xff]  ;;  %v2565_v1 = vld [vmem:[#allocation8 + $0x150] sm:$0xff]  ;;  %s2253_s27 = sshll.u32 %s3996_s6, 4  ;;  %s2254_s27 = int_to_ptr.hbm [resolvable:$true] %s2253_s27 }
  0x15   :  { %v2567_v2 = vld [vmem:[#allocation9 + $0x168] sm:$0xff]  ;;  %153 = vmatpush.msra.mxu0 %v2563_v0  ;;  %v2571_v3 = vld [vmem:[#allocation9 + $0x150] sm:$0xff]  ;;  %v2573_v4 = vld [vmem:[#allocation8 + $0x138] sm:$0xff] }
  0x16   :  { %261 = vmatpush.msra.mxu3 %v2567_v2  ;;  %v2575_v5 = vld [vmem:[#allocation8 + $0x170] sm:$0xff]  ;;  %v2577_v6 = vld [vmem:[#allocation9 + $0x138] sm:$0xff]  ;;  %v2583_v8 = vld [vmem:[#allocation8 + $0x120] sm:$0xff] }
  0x17   :  { %4106 = vst [vmem:[#allocation16_spill] sm:$0xff] %v2575_v5  ;;  %154 = vmatpush.msra.mxu0 %v2565_v1  ;;  %v2581_v7 = vld [vmem:[#allocation8 + $0x158] sm:$0xff]  ;;  %173 = vmatpush.msra.mxu1 %v2575_v5  ;;  %v2586_v9 = vld [vmem:[#allocation9 + $0x120] sm:$0xff]  ;;  %v2592_v11 = vld [vmem:[#allocation8 + $0x108] sm:$0xff] }
  0x18   :  { %262 = vmatpush.msra.mxu3 %v2571_v3  ;;  %4107 = vst [vmem:[#allocation17_spill] sm:$0xff] %v2581_v7  ;;  %v2590_v10 = vld [vmem:[#allocation8 + $0x140] sm:$0xff]  ;;  %v2595_v12 = vld [vmem:[#allocation9 + $0x108] sm:$0xff]  ;;  %v2601_v14 = vld [vmem:[#allocation8 + $0xf0] sm:$0xff] }
  0x19   :  { %155 = vmatpush.msra.mxu0 %v2573_v4  ;;  %4108 = vst [vmem:[#allocation18_spill] sm:$0xff] %v2590_v10  ;;  %174 = vmatpush.msra.mxu1 %v2581_v7  ;;  %v2599_v13 = vld [vmem:[#allocation8 + $0x128] sm:$0xff]  ;;  %v2604_v15 = vld [vmem:[#allocation9 + $0xf0] sm:$0xff]  ;;  %v2610_v17 = vld [vmem:[#allocation8 + $0xd8] sm:$0xff] }
  0x1a   :  { %263 = vmatpush.msra.mxu3 %v2577_v6  ;;  %4109 = vst [vmem:[#allocation19_spill] sm:$0xff] %v2599_v13  ;;  %v2608_v16 = vld [vmem:[#allocation8 + $0x110] sm:$0xff]  ;;  %v2613_v18 = vld [vmem:[#allocation9 + $0xd8] sm:$0xff]  ;;  %v2619_v20 = vld [vmem:[#allocation8 + $0xc0] sm:$0xff] }
  0x1b   :  { %156 = vmatpush.msra.mxu0 %v2583_v8  ;;  %175 = vmatpush.msra.mxu1 %v2590_v10  ;;  %4110 = vst [vmem:[#allocation20_spill] sm:$0xff] %v2608_v16  ;;  %v2617_v19 = vld [vmem:[#allocation8 + $0xf8] sm:$0xff]  ;;  %v2622_v21 = vld [vmem:[#allocation9 + $0xc0] sm:$0xff]  ;;  %v2628_v23 = vld [vmem:[#allocation8 + $0xa8] sm:$0xff] }
  0x1c   :  { %264 = vmatpush.msra.mxu3 %v2586_v9  ;;  %4111 = vst [vmem:[#allocation21_spill] sm:$0xff] %v2617_v19  ;;  %v2626_v22 = vld [vmem:[#allocation8 + $0xe0] sm:$0xff]  ;;  %v2631_v24 = vld [vmem:[#allocation9 + $0xa8] sm:$0xff]  ;;  %v2637_v26 = vld [vmem:[#allocation8 + $0x178] sm:$0xff] }
  0x1d   :  { %157 = vmatpush.msra.mxu0 %v2592_v11  ;;  %176 = vmatpush.msra.mxu1 %v2599_v13  ;;  %4112 = vst [vmem:[#allocation22_spill] sm:$0xff] %v2626_v22  ;;  %v2635_v25 = vld [vmem:[#allocation8 + $0xc8] sm:$0xff]  ;;  %v2639_v27 = vld [vmem:[#allocation8 + $0x90] sm:$0xff]  ;;  %v2649_v30 = vld [vmem:[#allocation8 + $0x160] sm:$0xff] }
  0x1e   :  { %265 = vmatpush.msra.mxu3 %v2595_v12  ;;  %4113 = vst [vmem:[#allocation23_spill] sm:$0xff] %v2635_v25  ;;  %v2642_v28 = vld [vmem:[#allocation9 + $0x90] sm:$0xff]  ;;  %193 = vmatpush.msra.mxu2 %v2637_v26  ;;  %v2651_v31 = vld [vmem:[#allocation8 + $0x78] sm:$0xff]  ;;  %v2657_v33 = vld [vmem:[#allocation8 + $0x148] sm:$0xff] }
  0x1f   :  { %158 = vmatpush.msra.mxu0 %v2601_v14  ;;  %177 = vmatpush.msra.mxu1 %v2608_v16  ;;  %4114 = vst [vmem:[#allocation24_spill] sm:$0xff] %v2642_v28  ;;  %v2647_v29 = vld [vmem:[#allocation8 + $0xb0] sm:$0xff]  ;;  %v2654_v32 = vld [vmem:[#allocation9 + $0x78] sm:$0xff]  ;;  %v2665_v36 = vld [vmem:[#allocation8 + $0x60] sm:$0xff] }
  0x20   :  { %266 = vmatpush.msra.mxu3 %v2604_v15  ;;  %4115 = vst [vmem:[#allocation25_spill] sm:$0xff] %v2647_v29  ;;  %194 = vmatpush.msra.mxu2 %v2649_v30  ;;  %v2661_v34 = vld [vmem:[#allocation8 + $0x98] sm:$0xff]  ;;  %v2663_v35 = vld [vmem:[#allocation8 + $0x130] sm:$0xff]  ;;  %v2668_v37 = vld [vmem:[#allocation9 + $0x60] sm:$0xff] }
  0x21   :  { %159 = vmatpush.msra.mxu0 %v2610_v17  ;;  %178 = vmatpush.msra.mxu1 %v2617_v19  ;;  %4116 = vst [vmem:[#allocation26_spill] sm:$0xff] %v2654_v32  ;;  %v2673_v38 = vld [vmem:[#allocation8 + $0x80] sm:$0xff]  ;;  %v2675_v39 = vld [vmem:[#allocation8 + $0x118] sm:$0xff]  ;;  %v2677_v40 = vld [vmem:[#allocation8 + $0x48] sm:$0xff] }
  0x22   :  { %267 = vmatpush.msra.mxu3 %v2613_v18  ;;  %4117 = vst [vmem:[#allocation27_spill] sm:$0xff] %v2668_v37  ;;  %195 = vmatpush.msra.mxu2 %v2657_v33  ;;  %v2680_v41 = vld [vmem:[#allocation9 + $0x48] sm:$0xff]  ;;  %v2687_v43 = vld [vmem:[#allocation8 + $0x100] sm:$0xff]  ;;  %v2689_v44 = vld [vmem:[#allocation8 + $0x30] sm:$0xff] }
  0x23   :  { %160 = vmatpush.msra.mxu0 %v2619_v20  ;;  %179 = vmatpush.msra.mxu1 %v2626_v22  ;;  %4118 = vst [vmem:[#allocation28_spill] sm:$0xff] %v2680_v41  ;;  %v2685_v42 = vld [vmem:[#allocation8 + $0x68] sm:$0xff]  ;;  %v2692_v45 = vld [vmem:[#allocation9 + $0x30] sm:$0xff]  ;;  %v2701_v48 = vld [vmem:[#allocation8 + $0x18] sm:$0xff] }
  0x24   :  { %268 = vmatpush.msra.mxu3 %v2622_v21  ;;  %196 = vmatpush.msra.mxu2 %v2663_v35  ;;  %4119 = vst [vmem:[#allocation29_spill] sm:$0xff] %v2692_v45  ;;  %v2697_v46 = vld [vmem:[#allocation8 + $0x50] sm:$0xff]  ;;  %v2699_v47 = vld [vmem:[#allocation8 + $0xe8] sm:$0xff]  ;;  %v2704_v49 = vld [vmem:[#allocation9 + $0x18] sm:$0xff] }
  0x25   :  { %161 = vmatpush.msra.mxu0 %v2628_v23  ;;  %180 = vmatpush.msra.mxu1 %v2635_v25  ;;  %4120 = vst [vmem:[#allocation30_spill] sm:$0xff] %v2704_v49  ;;  %v2709_v50 = vld [vmem:[#allocation8 + $0x38] sm:$0xff]  ;;  %v2711_v51 = vld [vmem:[#allocation8 + $0xd0] sm:$0xff]  ;;  %v2713_v52 = vld [vmem:[#allocation8] sm:$0xff] }
  0x26   :  { %269 = vmatpush.msra.mxu3 %v2631_v24  ;;  %197 = vmatpush.msra.mxu2 %v2675_v39  ;;  %v2716_v53 = vld [vmem:[#allocation9] sm:$0xff]  ;;  %v2721_v54 = vld [vmem:[#allocation9 + $0x170] sm:$0xff]  ;;  %v2726_v56 = vld [vmem:[#allocation6] sm:$0xff] }
  0x27   :  { %162 = vmatpush.msra.mxu0 %v2639_v27  ;;  %181 = vmatpush.msra.mxu1 %v2647_v29  ;;  %4121 = vst [vmem:[#allocation31_spill] sm:$0xff] %v2716_v53  ;;  %v2723_v55 = vld [vmem:[#allocation8 + $0x20] sm:$0xff]  ;;  %v2728_v57 = vld [vmem:[#allocation3] sm:$0xff]  ;;  %v2735_v59 = vld [vmem:[#allocation8 + $0x8] sm:$0xff] }
  0x28   :  { %270 = vmatpush.msra.mxu3 %v2642_v28  ;;  %198 = vmatpush.msra.mxu2 %v2687_v43  ;;  %v2733_v58 = vld [vmem:[#allocation9 + $0x158] sm:$0xff]  ;;  %v2744_v62 = vld [vmem:[#allocation9 + $0x140] sm:$0xff]  ;;  %v2770_v28 = vld [vmem:[#allocation8 + $0x70] sm:$0xff] }
  0x29   :  { %163 = vmatpush.msra.mxu0 %v2651_v31  ;;  %182 = vmatpush.msra.mxu1 %v2661_v34  ;;  %4122 = vst [vmem:[#allocation32_spill] sm:$0xff] %v2733_v58  ;;  %v2739_v60 = vld [vmem:[#allocation9 + $0x178] sm:$0xff]  ;;  %v2749_v63 = vld [vmem:[#allocation9 + $0x160] sm:$0xff] }
  0x2a   :  { %271 = vmatpush.msra.mxu3 %v2654_v32  ;;  %199 = vmatpush.msra.mxu2 %v2699_v47  ;;  %v2741_v61 = vld [vmem:[#allocation8 + $0xb8] sm:$0xff]  ;;  %4124 = vst [vmem:[#allocation34_spill] sm:$0xff] %v2744_v62  ;;  %v2768_v32 = vld [vmem:[#allocation9 + $0x130] sm:$0xff] }
  0x2b   :  { %164 = vmatpush.msra.mxu0 %v2665_v36  ;;  %183 = vmatpush.msra.mxu1 %v2673_v38  ;;  %4123 = vst [vmem:[#allocation33_spill] sm:$0xff] %v2741_v61 }
  0x2c   :  { %272 = vmatpush.msra.mxu3 %v2668_v37  ;;  %200 = vmatpush.msra.mxu2 %v2711_v51  ;;  %v2763_v37 = vld [vmem:[#allocation9 + $0x110] sm:$0xff]  ;;  %4129 = vst [vmem:[#allocation39_spill] sm:$0xff] %v2770_v28 }
  0x2d   :  { %165 = vmatpush.msra.mxu0 %v2677_v40  ;;  %184 = vmatpush.msra.mxu1 %v2685_v42  ;;  %4128 = vst [vmem:[#allocation38_spill] sm:$0xff] %v2763_v37 }
  0x2e   :  { %273 = vmatpush.msra.mxu3 %v2680_v41  ;;  %201 = vmatpush.msra.mxu2 %v2741_v61  ;;  %v2760_v41 = vld [vmem:[#allocation8 + $0x88] sm:$0xff]  ;;  %v2780_v61 = vld [vmem:[#allocation8 + $0x58] sm:$0xff] }
  0x2f   :  { %166 = vmatpush.msra.mxu0 %v2689_v44  ;;  %185 = vmatpush.msra.mxu1 %v2697_v46  ;;  %4127 = vst [vmem:[#allocation37_spill] sm:$0xff] %v2760_v41 }
  0x30   :  { %274 = vmatpush.msra.mxu3 %v2692_v45  ;;  %v2758_v45 = vld [vmem:[#allocation9 + $0x148] sm:$0xff] }
  0x31   :  { %167 = vmatpush.msra.mxu0 %v2701_v48  ;;  %186 = vmatpush.msra.mxu1 %v2709_v50 }
  0x32   :  { %275 = vmatpush.msra.mxu3 %v2704_v49  ;;  %v2753_v49 = vld [vmem:[#allocation9 + $0x128] sm:$0xff] }
  0x33   :  { %168 = vmatpush.msra.mxu0 %v2713_v52  ;;  %187 = vmatpush.msra.mxu1 %v2723_v55  ;;  %4126 = vst [vmem:[#allocation36_spill] sm:$0xff] %v2753_v49 }
  0x34   :  { %276 = vmatpush.msra.mxu3 %v2716_v53  ;;  %169 = vmatmul.f32.vlgmr.msra.gmra.mxu0 %v2728_v57  ;;  %v2751_v53 = vld [vmem:[#allocation8 + $0xa0] sm:$0xff] }
  0x35   :  { %281 = vmatpush.msrb.mxu0 %v2721_v54  ;;  %277 = vmatmul.f32.vlgmr.msra.gmra.mxu3 %v2726_v56  ;;  %4125 = vst [vmem:[#allocation35_spill] sm:$0xff] %v2751_v53 }
  0x36   :  { %188 = vmatpush.msra.mxu1 %v2735_v59  ;;  %202 = vmatpush.msra.mxu2 %v2751_v53  ;;  %v2790_v53 = vld [vmem:[#allocation8 + $0x40] sm:$0xff] }
  0x37   :  { %282 = vmatpush.msrb.mxu0 %v2733_v58  ;;  %189 = vmatmul.f32.vlgmr.msra.gmra.mxu1 %v2728_v57  ;;  %v2778_v58 = vld [vmem:[#allocation9 + $0x118] sm:$0xff]  ;;  %4132 = vst [vmem:[#allocation42_spill] sm:$0xff] %v2790_v53 }
  0x38   :  { %301 = vmatpush.msrb.mxu1 %v2739_v60  ;;  %440 = vmatpush.msrb.mxu3 %v2575_v5  ;;  %v2788_v5 = vld [vmem:[#allocation9 + $0x100] sm:$0xff] }
  0x39   :  { %283 = vmatpush.msrb.mxu0 %v2744_v62  ;;  %v2773_v62 = vld [vmem:[#allocation9 + $0xf8] sm:$0xff]  ;;  %203 = vmatpush.msra.mxu2 %v2760_v41  ;;  %v2800_v41 = vld [vmem:[#allocation8 + $0x28] sm:$0xff] }
  0x3a   :  { %302 = vmatpush.msrb.mxu1 %v2749_v63  ;;  %4130 = vst [vmem:[#allocation40_spill] sm:$0xff] %v2773_v62  ;;  %441 = vmatpush.msrb.mxu3 %v2581_v7  ;;  %v2798_v7 = vld [vmem:[#allocation9 + $0xe8] sm:$0xff] }
  0x3b   :  { %284 = vmatpush.msrb.mxu0 %v2753_v49  ;;  %v2783_v49 = vld [vmem:[#allocation9 + $0xe0] sm:$0xff]  ;;  %204 = vmatpush.msra.mxu2 %v2770_v28  ;;  %v2810_v28 = vld [vmem:[#allocation8 + $0x10] sm:$0xff] }
  0x3c   :  { %303 = vmatpush.msrb.mxu1 %v2758_v45  ;;  %4131 = vst [vmem:[#allocation41_spill] sm:$0xff] %v2783_v49  ;;  %442 = vmatpush.msrb.mxu3 %v2590_v10  ;;  %v2808_v10 = vld [vmem:[#allocation9 + $0xd0] sm:$0xff] }
  0x3d   :  { %285 = vmatpush.msrb.mxu0 %v2763_v37  ;;  %v2793_v37 = vld [vmem:[#allocation9 + $0xc8] sm:$0xff]  ;;  %205 = vmatpush.msra.mxu2 %v2780_v61 }
  0x3e   :  { %304 = vmatpush.msrb.mxu1 %v2768_v32  ;;  %4133 = vst [vmem:[#allocation43_spill] sm:$0xff] %v2793_v37  ;;  %443 = vmatpush.msrb.mxu3 %v2599_v13  ;;  %v2818_v13 = vld [vmem:[#allocation9 + $0xb8] sm:$0xff] }
  0x3f   :  { %286 = vmatpush.msrb.mxu0 %v2773_v62  ;;  %v2803_v62 = vld [vmem:[#allocation9 + $0xb0] sm:$0xff]  ;;  %206 = vmatpush.msra.mxu2 %v2790_v53  ;;  %v2821_v53 = vld [vmem:[#allocation9 + $0x80] sm:$0xff] }
  0x40   :  { %305 = vmatpush.msrb.mxu1 %v2778_v58  ;;  %4134 = vst [vmem:[#allocation44_spill] sm:$0xff] %v2803_v62  ;;  %444 = vmatpush.msrb.mxu3 %v2608_v16  ;;  %v2826_v16 = vld [vmem:[#allocation9 + $0xa0] sm:$0xff] }
  0x41   :  { %287 = vmatpush.msrb.mxu0 %v2783_v49  ;;  %v2813_v49 = vld [vmem:[#allocation9 + $0x98] sm:$0xff]  ;;  %207 = vmatpush.msra.mxu2 %v2800_v41  ;;  %4136 = vst [vmem:[#allocation46_spill] sm:$0xff] %v2821_v53 }
  0x42   :  { %306 = vmatpush.msrb.mxu1 %v2788_v5  ;;  %4135 = vst [vmem:[#allocation45_spill] sm:$0xff] %v2813_v49  ;;  %445 = vmatpush.msrb.mxu3 %v2617_v19  ;;  %v2834_v19 = vld [vmem:[#allocation9 + $0x88] sm:$0xff] }
  0x43   :  { %288 = vmatpush.msrb.mxu0 %v2793_v37  ;;  %208 = vmatpush.msra.mxu2 %v2810_v28  ;;  %v2829_v37 = vld [vmem:[#allocation9 + $0x68] sm:$0xff] }
  0x44   :  { %307 = vmatpush.msrb.mxu1 %v2798_v7  ;;  %209 = vmatmul.f32.vlgmr.msra.gmra.mxu2 %v2728_v57  ;;  %4137 = vst [vmem:[#allocation47_spill] sm:$0xff] %v2829_v37  ;;  %v2842_v57 = vld [vmem:[#allocation9 + $0x70] sm:$0xff] }
  0x45   :  { %289 = vmatpush.msrb.mxu0 %v2803_v62  ;;  %420 = vmatpush.msrb.mxu2 %v2563_v0  ;;  %v2837_v62 = vld [vmem:[#allocation9 + $0x50] sm:$0xff] }
  0x46   :  { %308 = vmatpush.msrb.mxu1 %v2808_v10  ;;  %446 = vmatpush.msrb.mxu3 %v2626_v22  ;;  %v2850_v22 = vld [vmem:[#allocation9 + $0x58] sm:$0xff] }
  0x47   :  { %290 = vmatpush.msrb.mxu0 %v2813_v49  ;;  %421 = vmatpush.msrb.mxu2 %v2565_v1  ;;  %v2845_v49 = vld [vmem:[#allocation9 + $0x38] sm:$0xff] }
  0x48   :  { %309 = vmatpush.msrb.mxu1 %v2818_v13  ;;  %447 = vmatpush.msrb.mxu3 %v2635_v25  ;;  %4138 = vst [vmem:[#allocation48_spill] sm:$0xff] %v2845_v49  ;;  %v2858_v25 = vld [vmem:[#allocation9 + $0x40] sm:$0xff] }
  0x49   :  { %291 = vmatpush.msrb.mxu0 %v2821_v53  ;;  %422 = vmatpush.msrb.mxu2 %v2573_v4  ;;  %v2853_v53 = vld [vmem:[#allocation9 + $0x20] sm:$0xff] }
  0x4a   :  { %310 = vmatpush.msrb.mxu1 %v2826_v16  ;;  %448 = vmatpush.msrb.mxu3 %v2647_v29  ;;  %v2866_v29 = vld [vmem:[#allocation9 + $0x28] sm:$0xff] }
  0x4b   :  { %292 = vmatpush.msrb.mxu0 %v2829_v37  ;;  %423 = vmatpush.msrb.mxu2 %v2583_v8  ;;  %v2861_v37 = vld [vmem:[#allocation9 + $0x8] sm:$0xff] }
  0x4c   :  { %311 = vmatpush.msrb.mxu1 %v2834_v19  ;;  %449 = vmatpush.msrb.mxu3 %v2661_v34 }
  0x4d   :  { %293 = vmatpush.msrb.mxu0 %v2837_v62  ;;  %424 = vmatpush.msrb.mxu2 %v2592_v11 }
  0x4e   :  { %312 = vmatpush.msrb.mxu1 %v2842_v57  ;;  %450 = vmatpush.msrb.mxu3 %v2673_v38 }
  0x4f   :  { %294 = vmatpush.msrb.mxu0 %v2845_v49  ;;  %425 = vmatpush.msrb.mxu2 %v2601_v14  ;;  %v2872_v49 = vld [vmem:[#allocation9 + $0x10] sm:$0xff] }
  0x50   :  { %313 = vmatpush.msrb.mxu1 %v2850_v22  ;;  %451 = vmatpush.msrb.mxu3 %v2685_v42 }
  0x51   :  { %295 = vmatpush.msrb.mxu0 %v2853_v53  ;;  %426 = vmatpush.msrb.mxu2 %v2610_v17 }
  0x52   :  { %314 = vmatpush.msrb.mxu1 %v2858_v25  ;;  %452 = vmatpush.msrb.mxu3 %v2697_v46 }
  0x53   :  { %296 = vmatpush.msrb.mxu0 %v2861_v37  ;;  %427 = vmatpush.msrb.mxu2 %v2619_v20 }
  0x54   :  { %297 = vmatmul.f32.vlgmr.msrb.gmra.mxu0 %v2726_v56  ;;  %315 = vmatpush.msrb.mxu1 %v2866_v29 }
  0x55   :  { %460 = vmatpush.msra.mxu0 %v2637_v26  ;;  %453 = vmatpush.msrb.mxu3 %v2709_v50  ;;  %v4148_v26 = vld [vmem:[#allocation39_spill] sm:$0xff] }
  0x56   :  { %316 = vmatpush.msrb.mxu1 %v2872_v49  ;;  %428 = vmatpush.msrb.mxu2 %v2628_v23 }
  0x57   :  { %317 = vmatmul.f32.vlgmr.msrb.gmra.mxu1 %v2726_v56  ;;  %461 = vmatpush.msra.mxu0 %v2649_v30  ;;  %v4149_v30 = vld [vmem:[#allocation38_spill] sm:$0xff] }
  0x58   :  { %528 = vmatpush.msra.mxu1 %v2567_v2  ;;  %454 = vmatpush.msrb.mxu3 %v2723_v55  ;;  %v4139_v2 = vld [vmem:[#allocation33_spill] sm:$0xff] }
  0x59   :  { %429 = vmatpush.msrb.mxu2 %v2639_v27  ;;  %462 = vmatpush.msra.mxu0 %v2657_v33  ;;  %v4150_v33 = vld [vmem:[#allocation28_spill] sm:$0xff] }
  0x5a   :  { %529 = vmatpush.msra.mxu1 %v2571_v3  ;;  %455 = vmatpush.msrb.mxu3 %v2735_v59  ;;  %v4140_v3 = vld [vmem:[#allocation32_spill] sm:$0xff] }
  0x5b   :  { %430 = vmatpush.msrb.mxu2 %v2651_v31  ;;  %463 = vmatpush.msra.mxu0 %v2663_v35  ;;  %v4151_v35 = vld [vmem:[#allocation40_spill] sm:$0xff] }
  0x5c   :  { %530 = vmatpush.msra.mxu1 %v2577_v6  ;;  %568 = vmatpush.msra.mxu3 %v2739_v60  ;;  %v4141_v6 = vld [vmem:[#allocation24_spill] sm:$0xff] }
  0x5d   :  { %431 = vmatpush.msrb.mxu2 %v2665_v36  ;;  %464 = vmatpush.msra.mxu0 %v2675_v39  ;;  %v4152_v39 = vld [vmem:[#allocation29_spill] sm:$0xff] }
  0x5e   :  { %531 = vmatpush.msra.mxu1 %v2586_v9  ;;  %569 = vmatpush.msra.mxu3 %v2749_v63  ;;  %v4142_v9 = vld [vmem:[#allocation35_spill] sm:$0xff] }
  0x5f   :  { %432 = vmatpush.msrb.mxu2 %v2677_v40  ;;  %465 = vmatpush.msra.mxu0 %v2687_v43  ;;  %v4153_v43 = vld [vmem:[#allocation42_spill] sm:$0xff] }
  0x60   :  { %532 = vmatpush.msra.mxu1 %v2595_v12  ;;  %570 = vmatpush.msra.mxu3 %v2758_v45  ;;  %v4143_v12 = vld [vmem:[#allocation34_spill] sm:$0xff] }
  0x61   :  { %433 = vmatpush.msrb.mxu2 %v2689_v44  ;;  %466 = vmatpush.msra.mxu0 %v2699_v47  ;;  %v4154_v47 = vld [vmem:[#allocation41_spill] sm:$0xff] }
  0x62   :  { %533 = vmatpush.msra.mxu1 %v2604_v15  ;;  %571 = vmatpush.msra.mxu3 %v2768_v32  ;;  %v4144_v15 = vld [vmem:[#allocation26_spill] sm:$0xff] }
  0x63   :  { %434 = vmatpush.msrb.mxu2 %v2701_v48  ;;  %467 = vmatpush.msra.mxu0 %v2711_v51  ;;  %v4155_v51 = vld [vmem:[#allocation30_spill] sm:$0xff] }
  0x64   :  { %534 = vmatpush.msra.mxu1 %v2613_v18  ;;  %572 = vmatpush.msra.mxu3 %v2778_v58  ;;  %v4145_v18 = vld [vmem:[#allocation37_spill] sm:$0xff] }
  0x65   :  { %435 = vmatpush.msrb.mxu2 %v2713_v52  ;;  %468 = vmatpush.msra.mxu0 %v4139_v2  ;;  %v4156_v2 = vld [vmem:[#allocation43_spill] sm:$0xff] }
  0x66   :  { %535 = vmatpush.msra.mxu1 %v2622_v21  ;;  %573 = vmatpush.msra.mxu3 %v2788_v5  ;;  %v4146_v21 = vld [vmem:[#allocation36_spill] sm:$0xff] }
  0x67   :  { %548 = vmatpush.msra.mxu2 %v2721_v54  ;;  %469 = vmatpush.msra.mxu0 %v4142_v9  ;;  %v4159_v9 = vld [vmem:[#allocation16_spill] sm:$0xff] }
  0x68   :  { %536 = vmatpush.msra.mxu1 %v2631_v24  ;;  %574 = vmatpush.msra.mxu3 %v2798_v7  ;;  %v4147_v24 = vld [vmem:[#allocation27_spill] sm:$0xff] }
  0x69   :  { %549 = vmatpush.msra.mxu2 %v4140_v3  ;;  %470 = vmatpush.msra.mxu0 %v4145_v18  ;;  %v4162_v18 = vld [vmem:[#allocation46_spill] sm:$0xff] }
  0x6a   :  { %537 = vmatpush.msra.mxu1 %v4141_v6  ;;  %575 = vmatpush.msra.mxu3 %v2808_v10  ;;  %v4157_v6 = vld [vmem:[#allocation31_spill] sm:$0xff] }
  0x6b   :  { %550 = vmatpush.msra.mxu2 %v4143_v12  ;;  %471 = vmatpush.msra.mxu0 %v4148_v26  ;;  %v4167_v26 = vld [vmem:[#allocation48_spill] sm:$0xff] }
  0x6c   :  { %538 = vmatpush.msra.mxu1 %v4144_v15  ;;  %576 = vmatpush.msra.mxu3 %v2818_v13  ;;  %v4160_v15 = vld [vmem:[#allocation45_spill] sm:$0xff] }
  0x6d   :  { %551 = vmatpush.msra.mxu2 %v4146_v21  ;;  %472 = vmatpush.msra.mxu0 %v2780_v61  ;;  %v4158_v61 = vld [vmem:[#allocation44_spill] sm:$0xff] }
  0x6e   :  { %539 = vmatpush.msra.mxu1 %v4147_v24  ;;  %577 = vmatpush.msra.mxu3 %v2826_v16  ;;  %v4164_v24 = vld [vmem:[#allocation47_spill] sm:$0xff] }
  0x6f   :  { %552 = vmatpush.msra.mxu2 %v4149_v30  ;;  %473 = vmatpush.msra.mxu0 %v4153_v43 }
  0x70   :  { %540 = vmatpush.msra.mxu1 %v4150_v33  ;;  %578 = vmatpush.msra.mxu3 %v2834_v19  ;;  %v4168_v33 = vld [vmem:[#allocation21_spill] sm:$0xff] }
  0x71   :  { %553 = vmatpush.msra.mxu2 %v4151_v35  ;;  %474 = vmatpush.msra.mxu0 %v2800_v41  ;;  %v4161_v41 = vld [vmem:[#allocation17_spill] sm:$0xff] }
  0x72   :  { %541 = vmatpush.msra.mxu1 %v4152_v39  ;;  %579 = vmatpush.msra.mxu3 %v2842_v57 }
  0x73   :  { %554 = vmatpush.msra.mxu2 %v4154_v47  ;;  %475 = vmatpush.msra.mxu0 %v2810_v28  ;;  %v4163_v28 = vld [vmem:[#allocation18_spill] sm:$0xff] }
  0x74   :  { %542 = vmatpush.msra.mxu1 %v4155_v51  ;;  %580 = vmatpush.msra.mxu3 %v2850_v22 }
  0x75   :  { %555 = vmatpush.msra.mxu2 %v4156_v2  ;;  %688 = vmatpush.msrb.mxu0 %v2563_v0  ;;  %v4165_v0 = vld [vmem:[#allocation19_spill] sm:$0xff] }
  0x76   :  { %543 = vmatpush.msra.mxu1 %v4157_v6  ;;  %581 = vmatpush.msra.mxu3 %v2858_v25 }
  0x77   :  { %556 = vmatpush.msra.mxu2 %v4158_v61  ;;  %689 = vmatpush.msrb.mxu0 %v2565_v1  ;;  %v4166_v1 = vld [vmem:[#allocation20_spill] sm:$0xff] }
  0x78   :  { %582 = vmatpush.msra.mxu3 %v2866_v29  ;;  %708 = vmatpush.msrb.mxu1 %v4159_v9 }
  0x79   :  { %557 = vmatpush.msra.mxu2 %v4160_v15  ;;  %690 = vmatpush.msrb.mxu0 %v2573_v4  ;;  %v4169_v4 = vld [vmem:[#allocation22_spill] sm:$0xff] }
  0x7a   :  { %583 = vmatpush.msra.mxu3 %v2872_v49  ;;  %709 = vmatpush.msrb.mxu1 %v4161_v41 }
  0x7b   :  { %558 = vmatpush.msra.mxu2 %v4162_v18  ;;  %691 = vmatpush.msrb.mxu0 %v2583_v8  ;;  %v4170_v8 = vld [vmem:[#allocation23_spill] sm:$0xff] }
  0x7c   :  { %710 = vmatpush.msrb.mxu1 %v4163_v28 }
  0x7d   :  { %559 = vmatpush.msra.mxu2 %v4164_v24  ;;  %692 = vmatpush.msrb.mxu0 %v2592_v11  ;;  %v4171_v11 = vld [vmem:[#allocation25_spill] sm:$0xff] }
  0x7e   :  { %711 = vmatpush.msrb.mxu1 %v4165_v0 }
  0x7f   :  { %560 = vmatpush.msra.mxu2 %v2837_v62  ;;  %693 = vmatpush.msrb.mxu0 %v2601_v14  ;;  %v91_v14 = vld [vmem:[%s3994_s4] sm:$0x7] }
  0x80   :  { %712 = vmatpush.msrb.mxu1 %v4166_v1  ;;  %v3012_v0 = vperm.slane %v91_v14, 2 }
  0x81   :  { %561 = vmatpush.msra.mxu2 %v4167_v26  ;;  %694 = vmatpush.msrb.mxu0 %v2610_v17  ;;  %v2992_v17 = vperm.slane %v91_v14, 0 }
  0x82   :  { %713 = vmatpush.msrb.mxu1 %v4168_v33 }
  0x83   :  { %562 = vmatpush.msra.mxu2 %v2853_v53  ;;  %695 = vmatpush.msrb.mxu0 %v2619_v20  ;;  %4172 = vst [vmem:[#allocation33_spill] sm:$0xff] %v2992_v17 }
  0x84   :  { %714 = vmatpush.msrb.mxu1 %v4169_v4 }
  0x85   :  { %563 = vmatpush.msra.mxu2 %v2861_v37  ;;  %696 = vmatpush.msrb.mxu0 %v2628_v23 }
  0x86   :  { %715 = vmatpush.msrb.mxu1 %v4170_v8 }
  0x87   :  { %697 = vmatpush.msrb.mxu0 %v2639_v27 }
  0x88   :  { %716 = vmatpush.msrb.mxu1 %v4171_v11 }
  0x89   :  { %698 = vmatpush.msrb.mxu0 %v2651_v31 }
  0x8a   :  { %717 = vmatpush.msrb.mxu1 %v2661_v34 }
  0x8b   :  { %699 = vmatpush.msrb.mxu0 %v2665_v36 }
  0x8c   :  { %718 = vmatpush.msrb.mxu1 %v2673_v38 }
  0x8d   :  { %700 = vmatpush.msrb.mxu0 %v2677_v40  ;;  %v2995_v40 = vperm.slane %v91_v14, 1 }
  0x8e   :  { %719 = vmatpush.msrb.mxu1 %v2685_v42 }
  0x8f   :  { %701 = vmatpush.msrb.mxu0 %v2689_v44  ;;  %4173 = vst [vmem:[#allocation32_spill] sm:$0xff] %v2995_v40 }
  0x90   :  { %720 = vmatpush.msrb.mxu1 %v2697_v46  ;;  %v371_v46 = vld [vmem:[#allocation3 + $0x8] sm:$0xff] }
  0x91   :  { %702 = vmatpush.msrb.mxu0 %v2701_v48  ;;  %436 = vmatmul.f32.vlgmr.msrb.gmra.mxu2 %v371_v46 }
  0x92   :  { %721 = vmatpush.msrb.mxu1 %v2709_v50  ;;  %456 = vmatmul.f32.vlgmr.msrb.gmra.mxu3 %v371_v46 }
  0x93   :  { %703 = vmatpush.msrb.mxu0 %v2713_v52 }
  0x94   :  { %722 = vmatpush.msrb.mxu1 %v2723_v55  ;;  %476 = vmatmul.f32.vlgmr.msra.gmra.mxu0 %v371_v46 }
  0x95   :  { %816 = vmatpush.msra.mxu0 %v2721_v54  ;;  %v3007_v54 = vld [vmem:[%s3995_s5] ss:$0 sm:$0xff] }
  0x96   :  { %723 = vmatpush.msrb.mxu1 %v2735_v59 }
  0x97   :  { %817 = vmatpush.msra.mxu0 %v4140_v3 }
  0x99   :  { %818 = vmatpush.msra.mxu0 %v4143_v12 }
  0x9b   :  { %819 = vmatpush.msra.mxu0 %v4146_v21 }
  0x9d   :  { %820 = vmatpush.msra.mxu0 %v4149_v30 }
  0x9f   :  { %821 = vmatpush.msra.mxu0 %v4151_v35 }
  0xa1   :  { %822 = vmatpush.msra.mxu0 %v4154_v47 }
  0xa3   :  { %823 = vmatpush.msra.mxu0 %v4156_v2 }
  0xa5   :  { %824 = vmatpush.msra.mxu0 %v4158_v61 }
  0xa7   :  { %825 = vmatpush.msra.mxu0 %v4160_v15 }
  0xa9   :  { %826 = vmatpush.msra.mxu0 %v4162_v18 }
  0xab   :  { %827 = vmatpush.msra.mxu0 %v4164_v24 }
  0xad   :  { %828 = vmatpush.msra.mxu0 %v2837_v62 }
  0xaf   :  { %829 = vmatpush.msra.mxu0 %v4167_v26 }
  0xb1   :  { %v170_v20 = vpop.f32.mrf.mxu0  ;;  %830 = vmatpush.msra.mxu0 %v2853_v53  ;;  %v3074_v53 = vld [vmem:[#allocation9 + $0x90] sm:$0xff] }
  0xb2   :  { %v171_v23 = vadd.f32 %v170_v20, %v2992_v17 }
  0xb3   :  { %831 = vmatpush.msra.mxu0 %v2861_v37  ;;  %v3071_v37 = vld [vmem:[#allocation9 + $0xa8] sm:$0xff] }
  0xb4   :  { %v190_v42 = vpop.f32.mrf.mxu1 }
  0xb5   :  { %v191_v48 = vadd.f32 %v190_v42, %v2995_v40 }
  0xb8   :  { %v278_v27 = vpop.f32.mrf.mxu3 }
  0xb9   :  { %v321_v31 = vadd.f32 %v278_v27, %v171_v23 }
  0xbb   :  { %v2268_v34 = vmul.f32 -1.442695, %v321_v31 }
  0xbd   :  { %2294 = vpow2.f32 %v2268_v34 }
  0xc3   :  { %v2295_v36 = vpop.eup %2294 }
  0xc4   :  { %v325_v38 = vadd.f32 1.0, %v2295_v36 }
  0xc6   :  { %2296 = vrcp.f32 %v325_v38  ;;  %vm331_vm0 = vweird.f32 %v325_v38  ;;  %v337_v51 = vand.u32 2147483648, %v325_v38  ;;  %v335_v9 = vand.u32 2147483647, %v325_v38 }
  0xc7   :  { %v210_v1 = vpop.f32.mrf.mxu2 }
  0xc8   :  { %v338_v41 = vor.u32 1.1754944e-38, %v337_v51  ;;  %vm336_vm3 = vcmp.eq.f32.partialorder %v335_v9, 8.507059e+37  ;;  %v211_v4 = vadd.f32 %v210_v1, %v3012_v0  ;;  %v3110_v51 = vld [vmem:[#allocation8 + $0x148] sm:$0xff]  ;;  %v3114_v9 = vld [vmem:[#allocation8 + $0x130] sm:$0xff] }
  0xc9   :  { %v3135_v1 = vld [vmem:[#allocation8 + $0xe8] sm:$0xff] }
  0xcc   :  { %v2297_v44 = vpop.eup %2296 }
  0xcd   :  { %v327_v50 = vmul.f32 %v2297_v44, %v325_v38  ;;  %vm332_vm1 = vweird.f32 %v2297_v44  ;;  %v3084_v38 = vld [vmem:[#allocation3 + $0x10] sm:$0xff] }
  0xce   :  { %vm333_vm2 = vmor %vm331_vm0, %vm332_vm1  ;;  %704 = vmatmul.f32.vlgmr.msrb.gmra.mxu0 %v3084_v38 }
  0xcf   :  { %v328_v55 = vsub.f32 1.0, %v327_v50  ;;  %v3095_v50 = vld [vmem:[#allocation9 + $0x18] sm:$0xff] }
  0xd1   :  { %v298_v52 = vpop.f32.mrf.mxu0  ;;  %v329_v43 = vmul.f32 %v2297_v44, %v328_v55 }
  0xd2   :  { %v341_v59 = vadd.f32 %v298_v52, %v191_v48  ;;  %v3092_v48 = vld [vmem:[#allocation9 + $0x30] sm:$0xff]  ;;  %v3097_v52 = vld [vmem:[#allocation8 + $0x178] sm:$0xff] }
  0xd3   :  { %v330_v6 = vadd.f32 %v2297_v44, %v329_v43  ;;  %728 = vmatpush.msrb.mxu2 %v3097_v52  ;;  %996 = vmatpush.msrb.mxu0 %v3097_v52  ;;  %v3108_v43 = vld [vmem:[#allocation8 + $0x160] sm:$0xff] }
  0xd4   :  { %v2269_v39 = vmul.f32 -1.442695, %v341_v59  ;;  %v318_v12 = vpop.f32.mrf.mxu1  ;;  %v3101_v59 = vld [vmem:[#allocation9] sm:$0xff] }
  0xd5   :  { %v334_v28 = vsel %vm333_vm2, %v2297_v44, %v330_v6  ;;  %v361_v30 = vadd.f32 %v3007_v54, %v318_v12  ;;  %v3088_v44 = vld [vmem:[#allocation9 + $0x48] sm:$0xff]  ;;  %729 = vmatpush.msrb.mxu2 %v3108_v43  ;;  %997 = vmatpush.msrb.mxu0 %v3108_v43  ;;  %v3121_v12 = vld [vmem:[#allocation8 + $0x118] sm:$0xff] }
  0xd6   :  { %2298 = vpow2.f32 %v2269_v39  ;;  %v339_v35 = vsel %vm336_vm3, %v338_v41, %v334_v28 }
  0xd7   :  { %v362_v33 = vmul.f32 %v361_v30, %v339_v35  ;;  %730 = vmatpush.msrb.mxu2 %v3110_v51  ;;  %998 = vmatpush.msrb.mxu0 %v3110_v51  ;;  %v3129_v30 = vld [vmem:[#allocation8 + $0x100] sm:$0xff] }
  0xd9   :  { %v363_v2 = vadd.f32 %v362_v33, %v211_v4  ;;  %731 = vmatpush.msrb.mxu2 %v3114_v9  ;;  %999 = vmatpush.msrb.mxu0 %v3114_v9 }
  0xdb   :  { %732 = vmatpush.msrb.mxu2 %v3121_v12  ;;  %1000 = vmatpush.msrb.mxu0 %v3121_v12 }
  0xdc   :  { %v2299_v3 = vpop.eup %2298 }
  0xdd   :  { %v345_v21 = vadd.f32 1.0, %v2299_v3  ;;  %733 = vmatpush.msrb.mxu2 %v3129_v30  ;;  %1001 = vmatpush.msrb.mxu0 %v3129_v30 }
  0xdf   :  { %2300 = vrcp.f32 %v345_v21  ;;  %v357_v14 = vand.u32 2147483648, %v345_v21  ;;  %v355_v23 = vand.u32 2147483647, %v345_v21  ;;  %vm351_vm5 = vweird.f32 %v345_v21  ;;  %734 = vmatpush.msrb.mxu2 %v3135_v1  ;;  %1002 = vmatpush.msrb.mxu0 %v3135_v1 }
  0xe0   :  { %2302 = vtanh.f32 %v363_v2  ;;  %v3140_v2 = vld [vmem:[#allocation8 + $0xd0] sm:$0xff] }
  0xe1   :  { %v358_v15 = vor.u32 1.1754944e-38, %v357_v14  ;;  %vm356_vm7 = vcmp.eq.f32.partialorder %v355_v23, 8.507059e+37  ;;  %735 = vmatpush.msrb.mxu2 %v3140_v2  ;;  %1003 = vmatpush.msrb.mxu0 %v3140_v2 }
  0xe5   :  { %v2301_v47 = vpop.eup %2300 }
  0xe6   :  { %v347_v8 = vmul.f32 %v2301_v47, %v345_v21  ;;  %vm352_vm4 = vweird.f32 %v2301_v47  ;;  %v2303_v62 = vpop.eup %2302  ;;  %v3126_v21 = vld [vmem:[#allocation8 + $0x170] sm:$0xff] }
  0xe7   :  { %vm353_vm6 = vmor %vm351_vm5, %vm352_vm4 }
  0xe8   :  { %v348_v11 = vsub.f32 1.0, %v347_v8 }
  0xea   :  { %v349_v20 = vmul.f32 %v2301_v47, %v348_v11 }
  0xec   :  { %v350_v61 = vadd.f32 %v2301_v47, %v349_v20 }
  0xee   :  { %v354_v18 = vsel %vm353_vm6, %v2301_v47, %v350_v61  ;;  %v3146_v61 = vld [vmem:[#allocation8 + $0xb8] sm:$0xff] }
  0xef   :  { %v359_v24 = vsel %vm356_vm7, %v358_v15, %v354_v18  ;;  %736 = vmatpush.msrb.mxu2 %v3146_v61  ;;  %1004 = vmatpush.msrb.mxu0 %v3146_v61 }
  0xf0   :  { %v365_v27 = vsub.f32 1.0, %v359_v24  ;;  %v367_v34 = vmul.f32 %v359_v24, %v2726_v56 }
  0xf2   :  { %v366_v31 = vmul.f32 %v2303_v62, %v365_v27 }
  0xf4   :  { %v3024_v36 = vadd.f32 %v367_v34, %v366_v31  ;;  %v3153_v31 = vld [vmem:[#allocation8 + $0xa0] sm:$0xff] }
  0xf5   :  { %737 = vmatpush.msrb.mxu2 %v3153_v31  ;;  %1005 = vmatpush.msrb.mxu0 %v3153_v31 }
  0xf6   :  { %369 = vst [vmem:[#allocation11] sm:$0xff] %v3024_v36  ;;  %544 = vmatmul.f32.vlgmr.msra.gmra.mxu1 %v3024_v36  ;;  %564 = vmatmul.f32.vlgmr.msra.gmra.mxu2 %v3024_v36 }
  0xf7   :  { %584 = vmatmul.f32.vlgmr.msra.gmra.mxu3 %v3024_v36  ;;  %836 = vmatpush.msra.mxu1 %v2739_v60 }
  0xf9   :  { %837 = vmatpush.msra.mxu1 %v2749_v63  ;;  %v3078_v63 = vld [vmem:[#allocation9 + $0x78] sm:$0xff] }
  0xfb   :  { %838 = vmatpush.msra.mxu1 %v2758_v45 }
  0xfd   :  { %839 = vmatpush.msra.mxu1 %v2768_v32  ;;  %v3068_v32 = vld [vmem:[#allocation9 + $0xc0] sm:$0xff] }
  0xfe   :  { %724 = vmatmul.f32.vlgmr.msrb.gmra.mxu1 %v3084_v38 }
  0xff   :  { %840 = vmatpush.msra.mxu1 %v2778_v58 }
 0x101   :  { %841 = vmatpush.msra.mxu1 %v2788_v5  ;;  %v3046_v5 = vld [vmem:[#allocation9 + $0x168] sm:$0xff] }
 0x102   :  { %796 = vmatpush.msrb.mxu3 %v3046_v5 }
 0x103   :  { %842 = vmatpush.msra.mxu1 %v2798_v7  ;;  %v3049_v7 = vld [vmem:[#allocation9 + $0x150] sm:$0xff] }
 0x104   :  { %797 = vmatpush.msrb.mxu3 %v3049_v7 }
 0x105   :  { %843 = vmatpush.msra.mxu1 %v2808_v10  ;;  %v3052_v10 = vld [vmem:[#allocation9 + $0x138] sm:$0xff] }
 0x106   :  { %798 = vmatpush.msrb.mxu3 %v3052_v10 }
 0x107   :  { %844 = vmatpush.msra.mxu1 %v2818_v13  ;;  %v3055_v13 = vld [vmem:[#allocation9 + $0x120] sm:$0xff] }
 0x108   :  { %799 = vmatpush.msrb.mxu3 %v3055_v13 }
 0x109   :  { %845 = vmatpush.msra.mxu1 %v2826_v16  ;;  %v3058_v16 = vld [vmem:[#allocation9 + $0x108] sm:$0xff] }
 0x10a   :  { %800 = vmatpush.msrb.mxu3 %v3058_v16 }
 0x10b   :  { %846 = vmatpush.msra.mxu1 %v2834_v19  ;;  %v3061_v19 = vld [vmem:[#allocation9 + $0xf0] sm:$0xff] }
 0x10c   :  { %801 = vmatpush.msrb.mxu3 %v3061_v19 }
 0x10d   :  { %847 = vmatpush.msra.mxu1 %v2842_v57  ;;  %v3081_v57 = vld [vmem:[#allocation9 + $0x60] sm:$0xff] }
 0x10f   :  { %848 = vmatpush.msra.mxu1 %v2850_v22 }
 0x111   :  { %849 = vmatpush.msra.mxu1 %v2858_v25  ;;  %v3064_v25 = vld [vmem:[#allocation9 + $0xd8] sm:$0xff]  ;;  %v477_v8 = vpop.f32.mrf.mxu0 }
 0x112   :  { %802 = vmatpush.msrb.mxu3 %v3064_v25  ;;  %v478_v18 = vadd.f32 %v477_v8, %v3012_v0  ;;  %v3194_v8 = vld [vmem:[#allocation8 + $0x168] sm:$0xff] }
 0x113   :  { %850 = vmatpush.msra.mxu1 %v2866_v29 }
 0x114   :  { %v437_v22 = vpop.f32.mrf.mxu2  ;;  %803 = vmatpush.msrb.mxu3 %v3068_v32 }
 0x115   :  { %851 = vmatpush.msra.mxu1 %v2872_v49  ;;  %v438_v29 = vadd.f32 %v437_v22, %v2992_v17  ;;  %v457_v56 = vpop.f32.mrf.mxu3 }
 0x116   :  { %804 = vmatpush.msrb.mxu3 %v3071_v37  ;;  %v458_v58 = vadd.f32 %v457_v56, %v2995_v40 }
 0x117   :  { %1064 = vmatpush.msrb.mxu1 %v3046_v5 }
 0x118   :  { %805 = vmatpush.msrb.mxu3 %v3074_v53 }
 0x119   :  { %1065 = vmatpush.msrb.mxu1 %v3049_v7 }
 0x11a   :  { %806 = vmatpush.msrb.mxu3 %v3078_v63 }
 0x11b   :  { %1066 = vmatpush.msrb.mxu1 %v3052_v10 }
 0x11c   :  { %807 = vmatpush.msrb.mxu3 %v3081_v57 }
 0x11d   :  { %1067 = vmatpush.msrb.mxu1 %v3055_v13 }
 0x11e   :  { %808 = vmatpush.msrb.mxu3 %v3088_v44 }
 0x11f   :  { %1068 = vmatpush.msrb.mxu1 %v3058_v16 }
 0x120   :  { %809 = vmatpush.msrb.mxu3 %v3092_v48 }
 0x121   :  { %1069 = vmatpush.msrb.mxu1 %v3061_v19 }
 0x122   :  { %810 = vmatpush.msrb.mxu3 %v3095_v50 }
 0x123   :  { %1070 = vmatpush.msrb.mxu1 %v3064_v25 }
 0x124   :  { %811 = vmatpush.msrb.mxu3 %v3101_v59 }
 0x125   :  { %1071 = vmatpush.msrb.mxu1 %v3068_v32 }
 0x126   :  { %976 = vmatpush.msra.mxu3 %v3126_v21 }
 0x127   :  { %1072 = vmatpush.msrb.mxu1 %v3071_v37 }
 0x129   :  { %1073 = vmatpush.msrb.mxu1 %v3074_v53 }
 0x12b   :  { %1074 = vmatpush.msrb.mxu1 %v3078_v63 }
 0x12d   :  { %1075 = vmatpush.msrb.mxu1 %v3081_v57 }
 0x12f   :  { %1076 = vmatpush.msrb.mxu1 %v3088_v44 }
 0x131   :  { %1077 = vmatpush.msrb.mxu1 %v3092_v48 }
 0x133   :  { %1078 = vmatpush.msrb.mxu1 %v3095_v50 }
 0x135   :  { %1079 = vmatpush.msrb.mxu1 %v3101_v59 }
 0x173   :  { %v545_v45 = vpop.f32.mrf.mxu1 }
 0x174   :  { %v588_v49 = vadd.f32 %v545_v45, %v438_v29 }
 0x176   :  { %v2270_v60 = vmul.f32 -1.442695, %v588_v49  ;;  %v3159_v49 = vld [vmem:[#allocation8 + $0x88] sm:$0xff] }
 0x177   :  { %738 = vmatpush.msrb.mxu2 %v3159_v49  ;;  %1006 = vmatpush.msrb.mxu0 %v3159_v49 }
 0x178   :  { %2304 = vpow2.f32 %v2270_v60 }
 0x179   :  { %v565_v26 = vpop.f32.mrf.mxu2 }
 0x17a   :  { %v608_v42 = vadd.f32 %v565_v26, %v458_v58  ;;  %v585_v14 = vpop.f32.mrf.mxu3  ;;  %v3166_v26 = vld [vmem:[#allocation8 + $0x70] sm:$0xff] }
 0x17b   :  { %v628_v62 = vadd.f32 %v3007_v54, %v585_v14  ;;  %739 = vmatpush.msrb.mxu2 %v3166_v26  ;;  %1007 = vmatpush.msrb.mxu0 %v3166_v26  ;;  %v3213_v14 = vld [vmem:[#allocation8 + $0x140] sm:$0xff] }
 0x17c   :  { %v2271_v46 = vmul.f32 -1.442695, %v608_v42  ;;  %4176 = vst [vmem:[#allocation34_spill] sm:$0xff] %v3213_v14 }
 0x17e   :  { %v2305_v55 = vpop.eup %2304  ;;  %2306 = vpow2.f32 %v2271_v46 }
 0x17f   :  { %v592_v39 = vadd.f32 1.0, %v2305_v55  ;;  %v3171_v55 = vld [vmem:[#allocation8 + $0x58] sm:$0xff] }
 0x180   :  { %740 = vmatpush.msrb.mxu2 %v3171_v55  ;;  %1008 = vmatpush.msrb.mxu0 %v3171_v55 }
 0x181   :  { %2308 = vrcp.f32 %v592_v39  ;;  %v604_v33 = vand.u32 2147483648, %v592_v39  ;;  %v602_v47 = vand.u32 2147483647, %v592_v39  ;;  %vm598_vm9 = vweird.f32 %v592_v39 }
 0x183   :  { %v605_v15 = vor.u32 1.1754944e-38, %v604_v33  ;;  %vm603_vm11 = vcmp.eq.f32.partialorder %v602_v47, 8.507059e+37 }
 0x184   :  { %v2307_v6 = vpop.eup %2306 }
 0x185   :  { %v3117_v3 = vadd.f32 1.0, %v2307_v6  ;;  %v3176_v6 = vld [vmem:[#allocation8 + $0x40] sm:$0xff] }
 0x186   :  { %741 = vmatpush.msrb.mxu2 %v3176_v6  ;;  %1009 = vmatpush.msrb.mxu0 %v3176_v6 }
 0x187   :  { %v2309_v41 = vpop.eup %2308  ;;  %2310 = vrcp.f32 %v3117_v3  ;;  %v624_v29 = vand.u32 2147483648, %v3117_v3  ;;  %v622_v56 = vand.u32 2147483647, %v3117_v3  ;;  %vm618_vm13 = vweird.f32 %v3117_v3 }
 0x188   :  { %v594_v28 = vmul.f32 %v2309_v41, %v592_v39  ;;  %vm599_vm8 = vweird.f32 %v2309_v41 }
 0x189   :  { %vm600_vm10 = vmor %vm598_vm9, %vm599_vm8  ;;  %v625_v42 = vor.u32 1.1754944e-38, %v624_v29  ;;  %vm623_vm15 = vcmp.eq.f32.partialorder %v622_v56, 8.507059e+37  ;;  %v3253_v29 = vld [vmem:[#allocation8 + $0xc8] sm:$0xff]  ;;  %v3261_v56 = vld [vmem:[#allocation8 + $0xb0] sm:$0xff] }
 0x18a   :  { %v595_v35 = vsub.f32 1.0, %v594_v28  ;;  %4186 = vst [vmem:[#allocation42_spill] sm:$0xff] %v3253_v29 }
 0x18b   :  { %4188 = vst [vmem:[#allocation30_spill] sm:$0xff] %v3261_v56 }
 0x18c   :  { %v596_v4 = vmul.f32 %v2309_v41, %v595_v35  ;;  %v3185_v35 = vld [vmem:[#allocation8 + $0x10] sm:$0xff] }
 0x18d   :  { %v2311_v11 = vpop.eup %2310 }
 0x18e   :  { %v614_v20 = vmul.f32 %v2311_v11, %v3117_v3  ;;  %v597_v23 = vadd.f32 %v2309_v41, %v596_v4  ;;  %vm619_vm12 = vweird.f32 %v2311_v11  ;;  %v3181_v3 = vld [vmem:[#allocation8 + $0x28] sm:$0xff] }
 0x18f   :  { %vm620_vm14 = vmor %vm618_vm13, %vm619_vm12  ;;  %742 = vmatpush.msrb.mxu2 %v3181_v3  ;;  %1010 = vmatpush.msrb.mxu0 %v3181_v3 }
 0x190   :  { %v615_v24 = vsub.f32 1.0, %v614_v20  ;;  %v601_v27 = vsel %vm600_vm10, %v2309_v41, %v597_v23  ;;  %v3215_v20 = vld [vmem:[#allocation8 + $0x120] sm:$0xff]  ;;  %v3217_v23 = vld [vmem:[#allocation8 + $0x128] sm:$0xff] }
 0x191   :  { %v606_v34 = vsel %vm603_vm11, %v605_v15, %v601_v27  ;;  %743 = vmatpush.msrb.mxu2 %v3185_v35  ;;  %1011 = vmatpush.msrb.mxu0 %v3185_v35  ;;  %4177 = vst [vmem:[#allocation26_spill] sm:$0xff] %v3215_v20  ;;  %v3223_v15 = vld [vmem:[#allocation8 + $0x108] sm:$0xff]  ;;  %v3239_v27 = vld [vmem:[#allocation8 + $0xf8] sm:$0xff] }
 0x192   :  { %v616_v22 = vmul.f32 %v2311_v11, %v615_v24  ;;  %v629_v45 = vmul.f32 %v628_v62, %v606_v34  ;;  %744 = vmatmul.f32.vlgmr.msrb.gmra.mxu2 %v3084_v38  ;;  %v3209_v38 = vld [vmem:[#allocation8 + $0x138] sm:$0xff]  ;;  %4178 = vst [vmem:[#allocation37_spill] sm:$0xff] %v3217_v23  ;;  %v3237_v24 = vld [vmem:[#allocation8 + $0xf0] sm:$0xff]  ;;  %v3245_v34 = vld [vmem:[#allocation8 + $0xe0] sm:$0xff] }
 0x193   :  { %956 = vmatpush.msra.mxu2 %v3194_v8  ;;  %4175 = vst [vmem:[#allocation35_spill] sm:$0xff] %v3209_v38  ;;  %v3243_v62 = vld [vmem:[#allocation8 + $0xd8] sm:$0xff] }
 0x194   :  { %v617_v58 = vadd.f32 %v2311_v11, %v616_v22  ;;  %v630_v60 = vadd.f32 %v629_v45, %v478_v18  ;;  %4179 = vst [vmem:[#allocation36_spill] sm:$0xff] %v3223_v15  ;;  %v3225_v18 = vld [vmem:[#allocation8 + $0x110] sm:$0xff]  ;;  %v3251_v22 = vld [vmem:[#allocation8 + $0xc0] sm:$0xff]  ;;  %v3259_v45 = vld [vmem:[#allocation8 + $0xa8] sm:$0xff] }
 0x195   :  { %4180 = vst [vmem:[#allocation27_spill] sm:$0xff] %v3225_v18 }
 0x196   :  { %v621_v46 = vsel %vm620_vm14, %v2311_v11, %v617_v58  ;;  %2312 = vtanh.f32 %v630_v60  ;;  %v3207_v11 = vld [vmem:[#allocation8 + $0x158] sm:$0xff]  ;;  %4181 = vst [vmem:[#allocation39_spill] sm:$0xff] %v3237_v24  ;;  %v3267_v58 = vld [vmem:[#allocation8 + $0x90] sm:$0xff] }
 0x197   :  { %v626_v39 = vsel %vm623_vm15, %v625_v42, %v621_v46  ;;  %977 = vmatpush.msra.mxu3 %v3207_v11  ;;  %4182 = vst [vmem:[#allocation38_spill] sm:$0xff] %v3239_v27  ;;  %v3269_v60 = vld [vmem:[#allocation8 + $0x98] sm:$0xff]  ;;  %v3277_v46 = vld [vmem:[#allocation8 + $0x80] sm:$0xff] }
 0x198   :  { %v632_v41 = vsub.f32 1.0, %v626_v39  ;;  %v634_v4 = vmul.f32 %v626_v39, %v3024_v36  ;;  %v3205_v36 = vld [vmem:[#allocation8 + $0x150] sm:$0xff]  ;;  %4183 = vst [vmem:[#allocation28_spill] sm:$0xff] %v3243_v62  ;;  %v3275_v42 = vld [vmem:[#allocation8 + $0x78] sm:$0xff]  ;;  %v3283_v39 = vld [vmem:[#allocation8 + $0x60] sm:$0xff] }
 0x199   :  { %4174 = vst [vmem:[#allocation24_spill] sm:$0xff] %v3205_v36  ;;  %957 = vmatpush.msra.mxu2 %v3205_v36  ;;  %978 = vmatpush.msra.mxu3 %v3213_v14 }
 0x19a   :  { %4184 = vst [vmem:[#allocation40_spill] sm:$0xff] %v3245_v34 }
 0x19b   :  { %958 = vmatpush.msra.mxu2 %v3209_v38  ;;  %979 = vmatpush.msra.mxu3 %v3217_v23  ;;  %4185 = vst [vmem:[#allocation29_spill] sm:$0xff] %v3251_v22 }
 0x19c   :  { %v2313_v28 = vpop.eup %2312  ;;  %4187 = vst [vmem:[#allocation41_spill] sm:$0xff] %v3259_v45 }
 0x19d   :  { %v633_v33 = vmul.f32 %v2313_v28, %v632_v41  ;;  %959 = vmatpush.msra.mxu2 %v3215_v20  ;;  %980 = vmatpush.msra.mxu3 %v3225_v18  ;;  %4189 = vst [vmem:[#allocation43_spill] sm:$0xff] %v3267_v58  ;;  %v3285_v41 = vld [vmem:[#allocation8 + $0x68] sm:$0xff] }
 0x19e   :  { %4190 = vst [vmem:[#allocation31_spill] sm:$0xff] %v3269_v60  ;;  %v3291_v28 = vld [vmem:[#allocation8 + $0x48] sm:$0xff] }
 0x19f   :  { %v3191_v47 = vadd.f32 %v634_v4, %v633_v33  ;;  %960 = vmatpush.msra.mxu2 %v3223_v15  ;;  %981 = vmatpush.msra.mxu3 %v3239_v27  ;;  %4191 = vst [vmem:[#allocation44_spill] sm:$0xff] %v3275_v42  ;;  %v3293_v33 = vld [vmem:[#allocation8 + $0x50] sm:$0xff] }
 0x1a0   :  { %4192 = vst [vmem:[#allocation16_spill] sm:$0xff] %v3277_v46  ;;  %v3299_v4 = vld [vmem:[#allocation8 + $0x30] sm:$0xff] }
 0x1a1   :  { %637 = vst [vmem:[#allocation11 + $0x8] sm:$0xff] %v3191_v47  ;;  %812 = vmatmul.f32.vlgmr.msrb.gmra.mxu3 %v3191_v47  ;;  %832 = vmatmul.f32.vlgmr.msra.gmra.mxu0 %v3191_v47 }
 0x1a2   :  { %852 = vmatmul.f32.vlgmr.msra.gmra.mxu1 %v3191_v47  ;;  %1224 = vmatpush.msra.mxu0 %v3194_v8  ;;  %4193 = vst [vmem:[#allocation45_spill] sm:$0xff] %v3283_v39 }
 0x1a3   :  { %1244 = vmatpush.msra.mxu1 %v3126_v21  ;;  %961 = vmatpush.msra.mxu2 %v3237_v24  ;;  %4194 = vst [vmem:[#allocation17_spill] sm:$0xff] %v3285_v41 }
 0x1a4   :  { %1225 = vmatpush.msra.mxu0 %v3205_v36  ;;  %982 = vmatpush.msra.mxu3 %v3245_v34  ;;  %4195 = vst [vmem:[#allocation46_spill] sm:$0xff] %v3291_v28  ;;  %v3420_v36 = vld [vmem:[#allocation9 + $0x10] sm:$0xff] }
 0x1a5   :  { %1245 = vmatpush.msra.mxu1 %v3207_v11  ;;  %962 = vmatpush.msra.mxu2 %v3243_v62  ;;  %4196 = vst [vmem:[#allocation18_spill] sm:$0xff] %v3293_v33 }
 0x1a6   :  { %1226 = vmatpush.msra.mxu0 %v3209_v38  ;;  %983 = vmatpush.msra.mxu3 %v3253_v29  ;;  %4197 = vst [vmem:[#allocation47_spill] sm:$0xff] %v3299_v4  ;;  %v3381_v38 = vld [vmem:[#allocation9 + $0x98] sm:$0xff] }
 0x1a7   :  { %1246 = vmatpush.msra.mxu1 %v3213_v14  ;;  %963 = vmatpush.msra.mxu2 %v3251_v22  ;;  %v3418_v14 = vld [vmem:[#allocation9 + $0x8] sm:$0xff] }
 0x1a8   :  { %1227 = vmatpush.msra.mxu0 %v3215_v20  ;;  %984 = vmatpush.msra.mxu3 %v3261_v56  ;;  %v3366_v20 = vld [vmem:[#allocation9 + $0xc8] sm:$0xff] }
 0x1a9   :  { %1247 = vmatpush.msra.mxu1 %v3217_v23  ;;  %964 = vmatpush.msra.mxu2 %v3259_v45  ;;  %v3375_v23 = vld [vmem:[#allocation9 + $0xb0] sm:$0xff] }
 0x1aa   :  { %1228 = vmatpush.msra.mxu0 %v3223_v15  ;;  %985 = vmatpush.msra.mxu3 %v3269_v60 }
 0x1ab   :  { %1248 = vmatpush.msra.mxu1 %v3225_v18  ;;  %965 = vmatpush.msra.mxu2 %v3267_v58 }
 0x1ac   :  { %1229 = vmatpush.msra.mxu0 %v3237_v24  ;;  %986 = vmatpush.msra.mxu3 %v3277_v46  ;;  %v3360_v24 = vld [vmem:[#allocation9 + $0xe0] sm:$0xff] }
 0x1ad   :  { %1249 = vmatpush.msra.mxu1 %v3239_v27  ;;  %966 = vmatpush.msra.mxu2 %v3275_v42  ;;  %v3362_v27 = vld [vmem:[#allocation9 + $0xe8] sm:$0xff] }
 0x1ae   :  { %1230 = vmatpush.msra.mxu0 %v3243_v62  ;;  %987 = vmatpush.msra.mxu3 %v3285_v41  ;;  %v3354_v62 = vld [vmem:[#allocation9 + $0xf8] sm:$0xff]  ;;  %4208 = vst [vmem:[#allocation52_spill] sm:$0xff] %v3362_v27 }
 0x1af   :  { %1250 = vmatpush.msra.mxu1 %v3245_v34  ;;  %967 = vmatpush.msra.mxu2 %v3283_v39  ;;  %v3356_v34 = vld [vmem:[#allocation9 + $0x100] sm:$0xff] }
 0x1b0   :  { %1231 = vmatpush.msra.mxu0 %v3251_v22  ;;  %988 = vmatpush.msra.mxu3 %v3293_v33  ;;  %v3347_v22 = vld [vmem:[#allocation9 + $0x110] sm:$0xff]  ;;  %4207 = vst [vmem:[#allocation51_spill] sm:$0xff] %v3356_v34 }
 0x1b1   :  { %1251 = vmatpush.msra.mxu1 %v3253_v29  ;;  %968 = vmatpush.msra.mxu2 %v3291_v28  ;;  %4205 = vst [vmem:[#allocation49_spill] sm:$0xff] %v3347_v22 }
 0x1b2   :  { %1232 = vmatpush.msra.mxu0 %v3259_v45  ;;  %v3343_v45 = vld [vmem:[#allocation9 + $0x128] sm:$0xff] }
 0x1b3   :  { %1252 = vmatpush.msra.mxu1 %v3261_v56  ;;  %969 = vmatpush.msra.mxu2 %v3299_v4  ;;  %v3345_v56 = vld [vmem:[#allocation9 + $0x130] sm:$0xff] }
 0x1b4   :  { %1233 = vmatpush.msra.mxu0 %v3267_v58  ;;  %v3329_v58 = vld [vmem:[#allocation9 + $0x158] sm:$0xff]  ;;  %4204 = vst [vmem:[#allocation25_spill] sm:$0xff] %v3345_v56 }
 0x1b5   :  { %1253 = vmatpush.msra.mxu1 %v3269_v60  ;;  %4203 = vst [vmem:[#allocation23_spill] sm:$0xff] %v3329_v58  ;;  %v3331_v60 = vld [vmem:[#allocation9 + $0x160] sm:$0xff] }
 0x1b6   :  { %1234 = vmatpush.msra.mxu0 %v3275_v42  ;;  %v3301_v42 = vld [vmem:[#allocation8 + $0x38] sm:$0xff] }
 0x1b7   :  { %1254 = vmatpush.msra.mxu1 %v3277_v46  ;;  %4198 = vst [vmem:[#allocation19_spill] sm:$0xff] %v3301_v42  ;;  %989 = vmatpush.msra.mxu3 %v3301_v42  ;;  %v3307_v46 = vld [vmem:[#allocation8 + $0x18] sm:$0xff] }
 0x1b8   :  { %1235 = vmatpush.msra.mxu0 %v3283_v39  ;;  %4199 = vst [vmem:[#allocation20_spill] sm:$0xff] %v3307_v46  ;;  %v3309_v39 = vld [vmem:[#allocation8 + $0x20] sm:$0xff]  ;;  %970 = vmatpush.msra.mxu2 %v3307_v46 }
 0x1b9   :  { %1255 = vmatpush.msra.mxu1 %v3285_v41  ;;  %4200 = vst [vmem:[#allocation48_spill] sm:$0xff] %v3309_v39  ;;  %990 = vmatpush.msra.mxu3 %v3309_v39  ;;  %v3315_v41 = vld [vmem:[#allocation8] sm:$0xff] }
 0x1ba   :  { %1236 = vmatpush.msra.mxu0 %v3291_v28  ;;  %4201 = vst [vmem:[#allocation21_spill] sm:$0xff] %v3315_v41  ;;  %v3317_v28 = vld [vmem:[#allocation8 + $0x8] sm:$0xff]  ;;  %971 = vmatpush.msra.mxu2 %v3315_v41 }
 0x1bb   :  { %1256 = vmatpush.msra.mxu1 %v3293_v33  ;;  %4202 = vst [vmem:[#allocation22_spill] sm:$0xff] %v3317_v28  ;;  %991 = vmatpush.msra.mxu3 %v3317_v28  ;;  %v3323_v33 = vld [vmem:[#allocation9 + $0x170] sm:$0xff] }
 0x1bc   :  { %1237 = vmatpush.msra.mxu0 %v3299_v4  ;;  %v3325_v4 = vld [vmem:[#allocation9 + $0x178] sm:$0xff]  ;;  %1084 = vmatpush.msrb.mxu2 %v3323_v33 }
 0x1bd   :  { %1257 = vmatpush.msra.mxu1 %v3301_v42  ;;  %v705_v42 = vpop.f32.mrf.mxu0  ;;  %1104 = vmatpush.msrb.mxu3 %v3325_v4 }
 0x1be   :  { %1238 = vmatpush.msra.mxu0 %v3307_v46  ;;  %1085 = vmatpush.msrb.mxu2 %v3329_v58  ;;  %v3337_v46 = vld [vmem:[#allocation9 + $0x140] sm:$0xff] }
 0x1bf   :  { %1258 = vmatpush.msra.mxu1 %v3309_v39  ;;  %1105 = vmatpush.msrb.mxu3 %v3331_v60  ;;  %v3339_v39 = vld [vmem:[#allocation9 + $0x148] sm:$0xff] }
 0x1c0   :  { %1239 = vmatpush.msra.mxu0 %v3315_v41  ;;  %1086 = vmatpush.msrb.mxu2 %v3337_v46  ;;  %v725_v41 = vpop.f32.mrf.mxu1 }
 0x1c1   :  { %1259 = vmatpush.msra.mxu1 %v3317_v28  ;;  %1106 = vmatpush.msrb.mxu3 %v3339_v39  ;;  %v3351_v28 = vld [vmem:[#allocation9 + $0x118] sm:$0xff]  ;;  %v726_v29 = vadd.f32 %v725_v41, %v2995_v40  ;;  %v3368_v41 = vld [vmem:[#allocation9 + $0xd0] sm:$0xff]  ;;  %v706_v40 = vadd.f32 %v705_v42, %v2992_v17  ;;  %v3387_v42 = vld [vmem:[#allocation9 + $0x80] sm:$0xff] }
 0x1c2   :  { %1087 = vmatpush.msrb.mxu2 %v3343_v45  ;;  %4206 = vst [vmem:[#allocation50_spill] sm:$0xff] %v3351_v28 }
 0x1c3   :  { %1107 = vmatpush.msrb.mxu3 %v3345_v56  ;;  %4209 = vst [vmem:[#allocation53_spill] sm:$0xff] %v3368_v41 }
 0x1c4   :  { %1088 = vmatpush.msrb.mxu2 %v3347_v22 }
 0x1c5   :  { %1108 = vmatpush.msrb.mxu3 %v3351_v28 }
 0x1c6   :  { %1089 = vmatpush.msrb.mxu2 %v3354_v62 }
 0x1c7   :  { %1109 = vmatpush.msrb.mxu3 %v3356_v34  ;;  %v3377_v34 = vld [vmem:[#allocation9 + $0xb8] sm:$0xff] }
 0x1c8   :  { %1090 = vmatpush.msrb.mxu2 %v3360_v24  ;;  %4210 = vst [vmem:[#allocation54_spill] sm:$0xff] %v3377_v34 }
 0x1c9   :  { %1110 = vmatpush.msrb.mxu3 %v3362_v27  ;;  %v3383_v27 = vld [vmem:[#allocation9 + $0xa0] sm:$0xff] }
 0x1ca   :  { %1091 = vmatpush.msrb.mxu2 %v3366_v20  ;;  %4211 = vst [vmem:[#allocation55_spill] sm:$0xff] %v3383_v27 }
 0x1cb   :  { %1111 = vmatpush.msrb.mxu3 %v3368_v41  ;;  %v3403_v41 = vld [vmem:[#allocation9 + $0x58] sm:$0xff] }
 0x1cc   :  { %1092 = vmatpush.msrb.mxu2 %v3375_v23  ;;  %4214 = vst [vmem:[#allocation58_spill] sm:$0xff] %v3403_v41 }
 0x1cd   :  { %1112 = vmatpush.msrb.mxu3 %v3377_v34 }
 0x1ce   :  { %1093 = vmatpush.msrb.mxu2 %v3381_v38 }
 0x1cf   :  { %1113 = vmatpush.msrb.mxu3 %v3383_v27  ;;  %v3401_v27 = vld [vmem:[#allocation9 + $0x50] sm:$0xff] }
 0x1d0   :  { %1094 = vmatpush.msrb.mxu2 %v3387_v42 }
 0x21e   :  { %v833_v15 = vpop.f32.mrf.mxu0 }
 0x21f   :  { %v876_v18 = vadd.f32 %v833_v15, %v726_v29 }
 0x221   :  { %v2273_v28 = vmul.f32 -1.442695, %v876_v18 }
 0x223   :  { %2314 = vpow2.f32 %v2273_v28  ;;  %v3389_v28 = vld [vmem:[#allocation9 + $0x88] sm:$0xff] }
 0x224   :  { %v813_v15 = vpop.f32.mrf.mxu3  ;;  %4212 = vst [vmem:[#allocation56_spill] sm:$0xff] %v3389_v28  ;;  %1114 = vmatpush.msrb.mxu3 %v3389_v28  ;;  %v3416_v28 = vld [vmem:[#allocation9 + $0x28] sm:$0xff] }
 0x225   :  { %v856_v29 = vadd.f32 %v813_v15, %v706_v40  ;;  %v3393_v40 = vld [vmem:[#allocation9 + $0x68] sm:$0xff]  ;;  %v3395_v15 = vld [vmem:[#allocation9 + $0x70] sm:$0xff] }
 0x226   :  { %4213 = vst [vmem:[#allocation57_spill] sm:$0xff] %v3395_v15  ;;  %1095 = vmatpush.msrb.mxu2 %v3393_v40  ;;  %1115 = vmatpush.msrb.mxu3 %v3395_v15  ;;  %v3414_v15 = vld [vmem:[#allocation9 + $0x20] sm:$0xff] }
 0x227   :  { %v2272_v18 = vmul.f32 -1.442695, %v856_v29  ;;  %v907_v29 = vld [vmem:[#allocation3 + $0x18] sm:$0xff] }
 0x228   :  { %972 = vmatmul.f32.vlgmr.msra.gmra.mxu2 %v907_v29  ;;  %992 = vmatmul.f32.vlgmr.msra.gmra.mxu3 %v907_v29 }
 0x229   :  { %v2315_v17 = vpop.eup %2314  ;;  %2316 = vpow2.f32 %v2272_v18  ;;  %1096 = vmatpush.msrb.mxu2 %v3401_v27  ;;  %1116 = vmatpush.msrb.mxu3 %v3403_v41  ;;  %v3408_v18 = vld [vmem:[#allocation9 + $0x38] sm:$0xff] }
 0x22a   :  { %v3397_v34 = vadd.f32 1.0, %v2315_v17  ;;  %v3410_v17 = vld [vmem:[#allocation9 + $0x40] sm:$0xff]  ;;  %1012 = vmatmul.f32.vlgmr.msrb.gmra.mxu0 %v907_v29 }
 0x22b   :  { %1097 = vmatpush.msrb.mxu2 %v3408_v18  ;;  %1117 = vmatpush.msrb.mxu3 %v3410_v17 }
 0x22c   :  { %2318 = vrcp.f32 %v3397_v34  ;;  %1352 = vmatpush.msrb.mxu0 %v3323_v33  ;;  %vm886_vm5 = vweird.f32 %v3397_v34 }
 0x22d   :  { %1098 = vmatpush.msrb.mxu2 %v3414_v15  ;;  %1118 = vmatpush.msrb.mxu3 %v3416_v28 }
 0x22e   :  { %1353 = vmatpush.msrb.mxu0 %v3329_v58 }
 0x22f   :  { %v2317_v56 = vpop.eup %2316  ;;  %1099 = vmatpush.msrb.mxu2 %v3418_v14  ;;  %1119 = vmatpush.msrb.mxu3 %v3420_v36 }
 0x230   :  { %v860_v41 = vadd.f32 1.0, %v2317_v56  ;;  %1354 = vmatpush.msrb.mxu0 %v3337_v46 }
 0x231   :  { %1332 = vmatpush.msra.mxu3 %v3046_v5  ;;  %1264 = vmatpush.msra.mxu2 %v3097_v52 }
 0x232   :  { %2320 = vrcp.f32 %v860_v41  ;;  %v3428_v29 = vpop.eup %2318  ;;  %1355 = vmatpush.msrb.mxu0 %v3343_v45  ;;  %vm866_vm1 = vweird.f32 %v860_v41 }
 0x233   :  { %1333 = vmatpush.msra.mxu3 %v3049_v7  ;;  %v882_v56 = vmul.f32 %v3428_v29, %v3397_v34  ;;  %1265 = vmatpush.msra.mxu2 %v3108_v43  ;;  %v872_v43 = vand.u32 2147483648, %v860_v41  ;;  %vm887_vm4 = vweird.f32 %v3428_v29 }
 0x234   :  { %1356 = vmatpush.msrb.mxu0 %v3347_v22  ;;  %v870_v22 = vand.u32 2147483647, %v860_v41  ;;  %vm888_vm6 = vmor %vm886_vm5, %vm887_vm4 }
 0x235   :  { %1334 = vmatpush.msra.mxu3 %v3052_v10  ;;  %1266 = vmatpush.msra.mxu2 %v3110_v51  ;;  %v883_v7 = vsub.f32 1.0, %v882_v56  ;;  %v853_v51 = vpop.f32.mrf.mxu1  ;;  %v745_v56 = vpop.f32.mrf.mxu2 }
 0x236   :  { %1357 = vmatpush.msrb.mxu0 %v3354_v62  ;;  %vm871_vm3 = vcmp.eq.f32.partialorder %v870_v22, 8.507059e+37 }
 0x237   :  { %1335 = vmatpush.msra.mxu3 %v3055_v13  ;;  %1267 = vmatpush.msra.mxu2 %v3114_v9  ;;  %v884_v13 = vmul.f32 %v3428_v29, %v883_v7  ;;  %v4232_v7 = vld [vmem:[#allocation54_spill] sm:$0xff] }
 0x238   :  { %v2321_v58 = vpop.eup %2320  ;;  %1358 = vmatpush.msrb.mxu0 %v3360_v24 }
 0x239   :  { %v862_v5 = vmul.f32 %v2321_v58, %v860_v41  ;;  %1336 = vmatpush.msra.mxu3 %v3058_v16  ;;  %1268 = vmatpush.msra.mxu2 %v3121_v12  ;;  %vm867_vm0 = vweird.f32 %v2321_v58  ;;  %v873_v16 = vor.u32 1.1754944e-38, %v872_v43  ;;  %v746_v12 = vadd.f32 %v745_v56, %v3012_v0  ;;  %v4234_v43 = vld [vmem:[#allocation30_spill] sm:$0xff]  ;;  %v4238_v56 = vld [vmem:[#allocation56_spill] sm:$0xff] }
 0x23a   :  { %1359 = vmatpush.msrb.mxu0 %v3366_v20  ;;  %vm868_vm2 = vmor %vm866_vm1, %vm867_vm0  ;;  %v892_v41 = vand.u32 2147483648, %v3397_v34 }
 0x23b   :  { %v863_v52 = vsub.f32 1.0, %v862_v5  ;;  %1337 = vmatpush.msra.mxu3 %v3061_v19  ;;  %1269 = vmatpush.msra.mxu2 %v3129_v30  ;;  %v896_v19 = vadd.f32 %v3007_v54, %v853_v51  ;;  %v890_v54 = vand.u32 2147483647, %v3397_v34  ;;  %v4229_v34 = vld [vmem:[#allocation53_spill] sm:$0xff]  ;;  %v4237_v51 = vld [vmem:[#allocation31_spill] sm:$0xff] }
 0x23c   :  { %1360 = vmatpush.msrb.mxu0 %v3375_v23  ;;  %v893_v22 = vor.u32 1.1754944e-38, %v892_v41  ;;  %v4246_v41 = vld [vmem:[#allocation18_spill] sm:$0xff] }
 0x23d   :  { %v864_v10 = vmul.f32 %v2321_v58, %v863_v52  ;;  %1338 = vmatpush.msra.mxu3 %v3064_v25  ;;  %1270 = vmatpush.msra.mxu2 %v3135_v1  ;;  %v885_v25 = vadd.f32 %v3428_v29, %v884_v13  ;;  %vm891_vm7 = vcmp.eq.f32.partialorder %v890_v54, 8.507059e+37  ;;  %v4233_v52 = vld [vmem:[#allocation29_spill] sm:$0xff]  ;;  %v4248_v54 = vld [vmem:[#allocation19_spill] sm:$0xff] }
 0x23e   :  { %1361 = vmatpush.msrb.mxu0 %v3381_v38  ;;  %v4236_v13 = vld [vmem:[#allocation41_spill] sm:$0xff] }
 0x23f   :  { %v865_v9 = vadd.f32 %v2321_v58, %v864_v10  ;;  %1339 = vmatpush.msra.mxu3 %v3068_v32  ;;  %1271 = vmatpush.msra.mxu2 %v3140_v2  ;;  %v889_v2 = vsel %vm888_vm6, %v3428_v29, %v885_v25  ;;  %v4231_v29 = vld [vmem:[#allocation42_spill] sm:$0xff]  ;;  %v4235_v10 = vld [vmem:[#allocation55_spill] sm:$0xff]  ;;  %v4245_v25 = vld [vmem:[#allocation45_spill] sm:$0xff] }
 0x240   :  { %1362 = vmatpush.msrb.mxu0 %v3387_v42 }
 0x241   :  { %v869_v5 = vsel %vm868_vm2, %v2321_v58, %v865_v9  ;;  %1340 = vmatpush.msra.mxu3 %v3071_v37  ;;  %1272 = vmatpush.msra.mxu2 %v3146_v61  ;;  %v894_v37 = vsel %vm891_vm7, %v893_v22, %v889_v2  ;;  %v4230_v58 = vld [vmem:[#allocation28_spill] sm:$0xff]  ;;  %v4239_v9 = vld [vmem:[#allocation43_spill] sm:$0xff] }
 0x242   :  { %v874_v30 = vsel %vm871_vm3, %v873_v16, %v869_v5  ;;  %1363 = vmatpush.msrb.mxu0 %v3393_v40  ;;  %v4240_v16 = vld [vmem:[#allocation16_spill] sm:$0xff]  ;;  %v4243_v5 = vld [vmem:[#allocation17_spill] sm:$0xff] }
 0x243   :  { %v897_v1 = vmul.f32 %v896_v19, %v874_v30  ;;  %1341 = vmatpush.msra.mxu3 %v3074_v53  ;;  %1273 = vmatpush.msra.mxu2 %v3153_v31  ;;  %v900_v53 = vsub.f32 1.0, %v894_v37  ;;  %v902_v31 = vmul.f32 %v894_v37, %v3191_v47  ;;  %v4226_v47 = vld [vmem:[#allocation52_spill] sm:$0xff]  ;;  %v4241_v19 = vld [vmem:[#allocation57_spill] sm:$0xff]  ;;  %v4244_v30 = vld [vmem:[#allocation58_spill] sm:$0xff] }
 0x244   :  { %1364 = vmatpush.msrb.mxu0 %v3401_v27  ;;  %v4250_v2 = vld [vmem:[#allocation48_spill] sm:$0xff]  ;;  %v4252_v37 = vld [vmem:[#allocation22_spill] sm:$0xff] }
 0x245   :  { %v898_v32 = vadd.f32 %v897_v1, %v746_v12  ;;  %1342 = vmatpush.msra.mxu3 %v3078_v63  ;;  %1274 = vmatpush.msra.mxu2 %v3159_v49  ;;  %v4219_v49 = vld [vmem:[#allocation37_spill] sm:$0xff]  ;;  %v4242_v12 = vld [vmem:[#allocation44_spill] sm:$0xff]  ;;  %v4247_v1 = vld [vmem:[#allocation46_spill] sm:$0xff] }
 0x246   :  { %1365 = vmatpush.msrb.mxu0 %v3408_v18  ;;  %v4251_v22 = vld [vmem:[#allocation20_spill] sm:$0xff] }
 0x247   :  { %2322 = vtanh.f32 %v898_v32  ;;  %1343 = vmatpush.msra.mxu3 %v3081_v57  ;;  %1275 = vmatpush.msra.mxu2 %v3166_v26  ;;  %v4220_v26 = vld [vmem:[#allocation50_spill] sm:$0xff]  ;;  %v4249_v32 = vld [vmem:[#allocation47_spill] sm:$0xff] }
 0x248   :  { %1366 = vmatpush.msrb.mxu0 %v3414_v15 }
 0x249   :  { %1344 = vmatpush.msra.mxu3 %v3088_v44  ;;  %1276 = vmatpush.msra.mxu2 %v3171_v55  ;;  %v4215_v44 = vld [vmem:[#allocation24_spill] sm:$0xff]  ;;  %v4222_v55 = vld [vmem:[#allocation27_spill] sm:$0xff] }
 0x24a   :  { %1367 = vmatpush.msrb.mxu0 %v3418_v14 }
 0x24b   :  { %1345 = vmatpush.msra.mxu3 %v3092_v48  ;;  %1277 = vmatpush.msra.mxu2 %v3176_v6  ;;  %v4216_v48 = vld [vmem:[#allocation34_spill] sm:$0xff]  ;;  %v4223_v6 = vld [vmem:[#allocation51_spill] sm:$0xff] }
 0x24d   :  { %v2323_v63 = vpop.eup %2322  ;;  %1346 = vmatpush.msra.mxu3 %v3095_v50  ;;  %1278 = vmatpush.msra.mxu2 %v3181_v3  ;;  %v4217_v50 = vld [vmem:[#allocation25_spill] sm:$0xff]  ;;  %v4224_v3 = vld [vmem:[#allocation36_spill] sm:$0xff] }
 0x24e   :  { %v901_v61 = vmul.f32 %v2323_v63, %v900_v53  ;;  %v4253_v53 = vld [vmem:[#allocation21_spill] sm:$0xff] }
 0x24f   :  { %1347 = vmatpush.msra.mxu3 %v3101_v59  ;;  %1279 = vmatpush.msra.mxu2 %v3185_v35  ;;  %v4218_v59 = vld [vmem:[#allocation35_spill] sm:$0xff]  ;;  %v4225_v35 = vld [vmem:[#allocation38_spill] sm:$0xff] }
 0x250   :  { %v3485_v57 = vadd.f32 %v902_v31, %v901_v61  ;;  %v4254_v61 = vld [vmem:[#allocation33_spill] sm:$0xff] }
 0x252   :  { %905 = vst [vmem:[#allocation11 + $0x10] sm:$0xff] %v3485_v57  ;;  %1080 = vmatmul.f32.vlgmr.msrb.gmra.mxu1 %v3485_v57  ;;  %1100 = vmatmul.f32.vlgmr.msrb.gmra.mxu2 %v3485_v57 }
 0x253   :  { %1120 = vmatmul.f32.vlgmr.msrb.gmra.mxu3 %v3485_v57  ;;  %1372 = vmatpush.msrb.mxu1 %v3325_v4 }
 0x254   :  { %1512 = vmatpush.msrb.mxu3 %v3126_v21  ;;  %1492 = vmatpush.msrb.mxu2 %v3194_v8  ;;  %v4221_v21 = vld [vmem:[#allocation26_spill] sm:$0xff]  ;;  %v4227_v8 = vld [vmem:[#allocation39_spill] sm:$0xff] }
 0x255   :  { %1373 = vmatpush.msrb.mxu1 %v3331_v60 }
 0x256   :  { %1513 = vmatpush.msrb.mxu3 %v3207_v11  ;;  %1493 = vmatpush.msrb.mxu2 %v4215_v44  ;;  %v4228_v11 = vld [vmem:[#allocation40_spill] sm:$0xff] }
 0x257   :  { %1374 = vmatpush.msrb.mxu1 %v3339_v39 }
 0x258   :  { %1514 = vmatpush.msrb.mxu3 %v4216_v48  ;;  %1494 = vmatpush.msrb.mxu2 %v4218_v59 }
 0x259   :  { %1375 = vmatpush.msrb.mxu1 %v4217_v50 }
 0x25a   :  { %1515 = vmatpush.msrb.mxu3 %v4219_v49  ;;  %1495 = vmatpush.msrb.mxu2 %v4221_v21  ;;  %v4255_v49 = vld [vmem:[#allocation32_spill] sm:$0xff] }
 0x25b   :  { %1376 = vmatpush.msrb.mxu1 %v4220_v26 }
 0x25c   :  { %1516 = vmatpush.msrb.mxu3 %v4222_v55  ;;  %1496 = vmatpush.msrb.mxu2 %v4224_v3 }
 0x25d   :  { %1377 = vmatpush.msrb.mxu1 %v4223_v6 }
 0x25e   :  { %1517 = vmatpush.msrb.mxu3 %v4225_v35  ;;  %1497 = vmatpush.msrb.mxu2 %v4227_v8  ;;  %v1175_v35 = vld [vmem:[#allocation3 + $0x20] sm:$0xff] }
 0x25f   :  { %1378 = vmatpush.msrb.mxu1 %v4226_v47  ;;  %1240 = vmatmul.f32.vlgmr.msra.gmra.mxu0 %v1175_v35 }
 0x260   :  { %1518 = vmatpush.msrb.mxu3 %v4228_v11  ;;  %1498 = vmatpush.msrb.mxu2 %v4230_v58 }
 0x261   :  { %1379 = vmatpush.msrb.mxu1 %v4229_v34  ;;  %1280 = vmatmul.f32.vlgmr.msra.gmra.mxu2 %v1175_v35 }
 0x262   :  { %1519 = vmatpush.msrb.mxu3 %v4231_v29  ;;  %1499 = vmatpush.msrb.mxu2 %v4233_v52  ;;  %v4256_v29 = vld [vmem:[#allocation23_spill] sm:$0xff] }
 0x263   :  { %1380 = vmatpush.msrb.mxu1 %v4232_v7 }
 0x264   :  { %1520 = vmatpush.msrb.mxu3 %v4234_v43  ;;  %1500 = vmatpush.msrb.mxu2 %v4236_v13  ;;  %v4257_v13 = vld [vmem:[#allocation49_spill] sm:$0xff] }
 0x265   :  { %1381 = vmatpush.msrb.mxu1 %v4235_v10 }
 0x266   :  { %1521 = vmatpush.msrb.mxu3 %v4237_v51  ;;  %1501 = vmatpush.msrb.mxu2 %v4239_v9 }
 0x267   :  { %1382 = vmatpush.msrb.mxu1 %v4238_v56 }
 0x268   :  { %1522 = vmatpush.msrb.mxu3 %v4240_v16  ;;  %1502 = vmatpush.msrb.mxu2 %v4242_v12 }
 0x269   :  { %1383 = vmatpush.msrb.mxu1 %v4241_v19 }
 0x26a   :  { %1523 = vmatpush.msrb.mxu3 %v4243_v5  ;;  %1503 = vmatpush.msrb.mxu2 %v4245_v25 }
 0x26b   :  { %1384 = vmatpush.msrb.mxu1 %v4244_v30 }
 0x26c   :  { %1524 = vmatpush.msrb.mxu3 %v4246_v41  ;;  %1504 = vmatpush.msrb.mxu2 %v4247_v1 }
 0x26d   :  { %1385 = vmatpush.msrb.mxu1 %v3410_v17 }
 0x26e   :  { %1525 = vmatpush.msrb.mxu3 %v4248_v54  ;;  %1505 = vmatpush.msrb.mxu2 %v4249_v32 }
 0x26f   :  { %1386 = vmatpush.msrb.mxu1 %v3416_v28 }
 0x270   :  { %1526 = vmatpush.msrb.mxu3 %v4250_v2  ;;  %1506 = vmatpush.msrb.mxu2 %v4251_v22  ;;  %v3558_v2 = vld [vmem:[%s3995_s5] ss:$0 sm:$0xff] }
 0x271   :  { %1387 = vmatpush.msrb.mxu1 %v3420_v36 }
 0x272   :  { %1527 = vmatpush.msrb.mxu3 %v4252_v37  ;;  %1507 = vmatpush.msrb.mxu2 %v4253_v53 }
 0x273   :  { %1260 = vmatmul.f32.vlgmr.msra.gmra.mxu1 %v1175_v35 }
 0x274   :  { %1620 = vmatpush.msra.mxu2 %v3323_v33 }
 0x276   :  { %1621 = vmatpush.msra.mxu2 %v4256_v29  ;;  %v3630_v29 = vld [vmem:[#allocation3 + $0x28] sm:$0xff] }
 0x277   :  { %1508 = vmatmul.f32.vlgmr.msrb.gmra.mxu2 %v3630_v29 }
 0x278   :  { %1622 = vmatpush.msra.mxu2 %v3337_v46 }
 0x27a   :  { %1623 = vmatpush.msra.mxu2 %v3343_v45 }
 0x27c   :  { %1624 = vmatpush.msra.mxu2 %v4257_v13  ;;  %v3642_v13 = vld [vmem:[#allocation9 + $0x18] sm:$0xff] }
 0x27e   :  { %1625 = vmatpush.msra.mxu2 %v3354_v62 }
 0x280   :  { %1626 = vmatpush.msra.mxu2 %v3360_v24 }
 0x282   :  { %1627 = vmatpush.msra.mxu2 %v3366_v20 }
 0x284   :  { %1628 = vmatpush.msra.mxu2 %v3375_v23 }
 0x286   :  { %1629 = vmatpush.msra.mxu2 %v3381_v38 }
 0x288   :  { %1630 = vmatpush.msra.mxu2 %v3387_v42 }
 0x28a   :  { %1631 = vmatpush.msra.mxu2 %v3393_v40 }
 0x28c   :  { %1632 = vmatpush.msra.mxu2 %v3401_v27 }
 0x28e   :  { %1633 = vmatpush.msra.mxu2 %v3408_v18  ;;  %v3605_v18 = vld [vmem:[#allocation9 + $0xf0] sm:$0xff] }
 0x290   :  { %1634 = vmatpush.msra.mxu2 %v3414_v15  ;;  %v3601_v15 = vld [vmem:[#allocation9 + $0x108] sm:$0xff] }
 0x292   :  { %1635 = vmatpush.msra.mxu2 %v3418_v14  ;;  %v3590_v14 = vld [vmem:[#allocation9 + $0x168] sm:$0xff] }
 0x293   :  { %1600 = vmatpush.msra.mxu1 %v3590_v14 }
 0x2a7   :  { %v1013_v25 = vpop.f32.mrf.mxu0 }
 0x2a8   :  { %v1014_v24 = vadd.f32 %v1013_v25, %v3012_v0  ;;  %v3666_v25 = vld [vmem:[#allocation8 + $0x130] sm:$0xff] }
 0x2ab   :  { %v973_v63 = vpop.f32.mrf.mxu2  ;;  %v993_v59 = vpop.f32.mrf.mxu3 }
 0x2ac   :  { %v974_v31 = vadd.f32 %v973_v63, %v4254_v61  ;;  %v994_v21 = vadd.f32 %v993_v59, %v4255_v49 }
 0x2cf   :  { %v1081_v44 = vpop.f32.mrf.mxu1 }
 0x2d0   :  { %v1124_v48 = vadd.f32 %v1081_v44, %v974_v31 }
 0x2d2   :  { %v2274_v55 = vmul.f32 -1.442695, %v1124_v48 }
 0x2d4   :  { %2324 = vpow2.f32 %v2274_v55 }
 0x2d5   :  { %v1101_v3 = vpop.f32.mrf.mxu2 }
 0x2d6   :  { %v1144_v8 = vadd.f32 %v1101_v3, %v994_v21  ;;  %v1121_v41 = vpop.f32.mrf.mxu3 }
 0x2d7   :  { %v1164_v23 = vadd.f32 %v3558_v2, %v1121_v41  ;;  %v3673_v41 = vld [vmem:[#allocation8 + $0x118] sm:$0xff] }
 0x2d8   :  { %v2275_v11 = vmul.f32 -1.442695, %v1144_v8 }
 0x2da   :  { %v2325_v58 = vpop.eup %2324  ;;  %2326 = vpow2.f32 %v2275_v11  ;;  %v3625_v11 = vld [vmem:[#allocation9 + $0x60] sm:$0xff] }
 0x2db   :  { %v1128_v52 = vadd.f32 1.0, %v2325_v58 }
 0x2dc   :  { %v1241_v27 = vpop.f32.mrf.mxu0 }
 0x2dd   :  { %2328 = vrcp.f32 %v1128_v52  ;;  %v1140_v12 = vand.u32 2147483648, %v1128_v52  ;;  %v1138_v46 = vand.u32 2147483647, %v1128_v52  ;;  %vm1134_vm9 = vweird.f32 %v1128_v52 }
 0x2df   :  { %v1141_v62 = vor.u32 1.1754944e-38, %v1140_v12  ;;  %vm1139_vm11 = vcmp.eq.f32.partialorder %v1138_v46, 8.507059e+37  ;;  %v3662_v46 = vld [vmem:[#allocation8 + $0x148] sm:$0xff] }
 0x2e0   :  { %v2327_v43 = vpop.eup %2326 }
 0x2e1   :  { %v1148_v51 = vadd.f32 1.0, %v2327_v43  ;;  %v3639_v43 = vld [vmem:[#allocation9 + $0x30] sm:$0xff] }
 0x2e3   :  { %v2329_v9 = vpop.eup %2328  ;;  %2330 = vrcp.f32 %v1148_v51  ;;  %v1160_v38 = vand.u32 2147483648, %v1148_v51  ;;  %v1158_v63 = vand.u32 2147483647, %v1148_v51  ;;  %vm1154_vm13 = vweird.f32 %v1148_v51 }
 0x2e4   :  { %v1130_v16 = vmul.f32 %v2329_v9, %v1128_v52  ;;  %vm1135_vm8 = vweird.f32 %v2329_v9  ;;  %v3634_v52 = vld [vmem:[#allocation9 + $0x48] sm:$0xff] }
 0x2e5   :  { %vm1136_vm10 = vmor %vm1134_vm9, %vm1135_vm8  ;;  %v1161_v48 = vor.u32 1.1754944e-38, %v1160_v38  ;;  %vm1159_vm15 = vcmp.eq.f32.partialorder %v1158_v63, 8.507059e+37 }
 0x2e6   :  { %v1131_v33 = vsub.f32 1.0, %v1130_v16  ;;  %v3648_v16 = vld [vmem:[#allocation9] sm:$0xff] }
 0x2e8   :  { %v1132_v5 = vmul.f32 %v2329_v9, %v1131_v33 }
 0x2e9   :  { %v2331_v45 = vpop.eup %2330 }
 0x2ea   :  { %v1150_v1 = vmul.f32 %v2331_v45, %v1148_v51  ;;  %v1133_v54 = vadd.f32 %v2329_v9, %v1132_v5  ;;  %vm1155_vm12 = vweird.f32 %v2331_v45  ;;  %v3644_v51 = vld [vmem:[#allocation8 + $0x178] sm:$0xff]  ;;  %v3660_v5 = vld [vmem:[#allocation8 + $0x160] sm:$0xff] }
 0x2eb   :  { %vm1156_vm14 = vmor %vm1154_vm13, %vm1155_vm12  ;;  %1532 = vmatpush.msra.mxu0 %v3644_v51  ;;  %1800 = vmatpush.msrb.mxu2 %v3644_v51 }
 0x2ec   :  { %v1151_v32 = vsub.f32 1.0, %v1150_v1  ;;  %v1137_v20 = vsel %vm1136_vm10, %v2329_v9, %v1133_v54  ;;  %v3677_v54 = vld [vmem:[#allocation8 + $0x170] sm:$0xff] }
 0x2ed   :  { %v1142_v22 = vsel %vm1139_vm11, %v1141_v62, %v1137_v20  ;;  %1533 = vmatpush.msra.mxu0 %v3660_v5  ;;  %1801 = vmatpush.msrb.mxu2 %v3660_v5 }
 0x2ee   :  { %v1152_v37 = vmul.f32 %v2331_v45, %v1151_v32  ;;  %v1165_v53 = vmul.f32 %v1164_v23, %v1142_v22  ;;  %v3684_v32 = vld [vmem:[#allocation8 + $0x158] sm:$0xff]  ;;  %v3688_v23 = vld [vmem:[#allocation8 + $0x140] sm:$0xff] }
 0x2ef   :  { %1534 = vmatpush.msra.mxu0 %v3662_v46  ;;  %1802 = vmatpush.msrb.mxu2 %v3662_v46 }
 0x2f0   :  { %v1153_v31 = vadd.f32 %v2331_v45, %v1152_v37  ;;  %v1166_v44 = vadd.f32 %v1165_v53, %v1014_v24  ;;  %v3681_v24 = vld [vmem:[#allocation8 + $0x100] sm:$0xff]  ;;  %v3691_v37 = vld [vmem:[#allocation8 + $0xe8] sm:$0xff] }
 0x2f1   :  { %1535 = vmatpush.msra.mxu0 %v3666_v25  ;;  %1803 = vmatpush.msrb.mxu2 %v3666_v25  ;;  %v3697_v53 = vld [vmem:[#allocation8 + $0x128] sm:$0xff] }
 0x2f2   :  { %v1157_v59 = vsel %vm1156_vm14, %v2331_v45, %v1153_v31  ;;  %2332 = vtanh.f32 %v1166_v44  ;;  %v3701_v44 = vld [vmem:[#allocation8 + $0xd0] sm:$0xff] }
 0x2f3   :  { %v1162_v42 = vsel %vm1159_vm15, %v1161_v48, %v1157_v59  ;;  %1536 = vmatpush.msra.mxu0 %v3673_v41  ;;  %1804 = vmatpush.msrb.mxu2 %v3673_v41 }
 0x2f4   :  { %v1168_v21 = vsub.f32 1.0, %v1162_v42  ;;  %v1170_v3 = vmul.f32 %v1162_v42, %v3485_v57  ;;  %v1281_v42 = vpop.f32.mrf.mxu2 }
 0x2f5   :  { %1537 = vmatpush.msra.mxu0 %v3681_v24  ;;  %1805 = vmatpush.msrb.mxu2 %v3681_v24 }
 0x2f7   :  { %1538 = vmatpush.msra.mxu0 %v3691_v37  ;;  %1806 = vmatpush.msrb.mxu2 %v3691_v37 }
 0x2f8   :  { %v2333_v40 = vpop.eup %2332 }
 0x2f9   :  { %v1169_v55 = vmul.f32 %v2333_v40, %v1168_v21  ;;  %v3707_v21 = vld [vmem:[#allocation8 + $0x110] sm:$0xff]  ;;  %1539 = vmatpush.msra.mxu0 %v3701_v44  ;;  %1807 = vmatpush.msrb.mxu2 %v3701_v44 }
 0x2fb   :  { %v3568_v35 = vadd.f32 %v1170_v3, %v1169_v55  ;;  %v3711_v55 = vld [vmem:[#allocation8 + $0xb8] sm:$0xff] }
 0x2fc   :  { %1540 = vmatpush.msra.mxu0 %v3711_v55  ;;  %1808 = vmatpush.msrb.mxu2 %v3711_v55 }
 0x2fd   :  { %1173 = vst [vmem:[#allocation11 + $0x18] sm:$0xff] %v3568_v35  ;;  %1348 = vmatmul.f32.vlgmr.msra.gmra.mxu3 %v3568_v35  ;;  %1368 = vmatmul.f32.vlgmr.msrb.gmra.mxu0 %v3568_v35 }
 0x2fe   :  { %1388 = vmatmul.f32.vlgmr.msrb.gmra.mxu1 %v3568_v35  ;;  %1640 = vmatpush.msra.mxu3 %v3325_v4  ;;  %v3599_v4 = vld [vmem:[#allocation9 + $0x120] sm:$0xff] }
 0x300   :  { %1641 = vmatpush.msra.mxu3 %v3331_v60  ;;  %v3593_v60 = vld [vmem:[#allocation9 + $0x150] sm:$0xff] }
 0x301   :  { %1601 = vmatpush.msra.mxu1 %v3593_v60 }
 0x302   :  { %1642 = vmatpush.msra.mxu3 %v3339_v39  ;;  %v3596_v39 = vld [vmem:[#allocation9 + $0x138] sm:$0xff] }
 0x303   :  { %1602 = vmatpush.msra.mxu1 %v3596_v39 }
 0x304   :  { %1643 = vmatpush.msra.mxu3 %v4217_v50 }
 0x305   :  { %1603 = vmatpush.msra.mxu1 %v3599_v4  ;;  %1528 = vmatmul.f32.vlgmr.msrb.gmra.mxu3 %v3630_v29 }
 0x306   :  { %1644 = vmatpush.msra.mxu3 %v4220_v26  ;;  %v3611_v26 = vld [vmem:[#allocation9 + $0xc0] sm:$0xff] }
 0x307   :  { %1604 = vmatpush.msra.mxu1 %v3601_v15 }
 0x308   :  { %1645 = vmatpush.msra.mxu3 %v4223_v6  ;;  %v1242_v6 = vadd.f32 %v1241_v27, %v4254_v61  ;;  %v3717_v27 = vld [vmem:[#allocation8 + $0xf8] sm:$0xff] }
 0x309   :  { %1605 = vmatpush.msra.mxu1 %v3605_v18 }
 0x30a   :  { %1646 = vmatpush.msra.mxu3 %v4226_v47 }
 0x30c   :  { %1647 = vmatpush.msra.mxu3 %v4229_v34  ;;  %v3616_v34 = vld [vmem:[#allocation9 + $0xa8] sm:$0xff] }
 0x30e   :  { %1648 = vmatpush.msra.mxu3 %v4232_v7 }
 0x310   :  { %1649 = vmatpush.msra.mxu3 %v4235_v10 }
 0x312   :  { %1650 = vmatpush.msra.mxu3 %v4238_v56  ;;  %v3619_v56 = vld [vmem:[#allocation9 + $0x90] sm:$0xff] }
 0x314   :  { %1651 = vmatpush.msra.mxu3 %v4241_v19 }
 0x316   :  { %1652 = vmatpush.msra.mxu3 %v4244_v30  ;;  %v3622_v30 = vld [vmem:[#allocation9 + $0x78] sm:$0xff] }
 0x318   :  { %1653 = vmatpush.msra.mxu3 %v3410_v17  ;;  %v3608_v17 = vld [vmem:[#allocation9 + $0xd8] sm:$0xff] }
 0x319   :  { %1606 = vmatpush.msra.mxu1 %v3608_v17 }
 0x31a   :  { %1654 = vmatpush.msra.mxu3 %v3416_v28  ;;  %v1261_v28 = vpop.f32.mrf.mxu1 }
 0x31b   :  { %1607 = vmatpush.msra.mxu1 %v3611_v26 }
 0x31c   :  { %1655 = vmatpush.msra.mxu3 %v3420_v36  ;;  %v1262_v36 = vadd.f32 %v1261_v28, %v4255_v49 }
 0x31d   :  { %1608 = vmatpush.msra.mxu1 %v3616_v34 }
 0x31e   :  { %1868 = vmatpush.msrb.mxu3 %v3590_v14 }
 0x31f   :  { %1609 = vmatpush.msra.mxu1 %v3619_v56 }
 0x320   :  { %1869 = vmatpush.msrb.mxu3 %v3593_v60 }
 0x321   :  { %1610 = vmatpush.msra.mxu1 %v3622_v30 }
 0x322   :  { %1870 = vmatpush.msrb.mxu3 %v3596_v39 }
 0x323   :  { %1611 = vmatpush.msra.mxu1 %v3625_v11 }
 0x324   :  { %1871 = vmatpush.msrb.mxu3 %v3599_v4 }
 0x325   :  { %1612 = vmatpush.msra.mxu1 %v3634_v52 }
 0x326   :  { %1872 = vmatpush.msrb.mxu3 %v3601_v15 }
 0x327   :  { %1613 = vmatpush.msra.mxu1 %v3639_v43 }
 0x328   :  { %1873 = vmatpush.msrb.mxu3 %v3605_v18 }
 0x329   :  { %1614 = vmatpush.msra.mxu1 %v3642_v13 }
 0x32a   :  { %1874 = vmatpush.msrb.mxu3 %v3608_v17 }
 0x32b   :  { %1615 = vmatpush.msra.mxu1 %v3648_v16 }
 0x32c   :  { %1875 = vmatpush.msrb.mxu3 %v3611_v26 }
 0x32d   :  { %1780 = vmatpush.msrb.mxu1 %v3677_v54 }
 0x32e   :  { %1876 = vmatpush.msrb.mxu3 %v3616_v34 }
 0x32f   :  { %1781 = vmatpush.msrb.mxu1 %v3684_v32 }
 0x330   :  { %1877 = vmatpush.msrb.mxu3 %v3619_v56 }
 0x331   :  { %1782 = vmatpush.msrb.mxu1 %v3688_v23 }
 0x332   :  { %1878 = vmatpush.msrb.mxu3 %v3622_v30 }
 0x333   :  { %1783 = vmatpush.msrb.mxu1 %v3697_v53 }
 0x334   :  { %1879 = vmatpush.msrb.mxu3 %v3625_v11 }
 0x335   :  { %1784 = vmatpush.msrb.mxu1 %v3707_v21 }
 0x336   :  { %1880 = vmatpush.msrb.mxu3 %v3634_v52 }
 0x337   :  { %1785 = vmatpush.msrb.mxu1 %v3717_v27 }
 0x338   :  { %1881 = vmatpush.msrb.mxu3 %v3639_v43 }
 0x33a   :  { %1882 = vmatpush.msrb.mxu3 %v3642_v13 }
 0x33c   :  { %1883 = vmatpush.msrb.mxu3 %v3648_v16 }
 0x37a   :  { %v1369_v57 = vpop.f32.mrf.mxu0 }
 0x37b   :  { %v1412_v50 = vadd.f32 %v1369_v57, %v1262_v36  ;;  %v1389_v59 = vpop.f32.mrf.mxu1  ;;  %v1282_v36 = vadd.f32 %v1281_v42, %v3012_v0 }
 0x37c   :  { %v1432_v28 = vadd.f32 %v3558_v2, %v1389_v59 }
 0x37d   :  { %v2277_v47 = vmul.f32 -1.442695, %v1412_v50  ;;  %v3722_v50 = vld [vmem:[#allocation8 + $0xa0] sm:$0xff] }
 0x37e   :  { %1541 = vmatpush.msra.mxu0 %v3722_v50  ;;  %1809 = vmatpush.msrb.mxu2 %v3722_v50 }
 0x37f   :  { %2334 = vpow2.f32 %v2277_v47 }
 0x380   :  { %v1349_v7 = vpop.f32.mrf.mxu3 }
 0x381   :  { %v1392_v10 = vadd.f32 %v1349_v7, %v1242_v6  ;;  %v3729_v7 = vld [vmem:[#allocation8 + $0xe0] sm:$0xff] }
 0x382   :  { %1786 = vmatpush.msrb.mxu1 %v3729_v7 }
 0x383   :  { %v2276_v19 = vmul.f32 -1.442695, %v1392_v10 }
 0x385   :  { %v2335_v8 = vpop.eup %2334  ;;  %2336 = vpow2.f32 %v2276_v19 }
 0x386   :  { %v3627_v58 = vadd.f32 1.0, %v2335_v8  ;;  %v3733_v8 = vld [vmem:[#allocation8 + $0x88] sm:$0xff] }
 0x387   :  { %1542 = vmatpush.msra.mxu0 %v3733_v8  ;;  %1810 = vmatpush.msrb.mxu2 %v3733_v8 }
 0x388   :  { %2338 = vrcp.f32 %v3627_v58  ;;  %v1428_v10 = vand.u32 2147483648, %v3627_v58  ;;  %vm1422_vm5 = vweird.f32 %v3627_v58 }
 0x38b   :  { %v2337_v9 = vpop.eup %2336 }
 0x38c   :  { %v3651_v33 = vadd.f32 1.0, %v2337_v9  ;;  %v1426_v9 = vand.u32 2147483647, %v3627_v58 }
 0x38e   :  { %2340 = vrcp.f32 %v3651_v33  ;;  %v3658_v12 = vpop.eup %2338  ;;  %v1408_v38 = vand.u32 2147483648, %v3651_v33  ;;  %v1406_v31 = vand.u32 2147483647, %v3651_v33  ;;  %vm1402_vm1 = vweird.f32 %v3651_v33 }
 0x38f   :  { %v1418_v45 = vmul.f32 %v3658_v12, %v3627_v58  ;;  %vm1423_vm4 = vweird.f32 %v3658_v12  ;;  %vm1427_vm7 = vcmp.eq.f32.partialorder %v1426_v9, 8.507059e+37  ;;  %v1721_v9 = vld [vmem:[#allocation8 + $0x48] sm:$0xff] }
 0x390   :  { %v1409_v3 = vor.u32 1.1754944e-38, %v1408_v38  ;;  %vm1407_vm3 = vcmp.eq.f32.partialorder %v1406_v31, 8.507059e+37  ;;  %vm3743_vm6 = vmor %vm1422_vm5, %vm1423_vm4  ;;  %v3761_v38 = vld [vmem:[#allocation8 + $0x40] sm:$0xff] }
 0x391   :  { %v1419_v20 = vsub.f32 1.0, %v1418_v45 }
 0x393   :  { %v1420_v48 = vmul.f32 %v3658_v12, %v1419_v20  ;;  %v3756_v20 = vld [vmem:[#allocation8 + $0x58] sm:$0xff] }
 0x394   :  { %v2341_v1 = vpop.eup %2340 }
 0x395   :  { %v1398_v62 = vmul.f32 %v2341_v1, %v3651_v33  ;;  %vm1403_vm0 = vweird.f32 %v2341_v1  ;;  %v1421_v47 = vadd.f32 %v3658_v12, %v1420_v48  ;;  %v3770_v48 = vld [vmem:[#allocation8 + $0x10] sm:$0xff] }
 0x396   :  { %vm1404_vm2 = vmor %vm1402_vm1, %vm1403_vm0  ;;  %v1722_v33 = vld [vmem:[#allocation8 + $0x50] sm:$0xff] }
 0x397   :  { %v1399_v22 = vsub.f32 1.0, %v1398_v62  ;;  %v1425_v58 = vsel %vm3743_vm6, %v3658_v12, %v1421_v47  ;;  %v1429_v62 = vor.u32 1.1754944e-38, %v1428_v10  ;;  %v3766_v12 = vld [vmem:[#allocation8 + $0x28] sm:$0xff]  ;;  %v1730_v47 = vld [vmem:[#allocation8 + $0x90] sm:$0xff]  ;;  %v1728_v10 = vld [vmem:[#allocation8 + $0x80] sm:$0xff] }
 0x399   :  { %v1400_v63 = vmul.f32 %v2341_v1, %v1399_v22  ;;  %v1430_v22 = vsel %vm1427_vm7, %v1429_v62, %v1425_v58  ;;  %v1719_v58 = vld [vmem:[#allocation8 + $0x38] sm:$0xff] }
 0x39a   :  { %v1438_v42 = vmul.f32 %v1430_v22, %v3568_v35  ;;  %v1754_v35 = vld [vmem:[#allocation8 + $0x150] sm:$0xff]  ;;  %v1715_v62 = vld [vmem:[#allocation8 + $0x18] sm:$0xff] }
 0x39b   :  { %v1401_v40 = vadd.f32 %v2341_v1, %v1400_v63  ;;  %v1436_v63 = vsub.f32 1.0, %v1430_v22  ;;  %v1716_v22 = vld [vmem:[#allocation8 + $0x20] sm:$0xff] }
 0x39d   :  { %v1405_v57 = vsel %vm1404_vm2, %v2341_v1, %v1401_v40  ;;  %v3747_v1 = vld [vmem:[#allocation8 + $0x70] sm:$0xff] }
 0x39e   :  { %v1410_v6 = vsel %vm1407_vm3, %v1409_v3, %v1405_v57  ;;  %1543 = vmatpush.msra.mxu0 %v3747_v1  ;;  %1811 = vmatpush.msrb.mxu2 %v3747_v1  ;;  %v1757_v3 = vld [vmem:[#allocation8 + $0x168] sm:$0xff]  ;;  %v1742_v57 = vld [vmem:[#allocation8 + $0xf0] sm:$0xff] }
 0x39f   :  { %v1433_v19 = vmul.f32 %v1432_v28, %v1410_v6  ;;  %v1751_v28 = vld [vmem:[#allocation8 + $0x138] sm:$0xff] }
 0x3a0   :  { %1544 = vmatpush.msra.mxu0 %v3756_v20  ;;  %1812 = vmatpush.msrb.mxu2 %v3756_v20  ;;  %v1739_v6 = vld [vmem:[#allocation8 + $0xd8] sm:$0xff] }
 0x3a1   :  { %v1434_v45 = vadd.f32 %v1433_v19, %v1282_v36  ;;  %v1748_v36 = vld [vmem:[#allocation8 + $0x120] sm:$0xff]  ;;  %v1725_v19 = vld [vmem:[#allocation8 + $0x68] sm:$0xff] }
 0x3a2   :  { %1545 = vmatpush.msra.mxu0 %v3761_v38  ;;  %1813 = vmatpush.msrb.mxu2 %v3761_v38 }
 0x3a3   :  { %2342 = vtanh.f32 %v1434_v45  ;;  %v1718_v45 = vld [vmem:[#allocation8 + $0x30] sm:$0xff] }
 0x3a4   :  { %1546 = vmatpush.msra.mxu0 %v3766_v12  ;;  %1814 = vmatpush.msrb.mxu2 %v3766_v12 }
 0x3a6   :  { %1547 = vmatpush.msra.mxu0 %v3770_v48  ;;  %1815 = vmatpush.msrb.mxu2 %v3770_v48 }
 0x3a7   :  { %1548 = vmatmul.f32.vlgmr.msra.gmra.mxu0 %v3630_v29  ;;  %v1745_v29 = vld [vmem:[#allocation8 + $0x108] sm:$0xff] }
 0x3a8   :  { %1760 = vmatpush.msrb.mxu0 %v1757_v3 }
 0x3a9   :  { %v2343_v31 = vpop.eup %2342 }
 0x3aa   :  { %v1437_v59 = vmul.f32 %v2343_v31, %v1436_v63  ;;  %1761 = vmatpush.msrb.mxu0 %v1754_v35  ;;  %v1712_v63 = vld [vmem:[#allocation8] sm:$0xff]  ;;  %v1713_v31 = vld [vmem:[#allocation8 + $0x8] sm:$0xff] }
 0x3ac   :  { %v3776_v40 = vadd.f32 %v1438_v42, %v1437_v59  ;;  %1762 = vmatpush.msrb.mxu0 %v1751_v28  ;;  %v3792_v59 = vld [vmem:[#allocation9 + $0x170] sm:$0xff]  ;;  %v3794_v42 = vld [vmem:[#allocation9 + $0x178] sm:$0xff] }
 0x3ae   :  { %1441 = vst [vmem:[#allocation11 + $0x20] sm:$0xff] %v3776_v40  ;;  %1616 = vmatmul.f32.vlgmr.msra.gmra.mxu1 %v3776_v40  ;;  %1636 = vmatmul.f32.vlgmr.msra.gmra.mxu2 %v3776_v40 }
 0x3af   :  { %1656 = vmatmul.f32.vlgmr.msra.gmra.mxu3 %v3776_v40  ;;  %2028 = vmatpush.msra.mxu2 %v1757_v3  ;;  %v3798_v3 = vld [vmem:[#allocation9 + $0x158] sm:$0xff] }
 0x3b0   :  { %2048 = vmatpush.msra.mxu3 %v3677_v54  ;;  %1763 = vmatpush.msrb.mxu0 %v1748_v36  ;;  %v1736_v54 = vld [vmem:[#allocation8 + $0xc0] sm:$0xff] }
 0x3b1   :  { %2029 = vmatpush.msra.mxu2 %v1754_v35  ;;  %v3800_v35 = vld [vmem:[#allocation9 + $0x160] sm:$0xff] }
 0x3b2   :  { %2049 = vmatpush.msra.mxu3 %v3684_v32  ;;  %1764 = vmatpush.msrb.mxu0 %v1745_v29  ;;  %v1737_v32 = vld [vmem:[#allocation8 + $0xc8] sm:$0xff] }
 0x3b3   :  { %2030 = vmatpush.msra.mxu2 %v1751_v28  ;;  %1787 = vmatpush.msrb.mxu1 %v1737_v32  ;;  %v3804_v28 = vld [vmem:[#allocation9 + $0x140] sm:$0xff] }
 0x3b4   :  { %2050 = vmatpush.msra.mxu3 %v3688_v23  ;;  %1765 = vmatpush.msrb.mxu0 %v1742_v57  ;;  %v1733_v23 = vld [vmem:[#allocation8 + $0xa8] sm:$0xff] }
 0x3b5   :  { %2031 = vmatpush.msra.mxu2 %v1748_v36  ;;  %v3806_v36 = vld [vmem:[#allocation9 + $0x148] sm:$0xff] }
 0x3b6   :  { %2051 = vmatpush.msra.mxu3 %v3697_v53  ;;  %1766 = vmatpush.msrb.mxu0 %v1739_v6  ;;  %v1734_v53 = vld [vmem:[#allocation8 + $0xb0] sm:$0xff] }
 0x3b7   :  { %2032 = vmatpush.msra.mxu2 %v1745_v29  ;;  %1788 = vmatpush.msrb.mxu1 %v1734_v53  ;;  %v3810_v29 = vld [vmem:[#allocation9 + $0x128] sm:$0xff] }
 0x3b8   :  { %2052 = vmatpush.msra.mxu3 %v3707_v21  ;;  %1767 = vmatpush.msrb.mxu0 %v1736_v54  ;;  %v1731_v21 = vld [vmem:[#allocation8 + $0x98] sm:$0xff] }
 0x3b9   :  { %2033 = vmatpush.msra.mxu2 %v1742_v57  ;;  %1789 = vmatpush.msrb.mxu1 %v1731_v21  ;;  %v3812_v57 = vld [vmem:[#allocation9 + $0x130] sm:$0xff] }
 0x3ba   :  { %2053 = vmatpush.msra.mxu3 %v3717_v27  ;;  %1768 = vmatpush.msrb.mxu0 %v1733_v23  ;;  %v1727_v27 = vld [vmem:[#allocation8 + $0x78] sm:$0xff] }
 0x3bb   :  { %2034 = vmatpush.msra.mxu2 %v1739_v6  ;;  %1790 = vmatpush.msrb.mxu1 %v1728_v10  ;;  %v3816_v6 = vld [vmem:[#allocation9 + $0x110] sm:$0xff] }
 0x3bc   :  { %2054 = vmatpush.msra.mxu3 %v3729_v7  ;;  %1769 = vmatpush.msrb.mxu0 %v1730_v47  ;;  %v1724_v7 = vld [vmem:[#allocation8 + $0x60] sm:$0xff] }
 0x3bd   :  { %2035 = vmatpush.msra.mxu2 %v1736_v54  ;;  %1791 = vmatpush.msrb.mxu1 %v1725_v19  ;;  %v3818_v54 = vld [vmem:[#allocation9 + $0x118] sm:$0xff] }
 0x3be   :  { %2055 = vmatpush.msra.mxu3 %v1737_v32  ;;  %1770 = vmatpush.msrb.mxu0 %v1727_v27  ;;  %v3822_v32 = vld [vmem:[#allocation9 + $0xf8] sm:$0xff] }
 0x3bf   :  { %2036 = vmatpush.msra.mxu2 %v1733_v23  ;;  %1792 = vmatpush.msrb.mxu1 %v1722_v33  ;;  %v3824_v23 = vld [vmem:[#allocation9 + $0x100] sm:$0xff] }
 0x3c0   :  { %2056 = vmatpush.msra.mxu3 %v1734_v53  ;;  %1771 = vmatpush.msrb.mxu0 %v1724_v7  ;;  %4260 = vst [vmem:[#allocation24_spill] sm:$0xff] %v3824_v23  ;;  %v1509_v53 = vpop.f32.mrf.mxu2 }
 0x3c1   :  { %2037 = vmatpush.msra.mxu2 %v1730_v47  ;;  %1793 = vmatpush.msrb.mxu1 %v1719_v58  ;;  %v3828_v47 = vld [vmem:[#allocation9 + $0xe0] sm:$0xff] }
 0x3c2   :  { %2057 = vmatpush.msra.mxu3 %v1731_v21  ;;  %1772 = vmatpush.msrb.mxu0 %v1721_v9  ;;  %v3830_v21 = vld [vmem:[#allocation9 + $0xe8] sm:$0xff] }
 0x3c3   :  { %2038 = vmatpush.msra.mxu2 %v1727_v27  ;;  %1794 = vmatpush.msrb.mxu1 %v1716_v22  ;;  %4261 = vst [vmem:[#allocation34_spill] sm:$0xff] %v3830_v21  ;;  %v1510_v27 = vadd.f32 %v1509_v53, %v4254_v61  ;;  %v3854_v53 = vld [vmem:[#allocation9 + $0x80] sm:$0xff]  ;;  %v3856_v61 = vld [vmem:[#allocation9 + $0x88] sm:$0xff] }
 0x3c4   :  { %2058 = vmatpush.msra.mxu3 %v1728_v10  ;;  %1773 = vmatpush.msrb.mxu0 %v1718_v45  ;;  %v3835_v10 = vld [vmem:[#allocation9 + $0xc8] sm:$0xff]  ;;  %4265 = vst [vmem:[#allocation50_spill] sm:$0xff] %v3856_v61 }
 0x3c5   :  { %2039 = vmatpush.msra.mxu2 %v1724_v7  ;;  %1795 = vmatpush.msrb.mxu1 %v1713_v31  ;;  %v3837_v7 = vld [vmem:[#allocation9 + $0xd0] sm:$0xff] }
 0x3c6   :  { %2059 = vmatpush.msra.mxu3 %v1725_v19  ;;  %1774 = vmatpush.msrb.mxu0 %v1715_v62  ;;  %4262 = vst [vmem:[#allocation25_spill] sm:$0xff] %v3837_v7  ;;  %v3841_v19 = vld [vmem:[#allocation9 + $0xb0] sm:$0xff] }
 0x3c7   :  { %2040 = vmatpush.msra.mxu2 %v1721_v9  ;;  %1908 = vmatpush.msra.mxu1 %v3794_v42  ;;  %v3843_v9 = vld [vmem:[#allocation9 + $0xb8] sm:$0xff] }
 0x3c8   :  { %2060 = vmatpush.msra.mxu3 %v1722_v33  ;;  %1775 = vmatpush.msrb.mxu0 %v1712_v63  ;;  %4263 = vst [vmem:[#allocation35_spill] sm:$0xff] %v3843_v9 }
 0x3c9   :  { %2041 = vmatpush.msra.mxu2 %v1718_v45  ;;  %1909 = vmatpush.msra.mxu1 %v3800_v35 }
 0x3ca   :  { %2061 = vmatpush.msra.mxu3 %v1719_v58  ;;  %1888 = vmatpush.msra.mxu0 %v3792_v59  ;;  %v3847_v58 = vld [vmem:[#allocation9 + $0x98] sm:$0xff] }
 0x3cb   :  { %2042 = vmatpush.msra.mxu2 %v1715_v62  ;;  %1910 = vmatpush.msra.mxu1 %v3806_v36  ;;  %v3849_v62 = vld [vmem:[#allocation9 + $0xa0] sm:$0xff] }
 0x3cc   :  { %2062 = vmatpush.msra.mxu3 %v1716_v22  ;;  %1889 = vmatpush.msra.mxu0 %v3798_v3  ;;  %4264 = vst [vmem:[#allocation37_spill] sm:$0xff] %v3849_v62  ;;  %v1529_v22 = vpop.f32.mrf.mxu3 }
 0x3cd   :  { %2043 = vmatpush.msra.mxu2 %v1712_v63  ;;  %1911 = vmatpush.msra.mxu1 %v3812_v57  ;;  %v1530_v63 = vadd.f32 %v1529_v22, %v4255_v49  ;;  %v1711_v22 = vld [vmem:[#allocation3 + $0x30] sm:$0xff]  ;;  %v3866_v49 = vld [vmem:[#allocation9 + $0x50] sm:$0xff] }
 0x3ce   :  { %2063 = vmatpush.msra.mxu3 %v1713_v31  ;;  %1890 = vmatpush.msra.mxu0 %v3804_v28 }
 0x3cf   :  { %1912 = vmatpush.msra.mxu1 %v3818_v54  ;;  %1776 = vmatmul.f32.vlgmr.msrb.gmra.mxu0 %v1711_v22 }
 0x3d0   :  { %1891 = vmatpush.msra.mxu0 %v3810_v29  ;;  %1796 = vmatmul.f32.vlgmr.msrb.gmra.mxu1 %v1711_v22 }
 0x3d1   :  { %1913 = vmatpush.msra.mxu1 %v3824_v23  ;;  %1816 = vmatmul.f32.vlgmr.msrb.gmra.mxu2 %v1711_v22  ;;  %v3884_v23 = vld [vmem:[#allocation9 + $0x10] sm:$0xff] }
 0x3d2   :  { %1892 = vmatpush.msra.mxu0 %v3816_v6  ;;  %2156 = vmatpush.msrb.mxu2 %v3792_v59 }
 0x3d3   :  { %1914 = vmatpush.msra.mxu1 %v3830_v21  ;;  %v3882_v21 = vld [vmem:[#allocation9 + $0x8] sm:$0xff] }
 0x3d4   :  { %1893 = vmatpush.msra.mxu0 %v3822_v32  ;;  %2157 = vmatpush.msrb.mxu2 %v3798_v3 }
 0x3d5   :  { %1915 = vmatpush.msra.mxu1 %v3837_v7  ;;  %v3874_v7 = vld [vmem:[#allocation9 + $0x40] sm:$0xff] }
 0x3d6   :  { %1894 = vmatpush.msra.mxu0 %v3828_v47  ;;  %2158 = vmatpush.msrb.mxu2 %v3804_v28 }
 0x3d7   :  { %1916 = vmatpush.msra.mxu1 %v3843_v9 }
 0x3d8   :  { %1895 = vmatpush.msra.mxu0 %v3835_v10  ;;  %2159 = vmatpush.msrb.mxu2 %v3810_v29 }
 0x3d9   :  { %1917 = vmatpush.msra.mxu1 %v3849_v62  ;;  %v3868_v62 = vld [vmem:[#allocation9 + $0x58] sm:$0xff] }
 0x3da   :  { %1896 = vmatpush.msra.mxu0 %v3841_v19  ;;  %2160 = vmatpush.msrb.mxu2 %v3816_v6 }
 0x3db   :  { %1918 = vmatpush.msra.mxu1 %v3856_v61  ;;  %v3872_v61 = vld [vmem:[#allocation9 + $0x38] sm:$0xff] }
 0x3dc   :  { %1897 = vmatpush.msra.mxu0 %v3847_v58  ;;  %2161 = vmatpush.msrb.mxu2 %v3822_v32 }
 0x3de   :  { %1898 = vmatpush.msra.mxu0 %v3854_v53  ;;  %2162 = vmatpush.msrb.mxu2 %v3828_v47 }
 0x3e0   :  { %2163 = vmatpush.msrb.mxu2 %v3835_v10 }
 0x3e2   :  { %2164 = vmatpush.msrb.mxu2 %v3841_v19 }
 0x3e4   :  { %2165 = vmatpush.msrb.mxu2 %v3847_v58 }
 0x3e6   :  { %2166 = vmatpush.msrb.mxu2 %v3854_v53 }
 0x424   :  { %v1549_v28 = vpop.f32.mrf.mxu0 }
 0x42b   :  { %v1617_v33 = vpop.f32.mrf.mxu1 }
 0x42c   :  { %v1660_v45 = vadd.f32 %v1617_v33, %v1510_v27  ;;  %v3860_v27 = vld [vmem:[#allocation9 + $0x68] sm:$0xff]  ;;  %v3862_v33 = vld [vmem:[#allocation9 + $0x70] sm:$0xff] }
 0x42d   :  { %4266 = vst [vmem:[#allocation26_spill] sm:$0xff] %v3862_v33  ;;  %1899 = vmatpush.msra.mxu0 %v3860_v27  ;;  %1919 = vmatpush.msra.mxu1 %v3862_v33 }
 0x42e   :  { %v2278_v31 = vmul.f32 -1.442695, %v1660_v45  ;;  %2167 = vmatpush.msrb.mxu2 %v3860_v27 }
 0x42f   :  { %1900 = vmatpush.msra.mxu0 %v3866_v49  ;;  %1920 = vmatpush.msra.mxu1 %v3868_v62 }
 0x430   :  { %2344 = vpow2.f32 %v2278_v31  ;;  %2168 = vmatpush.msrb.mxu2 %v3866_v49 }
 0x431   :  { %v1637_v9 = vpop.f32.mrf.mxu2  ;;  %1901 = vmatpush.msra.mxu0 %v3872_v61  ;;  %1921 = vmatpush.msra.mxu1 %v3874_v7 }
 0x432   :  { %v1680_v45 = vadd.f32 %v1637_v9, %v1530_v63  ;;  %v3878_v9 = vld [vmem:[#allocation9 + $0x20] sm:$0xff]  ;;  %v3880_v63 = vld [vmem:[#allocation9 + $0x28] sm:$0xff]  ;;  %2169 = vmatpush.msrb.mxu2 %v3872_v61 }
 0x433   :  { %1902 = vmatpush.msra.mxu0 %v3878_v9  ;;  %1922 = vmatpush.msra.mxu1 %v3880_v63 }
 0x434   :  { %v2279_v31 = vmul.f32 -1.442695, %v1680_v45  ;;  %2170 = vmatpush.msrb.mxu2 %v3878_v9 }
 0x435   :  { %1903 = vmatpush.msra.mxu0 %v3882_v21  ;;  %1923 = vmatpush.msra.mxu1 %v3884_v23 }
 0x436   :  { %v2345_v33 = vpop.eup %2344  ;;  %2346 = vpow2.f32 %v2279_v31  ;;  %2171 = vmatpush.msrb.mxu2 %v3882_v21 }
 0x437   :  { %v1664_v45 = vadd.f32 1.0, %v2345_v33  ;;  %2136 = vmatpush.msrb.mxu1 %v3590_v14  ;;  %2068 = vmatpush.msrb.mxu0 %v3644_v51 }
 0x439   :  { %2348 = vrcp.f32 %v1664_v45  ;;  %2137 = vmatpush.msrb.mxu1 %v3593_v60  ;;  %2069 = vmatpush.msrb.mxu0 %v3660_v5  ;;  %v1676_v51 = vand.u32 2147483648, %v1664_v45  ;;  %v1674_v5 = vand.u32 2147483647, %v1664_v45  ;;  %vm1670_vm9 = vweird.f32 %v1664_v45 }
 0x43b   :  { %2138 = vmatpush.msrb.mxu1 %v3596_v39  ;;  %2070 = vmatpush.msrb.mxu0 %v3662_v46  ;;  %v1657_v46 = vpop.f32.mrf.mxu3  ;;  %vm1675_vm11 = vcmp.eq.f32.partialorder %v1674_v5, 8.507059e+37 }
 0x43c   :  { %v2347_v22 = vpop.eup %2346  ;;  %v1700_v32 = vadd.f32 %v3558_v2, %v1657_v46 }
 0x43d   :  { %v1684_v59 = vadd.f32 1.0, %v2347_v22  ;;  %2139 = vmatpush.msrb.mxu1 %v3599_v4  ;;  %2071 = vmatpush.msrb.mxu0 %v3666_v25 }
 0x43f   :  { %v2349_v3 = vpop.eup %2348  ;;  %2350 = vrcp.f32 %v1684_v59  ;;  %2140 = vmatpush.msrb.mxu1 %v3601_v15  ;;  %2072 = vmatpush.msrb.mxu0 %v3673_v41  ;;  %v1677_v15 = vor.u32 1.1754944e-38, %v1676_v51  ;;  %v1550_v41 = vadd.f32 %v1549_v28, %v3012_v0  ;;  %v1696_v47 = vand.u32 2147483648, %v1684_v59  ;;  %v3968_v28 = vld [vmem:[%s3995_s5] ss:$0 sm:$0xff]  ;;  %s2512_s5 = smov [#allocation11]  }
 0x440   :  { %v1666_v14 = vmul.f32 %v2349_v3, %v1664_v45  ;;  %vm1671_vm8 = vweird.f32 %v2349_v3  ;;  %vm1690_vm13 = vweird.f32 %v1684_v59  ;;  %s2251_s24 = sshll.u32 %s2512_s5, 4  ;;  %s2252_s24 = int_to_ptr.vmem [resolvable:$true] %s2251_s24 }
 0x441   :  { %2141 = vmatpush.msrb.mxu1 %v3605_v18  ;;  %2073 = vmatpush.msrb.mxu0 %v3681_v24  ;;  %vm1672_vm10 = vmor %vm1670_vm9, %vm1671_vm8 }
 0x442   :  { %v1667_v60 = vsub.f32 1.0, %v1666_v14 }
 0x443   :  { %2142 = vmatpush.msrb.mxu1 %v3608_v17  ;;  %2074 = vmatpush.msrb.mxu0 %v3691_v37  ;;  %v1694_v37 = vand.u32 2147483647, %v1684_v59 }
 0x444   :  { %v1668_v39 = vmul.f32 %v2349_v3, %v1667_v60 }
 0x445   :  { %v2351_v4 = vpop.eup %2350  ;;  %2143 = vmatpush.msrb.mxu1 %v3611_v26  ;;  %2075 = vmatpush.msrb.mxu0 %v3701_v44  ;;  %v1697_v26 = vor.u32 1.1754944e-38, %v1696_v47  ;;  %vm1695_vm15 = vcmp.eq.f32.partialorder %v1694_v37, 8.507059e+37 }
 0x446   :  { %v1686_v25 = vmul.f32 %v2351_v4, %v1684_v59  ;;  %v1669_v29 = vadd.f32 %v2349_v3, %v1668_v39  ;;  %vm1691_vm12 = vweird.f32 %v2351_v4 }
 0x447   :  { %2144 = vmatpush.msrb.mxu1 %v3616_v34  ;;  %2076 = vmatpush.msrb.mxu0 %v3711_v55  ;;  %vm1692_vm14 = vmor %vm1690_vm13, %vm1691_vm12 }
 0x448   :  { %v1687_v18 = vsub.f32 1.0, %v1686_v25  ;;  %v1673_v6 = vsel %vm1672_vm10, %v2349_v3, %v1669_v29 }
 0x449   :  { %v1678_v24 = vsel %vm1675_vm11, %v1677_v15, %v1673_v6  ;;  %2145 = vmatpush.msrb.mxu1 %v3619_v56  ;;  %2077 = vmatpush.msrb.mxu0 %v3722_v50  ;;  %v4272_v50 = vld [vmem:[#allocation50_spill] sm:$0xff] }
 0x44a   :  { %v1688_v17 = vmul.f32 %v2351_v4, %v1687_v18  ;;  %v1701_v10 = vmul.f32 %v1700_v32, %v1678_v24 }
 0x44b   :  { %2146 = vmatpush.msrb.mxu1 %v3622_v30  ;;  %2078 = vmatpush.msrb.mxu0 %v3733_v8  ;;  %v4273_v8 = vld [vmem:[#allocation26_spill] sm:$0xff] }
 0x44c   :  { %v1689_v2 = vadd.f32 %v2351_v4, %v1688_v17  ;;  %v1702_v19 = vadd.f32 %v1701_v10, %v1550_v41 }
 0x44d   :  { %2147 = vmatpush.msrb.mxu1 %v3625_v11  ;;  %2079 = vmatpush.msrb.mxu0 %v3747_v1  ;;  %v4267_v11 = vld [vmem:[#allocation24_spill] sm:$0xff]  ;;  %v1777_v1 = vpop.f32.mrf.mxu0 }
 0x44e   :  { %v1693_v44 = vsel %vm1692_vm14, %v2351_v4, %v1689_v2  ;;  %2352 = vtanh.f32 %v1702_v19 }
 0x44f   :  { %v1698_v34 = vsel %vm1695_vm15, %v1697_v26, %v1693_v44  ;;  %2148 = vmatpush.msrb.mxu1 %v3634_v52  ;;  %2080 = vmatpush.msrb.mxu0 %v3756_v20  ;;  %v4268_v52 = vld [vmem:[#allocation34_spill] sm:$0xff]  ;;  %v1797_v20 = vpop.f32.mrf.mxu1 }
 0x450   :  { %v1704_v56 = vsub.f32 1.0, %v1698_v34  ;;  %v1706_v55 = vmul.f32 %v1698_v34, %v3776_v40 }
 0x451   :  { %2149 = vmatpush.msrb.mxu1 %v3639_v43  ;;  %2081 = vmatpush.msrb.mxu0 %v3761_v38  ;;  %v4269_v43 = vld [vmem:[#allocation25_spill] sm:$0xff]  ;;  %v4274_v38 = vld [vmem:[#allocation32_spill] sm:$0xff] }
 0x453   :  { %2150 = vmatpush.msrb.mxu1 %v3642_v13  ;;  %2082 = vmatpush.msrb.mxu0 %v3766_v12  ;;  %v4270_v13 = vld [vmem:[#allocation35_spill] sm:$0xff]  ;;  %v1798_v12 = vadd.f32 %v1797_v20, %v4274_v38 }
 0x454   :  { %v2353_v30 = vpop.eup %2352  ;;  %v1817_v51 = vpop.f32.mrf.mxu2 }
 0x455   :  { %v1705_v49 = vmul.f32 %v2353_v30, %v1704_v56  ;;  %2151 = vmatpush.msrb.mxu1 %v3648_v16  ;;  %2083 = vmatpush.msrb.mxu0 %v3770_v48  ;;  %v4271_v16 = vld [vmem:[#allocation37_spill] sm:$0xff]  ;;  %v1818_v46 = vadd.f32 %v1817_v51, %v3012_v0 }
 0x457   :  { %v3938_v61 = vadd.f32 %v1706_v55, %v1705_v49 }
 0x459   :  { %1709 = vst [vmem:[#allocation11 + $0x28] sm:$0xff] %v3938_v61  ;;  %1884 = vmatmul.f32.vlgmr.msrb.gmra.mxu3 %v3938_v61  ;;  %1904 = vmatmul.f32.vlgmr.msra.gmra.mxu0 %v3938_v61 }
 0x45a   :  { %1924 = vmatmul.f32.vlgmr.msra.gmra.mxu1 %v3938_v61  ;;  %2176 = vmatpush.msrb.mxu3 %v3794_v42  ;;  %v4275_v42 = vld [vmem:[#allocation33_spill] sm:$0xff] }
 0x45c   :  { %2177 = vmatpush.msrb.mxu3 %v3800_v35  ;;  %v1778_v35 = vadd.f32 %v1777_v1, %v4275_v42 }
 0x45e   :  { %2178 = vmatpush.msrb.mxu3 %v3806_v36 }
 0x460   :  { %2179 = vmatpush.msrb.mxu3 %v3812_v57 }
 0x462   :  { %2180 = vmatpush.msrb.mxu3 %v3818_v54 }
 0x464   :  { %2181 = vmatpush.msrb.mxu3 %v4267_v11 }
 0x466   :  { %2182 = vmatpush.msrb.mxu3 %v4268_v52 }
 0x468   :  { %2183 = vmatpush.msrb.mxu3 %v4269_v43 }
 0x46a   :  { %2184 = vmatpush.msrb.mxu3 %v4270_v13 }
 0x46c   :  { %2185 = vmatpush.msrb.mxu3 %v4271_v16 }
 0x46e   :  { %2186 = vmatpush.msrb.mxu3 %v4272_v50 }
 0x470   :  { %2187 = vmatpush.msrb.mxu3 %v4273_v8 }
 0x472   :  { %2188 = vmatpush.msrb.mxu3 %v3868_v62  ;;  %v1979_v62 = vld [vmem:[#allocation3 + $0x38] sm:$0xff] }
 0x473   :  { %2044 = vmatmul.f32.vlgmr.msra.gmra.mxu2 %v1979_v62  ;;  %2064 = vmatmul.f32.vlgmr.msra.gmra.mxu3 %v1979_v62 }
 0x474   :  { %2189 = vmatpush.msrb.mxu3 %v3874_v7  ;;  %2084 = vmatmul.f32.vlgmr.msrb.gmra.mxu0 %v1979_v62 }
 0x476   :  { %2190 = vmatpush.msrb.mxu3 %v3880_v63 }
 0x478   :  { %2191 = vmatpush.msrb.mxu3 %v3884_v23 }
 0x4d6   :  { %v1905_v48 = vpop.f32.mrf.mxu0 }
 0x4d7   :  { %v1948_v40 = vadd.f32 %v1905_v48, %v1798_v12  ;;  %v1925_v60 = vpop.f32.mrf.mxu1 }
 0x4d8   :  { %v1968_v4 = vadd.f32 %v3968_v28, %v1925_v60 }
 0x4d9   :  { %v2281_v36 = vmul.f32 -1.442695, %v1948_v40 }
 0x4db   :  { %2354 = vpow2.f32 %v2281_v36 }
 0x4dc   :  { %v1885_v57 = vpop.f32.mrf.mxu3 }
 0x4dd   :  { %v1928_v54 = vadd.f32 %v1885_v57, %v1778_v35 }
 0x4df   :  { %v2280_v21 = vmul.f32 -1.442695, %v1928_v54 }
 0x4e1   :  { %v2355_v58 = vpop.eup %2354  ;;  %2356 = vpow2.f32 %v2280_v21 }
 0x4e2   :  { %v1952_v7 = vadd.f32 1.0, %v2355_v58 }
 0x4e4   :  { %2358 = vrcp.f32 %v1952_v7  ;;  %v1964_v41 = vand.u32 2147483648, %v1952_v7  ;;  %vm1958_vm5 = vweird.f32 %v1952_v7  ;;  %v1962_v6 = vand.u32 2147483647, %v1952_v7 }
 0x4e6   :  { %v1965_v17 = vor.u32 1.1754944e-38, %v1964_v41  ;;  %vm1963_vm7 = vcmp.eq.f32.partialorder %v1962_v6, 8.507059e+37 }
 0x4e7   :  { %v2357_v23 = vpop.eup %2356 }
 0x4e8   :  { %v1932_v53 = vadd.f32 1.0, %v2357_v23 }
 0x4ea   :  { %2360 = vrcp.f32 %v1932_v53  ;;  %v2359_v27 = vpop.eup %2358  ;;  %v1944_v22 = vand.u32 2147483648, %v1932_v53  ;;  %v1942_v3 = vand.u32 2147483647, %v1932_v53  ;;  %vm1938_vm1 = vweird.f32 %v1932_v53 }
 0x4eb   :  { %v1954_v33 = vmul.f32 %v2359_v27, %v1952_v7  ;;  %vm1959_vm4 = vweird.f32 %v2359_v27 }
 0x4ec   :  { %v1945_v5 = vor.u32 1.1754944e-38, %v1944_v22  ;;  %vm1943_vm3 = vcmp.eq.f32.partialorder %v1942_v3, 8.507059e+37  ;;  %vm1960_vm6 = vmor %vm1958_vm5, %vm1959_vm4 }
 0x4ed   :  { %v1955_v63 = vsub.f32 1.0, %v1954_v33 }
 0x4ef   :  { %v1956_v14 = vmul.f32 %v2359_v27, %v1955_v63 }
 0x4f0   :  { %v2361_v31 = vpop.eup %2360 }
 0x4f1   :  { %v1934_v9 = vmul.f32 %v2361_v31, %v1932_v53  ;;  %vm1939_vm0 = vweird.f32 %v2361_v31  ;;  %v1957_v15 = vadd.f32 %v2359_v27, %v1956_v14 }
 0x4f2   :  { %vm1940_vm2 = vmor %vm1938_vm1, %vm1939_vm0 }
 0x4f3   :  { %v1935_v45 = vsub.f32 1.0, %v1934_v9  ;;  %v1961_v24 = vsel %vm1960_vm6, %v2359_v27, %v1957_v15 }
 0x4f4   :  { %v1966_v47 = vsel %vm1963_vm7, %v1965_v17, %v1961_v24 }
 0x4f5   :  { %v1936_v59 = vmul.f32 %v2361_v31, %v1935_v45  ;;  %v1972_v10 = vsub.f32 1.0, %v1966_v47  ;;  %v1974_v19 = vmul.f32 %v1966_v47, %v3938_v61 }
 0x4f6   :  { %v2045_v44 = vpop.f32.mrf.mxu2  ;;  %v2065_v49 = vpop.f32.mrf.mxu3 }
 0x4f7   :  { %v1937_v39 = vadd.f32 %v2361_v31, %v1936_v59  ;;  %v2046_v34 = vadd.f32 %v2045_v44, %v4275_v42  ;;  %v2066_v55 = vadd.f32 %v2065_v49, %v4274_v38  ;;  %v2085_v38 = vpop.f32.mrf.mxu0 }
 0x4f8   :  { %v2086_v58 = vadd.f32 %v2085_v38, %v3012_v0 }
 0x4f9   :  { %v1941_v25 = vsel %vm1940_vm2, %v2361_v31, %v1937_v39 }
 0x4fa   :  { %v1946_v29 = vsel %vm1943_vm3, %v1945_v5, %v1941_v25 }
 0x4fb   :  { %v1969_v18 = vmul.f32 %v1968_v4, %v1946_v29 }
 0x4fd   :  { %v1970_v32 = vadd.f32 %v1969_v18, %v1818_v46 }
 0x4ff   :  { %2362 = vtanh.f32 %v1970_v32 }
 0x505   :  { %v2363_v37 = vpop.eup %2362 }
 0x506   :  { %v1973_v2 = vmul.f32 %v2363_v37, %v1972_v10 }
 0x508   :  { %v3973_v26 = vadd.f32 %v1974_v19, %v1973_v2 }
 0x50a   :  { %1977 = vst [vmem:[#allocation11 + $0x30] sm:$0xff] %v3973_v26  ;;  %2152 = vmatmul.f32.vlgmr.msrb.gmra.mxu1 %v3973_v26  ;;  %2172 = vmatmul.f32.vlgmr.msrb.gmra.mxu2 %v3973_v26 }
 0x50b   :  { %2192 = vmatmul.f32.vlgmr.msrb.gmra.mxu3 %v3973_v26 }
 0x587   :  { %v2153_v56 = vpop.f32.mrf.mxu1 }
 0x588   :  { %v2196_v30 = vadd.f32 %v2153_v56, %v2046_v34 }
 0x58a   :  { %v2282_v11 = vmul.f32 -1.442695, %v2196_v30 }
 0x58c   :  { %2364 = vpow2.f32 %v2282_v11 }
 0x58d   :  { %v2173_v61 = vpop.f32.mrf.mxu2 }
 0x58e   :  { %v2216_v52 = vadd.f32 %v2173_v61, %v2066_v55  ;;  %v2193_v36 = vpop.f32.mrf.mxu3 }
 0x58f   :  { %v2236_v23 = vadd.f32 %v3968_v28, %v2193_v36 }
 0x590   :  { %v2283_v43 = vmul.f32 -1.442695, %v2216_v52 }
 0x592   :  { %v2365_v13 = vpop.eup %2364  ;;  %2366 = vpow2.f32 %v2283_v43 }
 0x593   :  { %v2200_v16 = vadd.f32 1.0, %v2365_v13 }
 0x595   :  { %2368 = vrcp.f32 %v2200_v16  ;;  %v2212_v48 = vand.u32 2147483648, %v2200_v16  ;;  %v2210_v42 = vand.u32 2147483647, %v2200_v16  ;;  %vm2206_vm9 = vweird.f32 %v2200_v16 }
 0x597   :  { %v2213_v21 = vor.u32 1.1754944e-38, %v2212_v48  ;;  %vm2211_vm11 = vcmp.eq.f32.partialorder %v2210_v42, 8.507059e+37 }
 0x598   :  { %v2367_v50 = vpop.eup %2366 }
 0x599   :  { %v2220_v8 = vadd.f32 1.0, %v2367_v50 }
 0x59b   :  { %v2369_v1 = vpop.eup %2368  ;;  %2370 = vrcp.f32 %v2220_v8  ;;  %v2232_v33 = vand.u32 2147483648, %v2220_v8  ;;  %v2230_v9 = vand.u32 2147483647, %v2220_v8  ;;  %vm2226_vm13 = vweird.f32 %v2220_v8 }
 0x59c   :  { %v2202_v20 = vmul.f32 %v2369_v1, %v2200_v16  ;;  %vm2207_vm8 = vweird.f32 %v2369_v1 }
 0x59d   :  { %vm2208_vm10 = vmor %vm2206_vm9, %vm2207_vm8  ;;  %v2233_v22 = vor.u32 1.1754944e-38, %v2232_v33  ;;  %vm2231_vm15 = vcmp.eq.f32.partialorder %v2230_v9, 8.507059e+37 }
 0x59e   :  { %v2203_v12 = vsub.f32 1.0, %v2202_v20 }
 0x5a0   :  { %v2204_v40 = vmul.f32 %v2369_v1, %v2203_v12 }
 0x5a1   :  { %v2371_v35 = vpop.eup %2370 }
 0x5a2   :  { %v2222_v57 = vmul.f32 %v2371_v35, %v2220_v8  ;;  %v2205_v54 = vadd.f32 %v2369_v1, %v2204_v40  ;;  %vm2227_vm12 = vweird.f32 %v2371_v35 }
 0x5a3   :  { %vm2228_vm14 = vmor %vm2226_vm13, %vm2227_vm12 }
 0x5a4   :  { %v2223_v7 = vsub.f32 1.0, %v2222_v57  ;;  %v2209_v62 = vsel %vm2208_vm10, %v2369_v1, %v2205_v54 }
 0x5a5   :  { %v2214_v53 = vsel %vm2211_vm11, %v2213_v21, %v2209_v62 }
 0x5a6   :  { %v2224_v27 = vmul.f32 %v2371_v35, %v2223_v7  ;;  %v2237_v31 = vmul.f32 %v2236_v23, %v2214_v53 }
 0x5a8   :  { %v2225_v63 = vadd.f32 %v2371_v35, %v2224_v27  ;;  %v2238_v45 = vadd.f32 %v2237_v31, %v2086_v58 }
 0x5aa   :  { %v2229_v59 = vsel %vm2228_vm14, %v2371_v35, %v2225_v63  ;;  %2372 = vtanh.f32 %v2238_v45 }
 0x5ab   :  { %v2234_v0 = vsel %vm2231_vm15, %v2233_v22, %v2229_v59 }
 0x5ac   :  { %v2240_v3 = vsub.f32 1.0, %v2234_v0  ;;  %v2242_v51 = vmul.f32 %v2234_v0, %v3973_v26 }
 0x5b0   :  { %v2373_v14 = vpop.eup %2372 }
 0x5b1   :  { %v2241_v60 = vmul.f32 %v2373_v14, %v2240_v3 }
 0x5b3   :  { %v2243_v39 = vadd.f32 %v2242_v51, %v2241_v60 }
 0x5b5   :  { %2245 = vst [vmem:[#allocation11 + $0x38] sm:$0xff] %v2243_v39 }
 0x5b6   :  { %2259 = dma.vmem_to_hbm [thread:$0]  %s2252_s24, 1024, %s2254_s27, [#allocation5], %s2506_s7, %s2506_s7, %s2507_s8  }
 0x5b7   :  { %2502 = dma.done.wait [#allocation5], 1024  }
 0x5b8   :  { %2503 = vsyncadd [#allocation5], 4294966272 }
 0x5b9   :  { %2264 = vsyncpa [#allocation4], 1 }
 0x5ba   :  { %2265 = vsyncpa [#allocation7], 1 }
 0x5bb   :  { %2266 = vsyncpa [#allocation10], 1 }
 0x5bc   :  { %2267 = vsyncpa [#allocation5], 1 }

</bundles_post_ra>
